<compile_context>
chip_gen: v5e
topology: v5e:2x2
jax: 0.10.0
libtpu: 0.0.40
codegen_flags: <defaults>
</compile_context>

<pallas_src>
import numpy as np
import jax
import jax.numpy as jnp
from jax import lax
from jax.experimental import pallas as pl
from jax.experimental.pallas import tpu as pltpu

# ----- hparams-like configuration (small, deterministic) -----
NUM_PARTS = 16            # num_class / num_parts
INP_SHAPE = (16, 16)      # (W, H) as in hparams.MODEL.INP_SHAPE
OUT_SHAPE = (16, 16)      # (W, H); predictor output_shape = OUT_SHAPE[::-1]
EARLY_PREDICTOR_SIZE = [(256, 2), (256, 4)]   # (inplanes, inshape_factor)
STEM_CH = 256


# ---------------- operator construction (init-time numpy) ----------------

def bilinear_matrix(n_in, n_out):
    """1-D bilinear interpolation matrix (n_out, n_in), align_corners=True."""
    M = np.zeros((n_out, n_in), np.float32)
    if n_in == 1 or n_out == 1:
        M[:, 0] = 1.0
        return M
    scale = (n_in - 1) / (n_out - 1)
    for o in range(n_out):
        src = o * scale
        i0 = min(int(np.floor(src)), n_in - 1)
        i1 = min(i0 + 1, n_in - 1)
        frac = src - i0
        M[o, i0] += 1.0 - frac
        M[o, i1] += frac
    return M


def shift_matrix(h, w, dh, dw):
    """(h*w, h*w) 0/1 matrix: (x @ S)[:, ho*w+wo] = x[:, (ho+dh)*w + (wo+dw)] or 0."""
    S = np.zeros((h * w, h * w), np.float32)
    for ho in range(h):
        for wo in range(w):
            hs, ws = ho + dh, wo + dw
            if 0 <= hs < h and 0 <= ws < w:
                S[hs * w + ws, ho * w + wo] = 1.0
    return S


def build_upsample_dw_operator(hin, win, hout, wout):
    """Fold bilinear upsample + the 9 depthwise-conv spatial shifts into ONE
    vertically stacked operator (9*hin*win, hout*wout); row block t = kh*3+kw."""
    Mh = bilinear_matrix(hin, hout)            # (hout, hin)
    Mw = bilinear_matrix(win, wout)            # (wout, win)
    U = np.kron(Mh, Mw)                        # (hout*wout, hin*win)
    blocks = [U.T @ shift_matrix(hout, wout, dh, dw)
              for dh in (-1, 0, 1) for dw in (-1, 0, 1)]
    return np.concatenate(blocks, axis=0).astype(np.float32)


# ---------------- fused Pallas kernel ----------------

def controller_kernel(x_cm_ref, stem_wt_ref, stem_w_ref, xsub0_ref, xsub1_ref,
                      w1f0_ref, ct0_ref, w20_ref, b0_ref,
                      w1f1_ref, ct1_ref, w21_ref, b1_ref,
                      out_ref, e0_ref, e1_ref,
                      fpad0_ref, fpad1_ref):
    # One grid step == one batch element (grid axis is "parallel" for v7x).
    cin = x_cm_ref.shape[1]

    # ---- main-model stem (synthetic stand-in), accumulated directly in NCHW
    #      orientation: 4 VPU broadcast-FMAs, no XLU transpose. ----
    acc = stem_wt_ref[:, 0:1] * x_cm_ref[0, 0:1, :]
    for c in range(1, cin):
        acc = acc + stem_wt_ref[:, c:c + 1] * x_cm_ref[0, c:c + 1, :]
    out_ref[0] = acc                                        # (256, H*W)

    # ---- fused early Predictor ----
    def predictor(xsub_ref, fpad_ref, w1f_ref, ct_ref, w2_ref, b_ref, e_ref):
        hs = fpad_ref.shape[0] - 2
        ws = fpad_ref.shape[1] - 2
        hws = hs * ws
        cch = stem_w_ref.shape[1]                           # 256
        # stem at the sub-sampled positions -> (HWs, 256); feature stays in VMEM.
        fs = xsub_ref[0, :, 0:1] * stem_w_ref[0:1, :]
        for c in range(1, cin):
            fs = fs + xsub_ref[0, :, c:c + 1] * stem_w_ref[c:c + 1, :]
        # conv1 padding (pad=1) done in-kernel into a zeroed VMEM scratch.
        fpad_ref[...] = jnp.zeros(fpad_ref.shape, jnp.float32)
        for h in range(hs):
            fpad_ref[h + 1, 1:ws + 1, :] = fs[h * ws:(h + 1) * ws, :]
        # im2col (HWs, 9*256) and ONE deep-contraction conv1 matmul -> (K, HWs).
        taps = [fpad_ref[kh:kh + hs, kw:kw + ws, :].reshape(hws, cch)
                for kh in range(3) for kw in range(3)]
        a = jnp.concatenate(taps, axis=1)                   # (HWs, 2304)
        yt = lax.dot_general(w1f_ref[...], a, (((1,), (1,)), ((), ())),
                             preferred_element_type=jnp.float32)     # (K, HWs)
        # Upsample(align_corners) + depthwise conv3x3 folded: per-tap VPU scale,
        # lane-concat, then ONE matmul over the stacked 9*HWs contraction.
        ytw = jnp.concatenate([w2_ref[:, t:t + 1] * yt for t in range(9)],
                              axis=1)                       # (K, 9*HWs)
        z = jnp.dot(ytw, ct_ref[...],
                    preferred_element_type=jnp.float32) + b_ref[...]  # (K, 256)
        # TODO(synk): OffsetBlock (LEARNABLE_OFFSET.USE_IN_PREDICTOR) assumed disabled.
        e_ref[0] = z

    predictor(xsub0_ref, fpad0_ref, w1f0_ref, ct0_ref, w20_ref, b0_ref, e0_ref)
    predictor(xsub1_ref, fpad1_ref, w1f1_ref, ct1_ref, w21_ref, b1_ref, e1_ref)


# ---------------- forward pass (single pallas_call) ----------------

def controller_forward(params, x):
    # TODO(synk): the real HRNet main_model is external to Controller; a synthetic
    # pointwise 4->256 stem stands in for it and also supplies the 256-channel
    # features the real model stashes in globalvars.pre_early_predictor_outs.
    n, cin, h, w = x.shape
    hw = h * w
    hout, wout = OUT_SHAPE[1], OUT_SHAPE[0]
    hwout = hout * wout
    p0, p1 = params['predictors']
    k = p0['w1flat'].shape[0]

    f0 = EARLY_PREDICTOR_SIZE[0][1]
    f1 = EARLY_PREDICTOR_SIZE[1][1]
    hs0, ws0 = h // f0, w // f0
    hs1, ws1 = h // f1, w // f1

    # Tiny (<8 KB) input-side reshapes/slices of the 4-channel x.
    x_cm = x.reshape(n, cin, hw)                                 # NCHW flattened
    x_nhwc = jnp.transpose(x, (0, 2, 3, 1))
    xsub0 = x_nhwc[:, ::f0, ::f0, :].reshape(n, hs0 * ws0, cin)
    xsub1 = x_nhwc[:, ::f1, ::f1, :].reshape(n, hs1 * ws1, cin)

    out, e0, e1 = pl.pallas_call(
        controller_kernel,
        out_shape=[jax.ShapeDtypeStruct((n, STEM_CH, hw), jnp.float32),
                   jax.ShapeDtypeStruct((n, k, hwout), jnp.float32),
                   jax.ShapeDtypeStruct((n, k, hwout), jnp.float32)],
        grid=(n,),
        in_specs=[
            pl.BlockSpec((1, cin, hw), lambda i: (i, 0, 0)),            # x_cm
            pl.BlockSpec((STEM_CH, cin), lambda i: (0, 0)),             # stem_wt
            pl.BlockSpec((cin, STEM_CH), lambda i: (0, 0)),             # stem_w
            pl.BlockSpec((1, hs0 * ws0, cin), lambda i: (i, 0, 0)),     # xsub0
            pl.BlockSpec((1, hs1 * ws1, cin), lambda i: (i, 0, 0)),     # xsub1
            pl.BlockSpec((k, 9 * STEM_CH), lambda i: (0, 0)),           # w1flat 0
            pl.BlockSpec((9 * hs0 * ws0, hwout), lambda i: (0, 0)),     # ct 0
            pl.BlockSpec((k, 9), lambda i: (0, 0)),                     # w2 0
            pl.BlockSpec((k, 1), lambda i: (0, 0)),                     # b 0
            pl.BlockSpec((k, 9 * STEM_CH), lambda i: (0, 0)),           # w1flat 1
            pl.BlockSpec((9 * hs1 * ws1, hwout), lambda i: (0, 0)),     # ct 1
            pl.BlockSpec((k, 9), lambda i: (0, 0)),                     # w2 1
            pl.BlockSpec((k, 1), lambda i: (0, 0)),                     # b 1
        ],
        out_specs=[
            pl.BlockSpec((1, STEM_CH, hw), lambda i: (i, 0, 0)),
            pl.BlockSpec((1, k, hwout), lambda i: (i, 0, 0)),
            pl.BlockSpec((1, k, hwout), lambda i: (i, 0, 0)),
        ],
        scratch_shapes=[pltpu.VMEM((hs0 + 2, ws0 + 2, STEM_CH), jnp.float32),
                        pltpu.VMEM((hs1 + 2, ws1 + 2, STEM_CH), jnp.float32)],
        compiler_params=pltpu.CompilerParams(dimension_semantics=("parallel",)),
    )(x_cm, params['stem_wt'], params['stem_w'], xsub0, xsub1,
      p0['w1flat'], p0['ct'], p0['w2'], p0['b2'],
      p1['w1flat'], p1['ct'], p1['w2'], p1['b2'])

    out = out.reshape(n, STEM_CH, h, w)                      # NCHW main output
    early = [e0.reshape(n, k, hout, wout), e1.reshape(n, k, hout, wout)]
    return out, early


# ---------------- params (kernel-ready layouts, no per-forward prep) ----------------

def init_params(key):
    keys = jax.random.split(key, 1 + 3 * len(EARLY_PREDICTOR_SIZE))
    stem_w = 0.1 * jax.random.normal(keys[0], (4, STEM_CH), jnp.float32)
    params = {'stem_w': stem_w, 'stem_wt': stem_w.T, 'predictors': []}
    h, w = INP_SHAPE[1], INP_SHAPE[0]
    hout, wout = OUT_SHAPE[1], OUT_SHAPE[0]
    for i, (_, f) in enumerate(EARLY_PREDICTOR_SIZE):
        k1, k2, k3 = keys[1 + 3 * i: 4 + 3 * i]
        hs, ws = h // f, w // f
        params['predictors'].append({
            # conv1 weight, deep-contraction layout:
            #   w1flat[k, (kh*3+kw)*256 + c] == torch_conv1.weight[k, c, kh, kw]
            'w1flat': 0.05 * jax.random.normal(k1, (NUM_PARTS, 9 * STEM_CH),
                                               jnp.float32),
            # depthwise weight (K, 9), column t = kh*3+kw; bias (K, 1)
            'w2': 0.2 * jax.random.normal(k2, (NUM_PARTS, 9), jnp.float32),
            'b2': 0.1 * jax.random.normal(k3, (NUM_PARTS, 1), jnp.float32),
            # folded upsample(align_corners) + per-tap shift operators, stacked
            'ct': jnp.asarray(build_upsample_dw_operator(hs, ws, hout, wout)),
        })
    return params


# ---------------- pure-JAX reference (sanity check) ----------------

def ref_predictor(p, f_nhwc, out_hw):
    N, Hin, Win, Cin = f_nhwc.shape
    K = p['w1flat'].shape[0]
    Hout, Wout = out_hw
    w1 = jnp.transpose(p['w1flat'].reshape(K, 3, 3, Cin), (1, 2, 3, 0))   # HWIO
    y = lax.conv_general_dilated(f_nhwc, w1, (1, 1), 'SAME',
                                 dimension_numbers=('NHWC', 'HWIO', 'NHWC'),
                                 precision=lax.Precision.HIGHEST)
    if (Hin, Win) != (Hout, Wout):
        Mh = jnp.asarray(bilinear_matrix(Hin, Hout))
        Mw = jnp.asarray(bilinear_matrix(Win, Wout))
        y = jnp.einsum('oh,nhwk->nowk', Mh, y, precision=lax.Precision.HIGHEST)
        y = jnp.einsum('ow,nhwk->nhok', Mw, y, precision=lax.Precision.HIGHEST)
    w2 = jnp.transpose(p['w2'], (1, 0)).reshape(3, 3, K)[:, :, None, :]   # (3,3,1,K)
    z = lax.conv_general_dilated(y, w2, (1, 1), 'SAME',
                                 dimension_numbers=('NHWC', 'HWIO', 'NHWC'),
                                 feature_group_count=K,
                                 precision=lax.Precision.HIGHEST)
    z = z + p['b2'].reshape(K)
    return jnp.transpose(z, (0, 3, 1, 2))


def ref_controller(params, x_nchw):
    N, C, H, W = x_nchw.shape
    x_nhwc = jnp.transpose(x_nchw, (0, 2, 3, 1))
    feat = jnp.einsum('nhwc,cd->nhwd', x_nhwc, params['stem_w'],
                      precision=lax.Precision.HIGHEST)
    out = jnp.transpose(feat, (0, 3, 1, 2))
    out_hw = (OUT_SHAPE[1], OUT_SHAPE[0])
    early = [ref_predictor(p, feat[:, ::f, ::f, :], out_hw)
             for p, (_, f) in zip(params['predictors'], EARLY_PREDICTOR_SIZE)]
    return out, early


if __name__ == "__main__":
    key = jax.random.PRNGKey(0)
    pkey, xkey = jax.random.split(key)
    params = init_params(pkey)
    # PyTorch-style NCHW input: (batch=2, channels=4, H=16, W=16)
    x = jax.random.normal(xkey, (2, 4, INP_SHAPE[1], INP_SHAPE[0]), jnp.float32)

    fwd = jax.jit(controller_forward)
    out, early = fwd(params, x)
    out = jax.block_until_ready(out)
    early = jax.block_until_ready(early)

    # sanity check against a pure-JAX/XLA reference
    ref_out, ref_early = ref_controller(params, x)
    assert out.shape == (2, 256, 16, 16)
    assert all(e.shape == (2, NUM_PARTS, 16, 16) for e in early)
    assert np.allclose(np.asarray(out), np.asarray(ref_out), atol=1e-4, rtol=1e-4)
    for e, r in zip(early, ref_early):
        assert np.allclose(np.asarray(e), np.asarray(r), atol=1e-4, rtol=1e-4)

    print("KERNEL_OK")
</pallas_src>

<mosaic_0001>
module attributes {stable_mosaic.version = 11 : i64} {
  func.func @controller_kernel(%arg0: i32, %arg1: memref<1x4x256xf32, #tpu.memory_space<vmem>>, %arg2: memref<256x4xf32, #tpu.memory_space<vmem>>, %arg3: memref<4x256xf32, #tpu.memory_space<vmem>>, %arg4: memref<1x64x4xf32, #tpu.memory_space<vmem>>, %arg5: memref<1x16x4xf32, #tpu.memory_space<vmem>>, %arg6: memref<16x2304xf32, #tpu.memory_space<vmem>>, %arg7: memref<576x256xf32, #tpu.memory_space<vmem>>, %arg8: memref<16x9xf32, #tpu.memory_space<vmem>>, %arg9: memref<16x1xf32, #tpu.memory_space<vmem>>, %arg10: memref<16x2304xf32, #tpu.memory_space<vmem>>, %arg11: memref<144x256xf32, #tpu.memory_space<vmem>>, %arg12: memref<16x9xf32, #tpu.memory_space<vmem>>, %arg13: memref<16x1xf32, #tpu.memory_space<vmem>>, %arg14: memref<1x256x256xf32, #tpu.memory_space<vmem>>, %arg15: memref<1x16x256xf32, #tpu.memory_space<vmem>>, %arg16: memref<1x16x256xf32, #tpu.memory_space<vmem>>, %arg17: memref<10x10x256xf32, #tpu.memory_space<vmem>>, %arg18: memref<6x6x256xf32, #tpu.memory_space<vmem>>) attributes {dimension_semantics = [#tpu.dimension_semantics<parallel>], iteration_bounds = array<i64: 2>, scalar_prefetch = 0 : i64, scratch_operands = 2 : i64, tpu.core_type = #tpu.core_type<tc>, window_params = [{transform_indices = @transform_0, window_bounds = array<i64: 1, 4, 256>}, {pipeline_mode = #tpu.pipeline_mode<synchronous>, transform_indices = @transform_1, window_bounds = array<i64: 256, 4>}, {pipeline_mode = #tpu.pipeline_mode<synchronous>, transform_indices = @transform_2, window_bounds = array<i64: 4, 256>}, {transform_indices = @transform_3, window_bounds = array<i64: 1, 64, 4>}, {transform_indices = @transform_4, window_bounds = array<i64: 1, 16, 4>}, {pipeline_mode = #tpu.pipeline_mode<synchronous>, transform_indices = @transform_5, window_bounds = array<i64: 16, 2304>}, {pipeline_mode = #tpu.pipeline_mode<synchronous>, transform_indices = @transform_6, window_bounds = array<i64: 576, 256>}, {pipeline_mode = #tpu.pipeline_mode<synchronous>, transform_indices = @transform_7, window_bounds = array<i64: 16, 9>}, {pipeline_mode = #tpu.pipeline_mode<synchronous>, transform_indices = @transform_8, window_bounds = array<i64: 16, 1>}, {pipeline_mode = #tpu.pipeline_mode<synchronous>, transform_indices = @transform_9, window_bounds = array<i64: 16, 2304>}, {pipeline_mode = #tpu.pipeline_mode<synchronous>, transform_indices = @transform_10, window_bounds = array<i64: 144, 256>}, {pipeline_mode = #tpu.pipeline_mode<synchronous>, transform_indices = @transform_11, window_bounds = array<i64: 16, 9>}, {pipeline_mode = #tpu.pipeline_mode<synchronous>, transform_indices = @transform_12, window_bounds = array<i64: 16, 1>}, {transform_indices = @transform_13, window_bounds = array<i64: 1, 256, 256>}, {transform_indices = @transform_14, window_bounds = array<i64: 1, 16, 256>}, {transform_indices = @transform_15, window_bounds = array<i64: 1, 16, 256>}]} {
    %c0 = arith.constant 0 : index
    %c0_0 = arith.constant 0 : index
    %0 = vector.load %arg2[%c0, %c0_0] : memref<256x4xf32, #tpu.memory_space<vmem>>, vector<256x1xf32>
    %c0_1 = arith.constant 0 : index
    %c0_2 = arith.constant 0 : index
    %c0_3 = arith.constant 0 : index
    %1 = vector.load %arg1[%c0_1, %c0_2, %c0_3] : memref<1x4x256xf32, #tpu.memory_space<vmem>>, vector<1x1x256xf32>
    %2 = vector.shape_cast %1 : vector<1x1x256xf32> to vector<1x256xf32>
    %3 = vector.broadcast %0 : vector<256x1xf32> to vector<256x256xf32>
    %4 = vector.broadcast %2 : vector<1x256xf32> to vector<256x256xf32>
    %5 = arith.mulf %3, %4 : vector<256x256xf32>
    %c0_4 = arith.constant 0 : index
    %c1 = arith.constant 1 : index
    %6 = vector.load %arg2[%c0_4, %c1] : memref<256x4xf32, #tpu.memory_space<vmem>>, vector<256x1xf32>
    %c0_5 = arith.constant 0 : index
    %c1_6 = arith.constant 1 : index
    %c0_7 = arith.constant 0 : index
    %7 = vector.load %arg1[%c0_5, %c1_6, %c0_7] : memref<1x4x256xf32, #tpu.memory_space<vmem>>, vector<1x1x256xf32>
    %8 = vector.shape_cast %7 : vector<1x1x256xf32> to vector<1x256xf32>
    %9 = vector.broadcast %6 : vector<256x1xf32> to vector<256x256xf32>
    %10 = vector.broadcast %8 : vector<1x256xf32> to vector<256x256xf32>
    %11 = arith.mulf %9, %10 : vector<256x256xf32>
    %12 = arith.addf %5, %11 : vector<256x256xf32>
    %c0_8 = arith.constant 0 : index
    %c2 = arith.constant 2 : index
    %13 = vector.load %arg2[%c0_8, %c2] : memref<256x4xf32, #tpu.memory_space<vmem>>, vector<256x1xf32>
    %c0_9 = arith.constant 0 : index
    %c2_10 = arith.constant 2 : index
    %c0_11 = arith.constant 0 : index
    %14 = vector.load %arg1[%c0_9, %c2_10, %c0_11] : memref<1x4x256xf32, #tpu.memory_space<vmem>>, vector<1x1x256xf32>
    %15 = vector.shape_cast %14 : vector<1x1x256xf32> to vector<1x256xf32>
    %16 = vector.broadcast %13 : vector<256x1xf32> to vector<256x256xf32>
    %17 = vector.broadcast %15 : vector<1x256xf32> to vector<256x256xf32>
    %18 = arith.mulf %16, %17 : vector<256x256xf32>
    %19 = arith.addf %12, %18 : vector<256x256xf32>
    %c0_12 = arith.constant 0 : index
    %c3 = arith.constant 3 : index
    %20 = vector.load %arg2[%c0_12, %c3] : memref<256x4xf32, #tpu.memory_space<vmem>>, vector<256x1xf32>
    %c0_13 = arith.constant 0 : index
    %c3_14 = arith.constant 3 : index
    %c0_15 = arith.constant 0 : index
    %21 = vector.load %arg1[%c0_13, %c3_14, %c0_15] : memref<1x4x256xf32, #tpu.memory_space<vmem>>, vector<1x1x256xf32>
    %22 = vector.shape_cast %21 : vector<1x1x256xf32> to vector<1x256xf32>
    %23 = vector.broadcast %20 : vector<256x1xf32> to vector<256x256xf32>
    %24 = vector.broadcast %22 : vector<1x256xf32> to vector<256x256xf32>
    %25 = arith.mulf %23, %24 : vector<256x256xf32>
    %26 = arith.addf %19, %25 : vector<256x256xf32>
    %c0_16 = arith.constant 0 : index
    %c0_17 = arith.constant 0 : index
    %c0_18 = arith.constant 0 : index
    %27 = vector.load %arg14[%c0_16, %c0_17, %c0_18] : memref<1x256x256xf32, #tpu.memory_space<vmem>>, vector<1x256x256xf32>
    %28 = vector.shape_cast %27 : vector<1x256x256xf32> to vector<256x256xf32>
    %29 = vector.shape_cast %26 : vector<256x256xf32> to vector<1x256x256xf32>
    tpu.vector_store %arg14[%c0_16, %c0_17, %c0_18], %29 {strides = array<i32>} : memref<1x256x256xf32, #tpu.memory_space<vmem>>, vector<1x256x256xf32>,
    %c0_19 = arith.constant 0 : index
    %c0_20 = arith.constant 0 : index
    %c0_21 = arith.constant 0 : index
    %30 = vector.load %arg4[%c0_19, %c0_20, %c0_21] : memref<1x64x4xf32, #tpu.memory_space<vmem>>, vector<1x64x1xf32>
    %31 = vector.shape_cast %30 : vector<1x64x1xf32> to vector<64x1xf32>
    %c0_22 = arith.constant 0 : index
    %c0_23 = arith.constant 0 : index
    %32 = vector.load %arg3[%c0_22, %c0_23] : memref<4x256xf32, #tpu.memory_space<vmem>>, vector<1x256xf32>
    %33 = vector.broadcast %31 : vector<64x1xf32> to vector<64x256xf32>
    %34 = vector.broadcast %32 : vector<1x256xf32> to vector<64x256xf32>
    %35 = arith.mulf %33, %34 : vector<64x256xf32>
    %c0_24 = arith.constant 0 : index
    %c0_25 = arith.constant 0 : index
    %c1_26 = arith.constant 1 : index
    %36 = vector.load %arg4[%c0_24, %c0_25, %c1_26] : memref<1x64x4xf32, #tpu.memory_space<vmem>>, vector<1x64x1xf32>
    %37 = vector.shape_cast %36 : vector<1x64x1xf32> to vector<64x1xf32>
    %c1_27 = arith.constant 1 : index
    %c0_28 = arith.constant 0 : index
    %38 = vector.load %arg3[%c1_27, %c0_28] : memref<4x256xf32, #tpu.memory_space<vmem>>, vector<1x256xf32>
    %39 = vector.broadcast %37 : vector<64x1xf32> to vector<64x256xf32>
    %40 = vector.broadcast %38 : vector<1x256xf32> to vector<64x256xf32>
    %41 = arith.mulf %39, %40 : vector<64x256xf32>
    %42 = arith.addf %35, %41 : vector<64x256xf32>
    %c0_29 = arith.constant 0 : index
    %c0_30 = arith.constant 0 : index
    %c2_31 = arith.constant 2 : index
    %43 = vector.load %arg4[%c0_29, %c0_30, %c2_31] : memref<1x64x4xf32, #tpu.memory_space<vmem>>, vector<1x64x1xf32>
    %44 = vector.shape_cast %43 : vector<1x64x1xf32> to vector<64x1xf32>
    %c2_32 = arith.constant 2 : index
    %c0_33 = arith.constant 0 : index
    %45 = vector.load %arg3[%c2_32, %c0_33] : memref<4x256xf32, #tpu.memory_space<vmem>>, vector<1x256xf32>
    %46 = vector.broadcast %44 : vector<64x1xf32> to vector<64x256xf32>
    %47 = vector.broadcast %45 : vector<1x256xf32> to vector<64x256xf32>
    %48 = arith.mulf %46, %47 : vector<64x256xf32>
    %49 = arith.addf %42, %48 : vector<64x256xf32>
    %c0_34 = arith.constant 0 : index
    %c0_35 = arith.constant 0 : index
    %c3_36 = arith.constant 3 : index
    %50 = vector.load %arg4[%c0_34, %c0_35, %c3_36] : memref<1x64x4xf32, #tpu.memory_space<vmem>>, vector<1x64x1xf32>
    %51 = vector.shape_cast %50 : vector<1x64x1xf32> to vector<64x1xf32>
    %c3_37 = arith.constant 3 : index
    %c0_38 = arith.constant 0 : index
    %52 = vector.load %arg3[%c3_37, %c0_38] : memref<4x256xf32, #tpu.memory_space<vmem>>, vector<1x256xf32>
    %53 = vector.broadcast %51 : vector<64x1xf32> to vector<64x256xf32>
    %54 = vector.broadcast %52 : vector<1x256xf32> to vector<64x256xf32>
    %55 = arith.mulf %53, %54 : vector<64x256xf32>
    %56 = arith.addf %49, %55 : vector<64x256xf32>
    %cst = arith.constant 0.000000e+00 : f32
    %57 = vector.broadcast %cst : f32 to vector<10x10x256xf32>
    %c0_39 = arith.constant 0 : index
    %c0_40 = arith.constant 0 : index
    %c0_41 = arith.constant 0 : index
    %58 = vector.load %arg17[%c0_39, %c0_40, %c0_41] : memref<10x10x256xf32, #tpu.memory_space<vmem>>, vector<10x10x256xf32>
    tpu.vector_store %arg17[%c0_39, %c0_40, %c0_41], %57 {strides = array<i32>} : memref<10x10x256xf32, #tpu.memory_space<vmem>>, vector<10x10x256xf32>,
    %59 = vector.extract_strided_slice %56 {offsets = [0, 0], sizes = [8, 256], strides = [1, 1]} : vector<64x256xf32> to vector<8x256xf32>
    %c1_42 = arith.constant 1 : index
    %c1_43 = arith.constant 1 : index
    %c0_44 = arith.constant 0 : index
    %60 = vector.load %arg17[%c1_42, %c1_43, %c0_44] : memref<10x10x256xf32, #tpu.memory_space<vmem>>, vector<1x8x256xf32>
    %61 = vector.shape_cast %60 : vector<1x8x256xf32> to vector<8x256xf32>
    %62 = vector.shape_cast %59 : vector<8x256xf32> to vector<1x8x256xf32>
    tpu.vector_store %arg17[%c1_42, %c1_43, %c0_44], %62 {strides = array<i32>} : memref<10x10x256xf32, #tpu.memory_space<vmem>>, vector<1x8x256xf32>,
    %63 = vector.extract_strided_slice %56 {offsets = [8, 0], sizes = [8, 256], strides = [1, 1]} : vector<64x256xf32> to vector<8x256xf32>
    %c2_45 = arith.constant 2 : index
    %c1_46 = arith.constant 1 : index
    %c0_47 = arith.constant 0 : index
    %64 = vector.load %arg17[%c2_45, %c1_46, %c0_47] : memref<10x10x256xf32, #tpu.memory_space<vmem>>, vector<1x8x256xf32>
    %65 = vector.shape_cast %64 : vector<1x8x256xf32> to vector<8x256xf32>
    %66 = vector.shape_cast %63 : vector<8x256xf32> to vector<1x8x256xf32>
    tpu.vector_store %arg17[%c2_45, %c1_46, %c0_47], %66 {strides = array<i32>} : memref<10x10x256xf32, #tpu.memory_space<vmem>>, vector<1x8x256xf32>,
    %67 = vector.extract_strided_slice %56 {offsets = [16, 0], sizes = [8, 256], strides = [1, 1]} : vector<64x256xf32> to vector<8x256xf32>
    %c3_48 = arith.constant 3 : index
    %c1_49 = arith.constant 1 : index
    %c0_50 = arith.constant 0 : index
    %68 = vector.load %arg17[%c3_48, %c1_49, %c0_50] : memref<10x10x256xf32, #tpu.memory_space<vmem>>, vector<1x8x256xf32>
    %69 = vector.shape_cast %68 : vector<1x8x256xf32> to vector<8x256xf32>
    %70 = vector.shape_cast %67 : vector<8x256xf32> to vector<1x8x256xf32>
    tpu.vector_store %arg17[%c3_48, %c1_49, %c0_50], %70 {strides = array<i32>} : memref<10x10x256xf32, #tpu.memory_space<vmem>>, vector<1x8x256xf32>,
    %71 = vector.extract_strided_slice %56 {offsets = [24, 0], sizes = [8, 256], strides = [1, 1]} : vector<64x256xf32> to vector<8x256xf32>
    %c4 = arith.constant 4 : index
    %c1_51 = arith.constant 1 : index
    %c0_52 = arith.constant 0 : index
    %72 = vector.load %arg17[%c4, %c1_51, %c0_52] : memref<10x10x256xf32, #tpu.memory_space<vmem>>, vector<1x8x256xf32>
    %73 = vector.shape_cast %72 : vector<1x8x256xf32> to vector<8x256xf32>
    %74 = vector.shape_cast %71 : vector<8x256xf32> to vector<1x8x256xf32>
    tpu.vector_store %arg17[%c4, %c1_51, %c0_52], %74 {strides = array<i32>} : memref<10x10x256xf32, #tpu.memory_space<vmem>>, vector<1x8x256xf32>,
    %75 = vector.extract_strided_slice %56 {offsets = [32, 0], sizes = [8, 256], strides = [1, 1]} : vector<64x256xf32> to vector<8x256xf32>
    %c5 = arith.constant 5 : index
    %c1_53 = arith.constant 1 : index
    %c0_54 = arith.constant 0 : index
    %76 = vector.load %arg17[%c5, %c1_53, %c0_54] : memref<10x10x256xf32, #tpu.memory_space<vmem>>, vector<1x8x256xf32>
    %77 = vector.shape_cast %76 : vector<1x8x256xf32> to vector<8x256xf32>
    %78 = vector.shape_cast %75 : vector<8x256xf32> to vector<1x8x256xf32>
    tpu.vector_store %arg17[%c5, %c1_53, %c0_54], %78 {strides = array<i32>} : memref<10x10x256xf32, #tpu.memory_space<vmem>>, vector<1x8x256xf32>,
    %79 = vector.extract_strided_slice %56 {offsets = [40, 0], sizes = [8, 256], strides = [1, 1]} : vector<64x256xf32> to vector<8x256xf32>
    %c6 = arith.constant 6 : index
    %c1_55 = arith.constant 1 : index
    %c0_56 = arith.constant 0 : index
    %80 = vector.load %arg17[%c6, %c1_55, %c0_56] : memref<10x10x256xf32, #tpu.memory_space<vmem>>, vector<1x8x256xf32>
    %81 = vector.shape_cast %80 : vector<1x8x256xf32> to vector<8x256xf32>
    %82 = vector.shape_cast %79 : vector<8x256xf32> to vector<1x8x256xf32>
    tpu.vector_store %arg17[%c6, %c1_55, %c0_56], %82 {strides = array<i32>} : memref<10x10x256xf32, #tpu.memory_space<vmem>>, vector<1x8x256xf32>,
    %83 = vector.extract_strided_slice %56 {offsets = [48, 0], sizes = [8, 256], strides = [1, 1]} : vector<64x256xf32> to vector<8x256xf32>
    %c7 = arith.constant 7 : index
    %c1_57 = arith.constant 1 : index
    %c0_58 = arith.constant 0 : index
    %84 = vector.load %arg17[%c7, %c1_57, %c0_58] : memref<10x10x256xf32, #tpu.memory_space<vmem>>, vector<1x8x256xf32>
    %85 = vector.shape_cast %84 : vector<1x8x256xf32> to vector<8x256xf32>
    %86 = vector.shape_cast %83 : vector<8x256xf32> to vector<1x8x256xf32>
    tpu.vector_store %arg17[%c7, %c1_57, %c0_58], %86 {strides = array<i32>} : memref<10x10x256xf32, #tpu.memory_space<vmem>>, vector<1x8x256xf32>,
    %87 = vector.extract_strided_slice %56 {offsets = [56, 0], sizes = [8, 256], strides = [1, 1]} : vector<64x256xf32> to vector<8x256xf32>
    %c8 = arith.constant 8 : index
    %c1_59 = arith.constant 1 : index
    %c0_60 = arith.constant 0 : index
    %88 = vector.load %arg17[%c8, %c1_59, %c0_60] : memref<10x10x256xf32, #tpu.memory_space<vmem>>, vector<1x8x256xf32>
    %89 = vector.shape_cast %88 : vector<1x8x256xf32> to vector<8x256xf32>
    %90 = vector.shape_cast %87 : vector<8x256xf32> to vector<1x8x256xf32>
    tpu.vector_store %arg17[%c8, %c1_59, %c0_60], %90 {strides = array<i32>} : memref<10x10x256xf32, #tpu.memory_space<vmem>>, vector<1x8x256xf32>,
    %c0_61 = arith.constant 0 : index
    %c0_62 = arith.constant 0 : index
    %c0_63 = arith.constant 0 : index
    %91 = vector.load %arg17[%c0_61, %c0_62, %c0_63] : memref<10x10x256xf32, #tpu.memory_space<vmem>>, vector<8x8x256xf32>
    %92 = vector.shape_cast %91 : vector<8x8x256xf32> to vector<64x256xf32>
    %c0_64 = arith.constant 0 : index
    %c1_65 = arith.constant 1 : index
    %c0_66 = arith.constant 0 : index
    %93 = vector.load %arg17[%c0_64, %c1_65, %c0_66] : memref<10x10x256xf32, #tpu.memory_space<vmem>>, vector<8x8x256xf32>
    %94 = vector.shape_cast %93 : vector<8x8x256xf32> to vector<64x256xf32>
    %c0_67 = arith.constant 0 : index
    %c2_68 = arith.constant 2 : index
    %c0_69 = arith.constant 0 : index
    %95 = vector.load %arg17[%c0_67, %c2_68, %c0_69] : memref<10x10x256xf32, #tpu.memory_space<vmem>>, vector<8x8x256xf32>
    %96 = vector.shape_cast %95 : vector<8x8x256xf32> to vector<64x256xf32>
    %c1_70 = arith.constant 1 : index
    %c0_71 = arith.constant 0 : index
    %c0_72 = arith.constant 0 : index
    %97 = vector.load %arg17[%c1_70, %c0_71, %c0_72] : memref<10x10x256xf32, #tpu.memory_space<vmem>>, vector<8x8x256xf32>
    %98 = vector.shape_cast %97 : vector<8x8x256xf32> to vector<64x256xf32>
    %c1_73 = arith.constant 1 : index
    %c1_74 = arith.constant 1 : index
    %c0_75 = arith.constant 0 : index
    %99 = vector.load %arg17[%c1_73, %c1_74, %c0_75] : memref<10x10x256xf32, #tpu.memory_space<vmem>>, vector<8x8x256xf32>
    %100 = vector.shape_cast %99 : vector<8x8x256xf32> to vector<64x256xf32>
    %c1_76 = arith.constant 1 : index
    %c2_77 = arith.constant 2 : index
    %c0_78 = arith.constant 0 : index
    %101 = vector.load %arg17[%c1_76, %c2_77, %c0_78] : memref<10x10x256xf32, #tpu.memory_space<vmem>>, vector<8x8x256xf32>
    %102 = vector.shape_cast %101 : vector<8x8x256xf32> to vector<64x256xf32>
    %c2_79 = arith.constant 2 : index
    %c0_80 = arith.constant 0 : index
    %c0_81 = arith.constant 0 : index
    %103 = vector.load %arg17[%c2_79, %c0_80, %c0_81] : memref<10x10x256xf32, #tpu.memory_space<vmem>>, vector<8x8x256xf32>
    %104 = vector.shape_cast %103 : vector<8x8x256xf32> to vector<64x256xf32>
    %c2_82 = arith.constant 2 : index
    %c1_83 = arith.constant 1 : index
    %c0_84 = arith.constant 0 : index
    %105 = vector.load %arg17[%c2_82, %c1_83, %c0_84] : memref<10x10x256xf32, #tpu.memory_space<vmem>>, vector<8x8x256xf32>
    %106 = vector.shape_cast %105 : vector<8x8x256xf32> to vector<64x256xf32>
    %c2_85 = arith.constant 2 : index
    %c2_86 = arith.constant 2 : index
    %c0_87 = arith.constant 0 : index
    %107 = vector.load %arg17[%c2_85, %c2_86, %c0_87] : memref<10x10x256xf32, #tpu.memory_space<vmem>>, vector<8x8x256xf32>
    %108 = vector.shape_cast %107 : vector<8x8x256xf32> to vector<64x256xf32>
    %109 = tpu.concatenate %92, %94, %96, %98, %100, %102, %104, %106, %108 in 1 : vector<64x256xf32>, vector<64x256xf32>, vector<64x256xf32>, vector<64x256xf32>, vector<64x256xf32>, vector<64x256xf32>, vector<64x256xf32>, vector<64x256xf32>, vector<64x256xf32> -> vector<64x2304xf32>
    %c0_88 = arith.constant 0 : index
    %c0_89 = arith.constant 0 : index
    %110 = vector.load %arg6[%c0_88, %c0_89] : memref<16x2304xf32, #tpu.memory_space<vmem>>, vector<16x2304xf32>
    %cst_90 = arith.constant dense<0.000000e+00> : vector<16x64xf32>
    %111 = tpu.matmul %110, %109, %cst_90 {dimension_numbers = #tpu.dot_dimension_numbers<[1], [1], [0], [0], [0, 0, 1, 0], [], []>} : vector<16x2304xf32>, vector<64x2304xf32>, vector<16x64xf32> -> vector<16x64xf32>
    %c0_91 = arith.constant 0 : index
    %c0_92 = arith.constant 0 : index
    %112 = vector.load %arg8[%c0_91, %c0_92] : memref<16x9xf32, #tpu.memory_space<vmem>>, vector<16x1xf32>
    %113 = vector.broadcast %112 : vector<16x1xf32> to vector<16x64xf32>
    %114 = arith.mulf %113, %111 : vector<16x64xf32>
    %c0_93 = arith.constant 0 : index
    %c1_94 = arith.constant 1 : index
    %115 = vector.load %arg8[%c0_93, %c1_94] : memref<16x9xf32, #tpu.memory_space<vmem>>, vector<16x1xf32>
    %116 = vector.broadcast %115 : vector<16x1xf32> to vector<16x64xf32>
    %117 = arith.mulf %116, %111 : vector<16x64xf32>
    %c0_95 = arith.constant 0 : index
    %c2_96 = arith.constant 2 : index
    %118 = vector.load %arg8[%c0_95, %c2_96] : memref<16x9xf32, #tpu.memory_space<vmem>>, vector<16x1xf32>
    %119 = vector.broadcast %118 : vector<16x1xf32> to vector<16x64xf32>
    %120 = arith.mulf %119, %111 : vector<16x64xf32>
    %c0_97 = arith.constant 0 : index
    %c3_98 = arith.constant 3 : index
    %121 = vector.load %arg8[%c0_97, %c3_98] : memref<16x9xf32, #tpu.memory_space<vmem>>, vector<16x1xf32>
    %122 = vector.broadcast %121 : vector<16x1xf32> to vector<16x64xf32>
    %123 = arith.mulf %122, %111 : vector<16x64xf32>
    %c0_99 = arith.constant 0 : index
    %c4_100 = arith.constant 4 : index
    %124 = vector.load %arg8[%c0_99, %c4_100] : memref<16x9xf32, #tpu.memory_space<vmem>>, vector<16x1xf32>
    %125 = vector.broadcast %124 : vector<16x1xf32> to vector<16x64xf32>
    %126 = arith.mulf %125, %111 : vector<16x64xf32>
    %c0_101 = arith.constant 0 : index
    %c5_102 = arith.constant 5 : index
    %127 = vector.load %arg8[%c0_101, %c5_102] : memref<16x9xf32, #tpu.memory_space<vmem>>, vector<16x1xf32>
    %128 = vector.broadcast %127 : vector<16x1xf32> to vector<16x64xf32>
    %129 = arith.mulf %128, %111 : vector<16x64xf32>
    %c0_103 = arith.constant 0 : index
    %c6_104 = arith.constant 6 : index
    %130 = vector.load %arg8[%c0_103, %c6_104] : memref<16x9xf32, #tpu.memory_space<vmem>>, vector<16x1xf32>
    %131 = vector.broadcast %130 : vector<16x1xf32> to vector<16x64xf32>
    %132 = arith.mulf %131, %111 : vector<16x64xf32>
    %c0_105 = arith.constant 0 : index
    %c7_106 = arith.constant 7 : index
    %133 = vector.load %arg8[%c0_105, %c7_106] : memref<16x9xf32, #tpu.memory_space<vmem>>, vector<16x1xf32>
    %134 = vector.broadcast %133 : vector<16x1xf32> to vector<16x64xf32>
    %135 = arith.mulf %134, %111 : vector<16x64xf32>
    %c0_107 = arith.constant 0 : index
    %c8_108 = arith.constant 8 : index
    %136 = vector.load %arg8[%c0_107, %c8_108] : memref<16x9xf32, #tpu.memory_space<vmem>>, vector<16x1xf32>
    %137 = vector.broadcast %136 : vector<16x1xf32> to vector<16x64xf32>
    %138 = arith.mulf %137, %111 : vector<16x64xf32>
    %139 = tpu.concatenate %114, %117, %120, %123, %126, %129, %132, %135, %138 in 1 : vector<16x64xf32>, vector<16x64xf32>, vector<16x64xf32>, vector<16x64xf32>, vector<16x64xf32>, vector<16x64xf32>, vector<16x64xf32>, vector<16x64xf32>, vector<16x64xf32> -> vector<16x576xf32>
    %c0_109 = arith.constant 0 : index
    %c0_110 = arith.constant 0 : index
    %140 = vector.load %arg7[%c0_109, %c0_110] : memref<576x256xf32, #tpu.memory_space<vmem>>, vector<576x256xf32>
    %cst_111 = arith.constant dense<0.000000e+00> : vector<16x256xf32>
    %141 = tpu.matmul %139, %140, %cst_111 {dimension_numbers = #tpu.dot_dimension_numbers<[1], [0], [0], [1], [0, 0, 1, 1], [], []>} : vector<16x576xf32>, vector<576x256xf32>, vector<16x256xf32> -> vector<16x256xf32>
    %c0_112 = arith.constant 0 : index
    %c0_113 = arith.constant 0 : index
    %142 = vector.load %arg9[%c0_112, %c0_113] : memref<16x1xf32, #tpu.memory_space<vmem>>, vector<16x1xf32>
    %143 = vector.broadcast %142 : vector<16x1xf32> to vector<16x256xf32>
    %144 = arith.addf %141, %143 : vector<16x256xf32>
    %c0_114 = arith.constant 0 : index
    %c0_115 = arith.constant 0 : index
    %c0_116 = arith.constant 0 : index
    %145 = vector.load %arg15[%c0_114, %c0_115, %c0_116] : memref<1x16x256xf32, #tpu.memory_space<vmem>>, vector<1x16x256xf32>
    %146 = vector.shape_cast %145 : vector<1x16x256xf32> to vector<16x256xf32>
    %147 = vector.shape_cast %144 : vector<16x256xf32> to vector<1x16x256xf32>
    tpu.vector_store %arg15[%c0_114, %c0_115, %c0_116], %147 {strides = array<i32>} : memref<1x16x256xf32, #tpu.memory_space<vmem>>, vector<1x16x256xf32>,
    %c0_117 = arith.constant 0 : index
    %c0_118 = arith.constant 0 : index
    %c0_119 = arith.constant 0 : index
    %148 = vector.load %arg5[%c0_117, %c0_118, %c0_119] : memref<1x16x4xf32, #tpu.memory_space<vmem>>, vector<1x16x1xf32>
    %149 = vector.shape_cast %148 : vector<1x16x1xf32> to vector<16x1xf32>
    %c0_120 = arith.constant 0 : index
    %c0_121 = arith.constant 0 : index
    %150 = vector.load %arg3[%c0_120, %c0_121] : memref<4x256xf32, #tpu.memory_space<vmem>>, vector<1x256xf32>
    %151 = vector.broadcast %149 : vector<16x1xf32> to vector<16x256xf32>
    %152 = vector.broadcast %150 : vector<1x256xf32> to vector<16x256xf32>
    %153 = arith.mulf %151, %152 : vector<16x256xf32>
    %c0_122 = arith.constant 0 : index
    %c0_123 = arith.constant 0 : index
    %c1_124 = arith.constant 1 : index
    %154 = vector.load %arg5[%c0_122, %c0_123, %c1_124] : memref<1x16x4xf32, #tpu.memory_space<vmem>>, vector<1x16x1xf32>
    %155 = vector.shape_cast %154 : vector<1x16x1xf32> to vector<16x1xf32>
    %c1_125 = arith.constant 1 : index
    %c0_126 = arith.constant 0 : index
    %156 = vector.load %arg3[%c1_125, %c0_126] : memref<4x256xf32, #tpu.memory_space<vmem>>, vector<1x256xf32>
    %157 = vector.broadcast %155 : vector<16x1xf32> to vector<16x256xf32>
    %158 = vector.broadcast %156 : vector<1x256xf32> to vector<16x256xf32>
    %159 = arith.mulf %157, %158 : vector<16x256xf32>
    %160 = arith.addf %153, %159 : vector<16x256xf32>
    %c0_127 = arith.constant 0 : index
    %c0_128 = arith.constant 0 : index
    %c2_129 = arith.constant 2 : index
    %161 = vector.load %arg5[%c0_127, %c0_128, %c2_129] : memref<1x16x4xf32, #tpu.memory_space<vmem>>, vector<1x16x1xf32>
    %162 = vector.shape_cast %161 : vector<1x16x1xf32> to vector<16x1xf32>
    %c2_130 = arith.constant 2 : index
    %c0_131 = arith.constant 0 : index
    %163 = vector.load %arg3[%c2_130, %c0_131] : memref<4x256xf32, #tpu.memory_space<vmem>>, vector<1x256xf32>
    %164 = vector.broadcast %162 : vector<16x1xf32> to vector<16x256xf32>
    %165 = vector.broadcast %163 : vector<1x256xf32> to vector<16x256xf32>
    %166 = arith.mulf %164, %165 : vector<16x256xf32>
    %167 = arith.addf %160, %166 : vector<16x256xf32>
    %c0_132 = arith.constant 0 : index
    %c0_133 = arith.constant 0 : index
    %c3_134 = arith.constant 3 : index
    %168 = vector.load %arg5[%c0_132, %c0_133, %c3_134] : memref<1x16x4xf32, #tpu.memory_space<vmem>>, vector<1x16x1xf32>
    %169 = vector.shape_cast %168 : vector<1x16x1xf32> to vector<16x1xf32>
    %c3_135 = arith.constant 3 : index
    %c0_136 = arith.constant 0 : index
    %170 = vector.load %arg3[%c3_135, %c0_136] : memref<4x256xf32, #tpu.memory_space<vmem>>, vector<1x256xf32>
    %171 = vector.broadcast %169 : vector<16x1xf32> to vector<16x256xf32>
    %172 = vector.broadcast %170 : vector<1x256xf32> to vector<16x256xf32>
    %173 = arith.mulf %171, %172 : vector<16x256xf32>
    %174 = arith.addf %167, %173 : vector<16x256xf32>
    %cst_137 = arith.constant 0.000000e+00 : f32
    %175 = vector.broadcast %cst_137 : f32 to vector<6x6x256xf32>
    %c0_138 = arith.constant 0 : index
    %c0_139 = arith.constant 0 : index
    %c0_140 = arith.constant 0 : index
    %176 = vector.load %arg18[%c0_138, %c0_139, %c0_140] : memref<6x6x256xf32, #tpu.memory_space<vmem>>, vector<6x6x256xf32>
    tpu.vector_store %arg18[%c0_138, %c0_139, %c0_140], %175 {strides = array<i32>} : memref<6x6x256xf32, #tpu.memory_space<vmem>>, vector<6x6x256xf32>,
    %177 = vector.extract_strided_slice %174 {offsets = [0, 0], sizes = [4, 256], strides = [1, 1]} : vector<16x256xf32> to vector<4x256xf32>
    %c1_141 = arith.constant 1 : index
    %c1_142 = arith.constant 1 : index
    %c0_143 = arith.constant 0 : index
    %178 = vector.load %arg18[%c1_141, %c1_142, %c0_143] : memref<6x6x256xf32, #tpu.memory_space<vmem>>, vector<1x4x256xf32>
    %179 = vector.shape_cast %178 : vector<1x4x256xf32> to vector<4x256xf32>
    %180 = vector.shape_cast %177 : vector<4x256xf32> to vector<1x4x256xf32>
    tpu.vector_store %arg18[%c1_141, %c1_142, %c0_143], %180 {strides = array<i32>} : memref<6x6x256xf32, #tpu.memory_space<vmem>>, vector<1x4x256xf32>,
    %181 = vector.extract_strided_slice %174 {offsets = [4, 0], sizes = [4, 256], strides = [1, 1]} : vector<16x256xf32> to vector<4x256xf32>
    %c2_144 = arith.constant 2 : index
    %c1_145 = arith.constant 1 : index
    %c0_146 = arith.constant 0 : index
    %182 = vector.load %arg18[%c2_144, %c1_145, %c0_146] : memref<6x6x256xf32, #tpu.memory_space<vmem>>, vector<1x4x256xf32>
    %183 = vector.shape_cast %182 : vector<1x4x256xf32> to vector<4x256xf32>
    %184 = vector.shape_cast %181 : vector<4x256xf32> to vector<1x4x256xf32>
    tpu.vector_store %arg18[%c2_144, %c1_145, %c0_146], %184 {strides = array<i32>} : memref<6x6x256xf32, #tpu.memory_space<vmem>>, vector<1x4x256xf32>,
    %185 = vector.extract_strided_slice %174 {offsets = [8, 0], sizes = [4, 256], strides = [1, 1]} : vector<16x256xf32> to vector<4x256xf32>
    %c3_147 = arith.constant 3 : index
    %c1_148 = arith.constant 1 : index
    %c0_149 = arith.constant 0 : index
    %186 = vector.load %arg18[%c3_147, %c1_148, %c0_149] : memref<6x6x256xf32, #tpu.memory_space<vmem>>, vector<1x4x256xf32>
    %187 = vector.shape_cast %186 : vector<1x4x256xf32> to vector<4x256xf32>
    %188 = vector.shape_cast %185 : vector<4x256xf32> to vector<1x4x256xf32>
    tpu.vector_store %arg18[%c3_147, %c1_148, %c0_149], %188 {strides = array<i32>} : memref<6x6x256xf32, #tpu.memory_space<vmem>>, vector<1x4x256xf32>,
    %189 = vector.extract_strided_slice %174 {offsets = [12, 0], sizes = [4, 256], strides = [1, 1]} : vector<16x256xf32> to vector<4x256xf32>
    %c4_150 = arith.constant 4 : index
    %c1_151 = arith.constant 1 : index
    %c0_152 = arith.constant 0 : index
    %190 = vector.load %arg18[%c4_150, %c1_151, %c0_152] : memref<6x6x256xf32, #tpu.memory_space<vmem>>, vector<1x4x256xf32>
    %191 = vector.shape_cast %190 : vector<1x4x256xf32> to vector<4x256xf32>
    %192 = vector.shape_cast %189 : vector<4x256xf32> to vector<1x4x256xf32>
    tpu.vector_store %arg18[%c4_150, %c1_151, %c0_152], %192 {strides = array<i32>} : memref<6x6x256xf32, #tpu.memory_space<vmem>>, vector<1x4x256xf32>,
    %c0_153 = arith.constant 0 : index
    %c0_154 = arith.constant 0 : index
    %c0_155 = arith.constant 0 : index
    %193 = vector.load %arg18[%c0_153, %c0_154, %c0_155] : memref<6x6x256xf32, #tpu.memory_space<vmem>>, vector<4x4x256xf32>
    %194 = vector.shape_cast %193 : vector<4x4x256xf32> to vector<16x256xf32>
    %c0_156 = arith.constant 0 : index
    %c1_157 = arith.constant 1 : index
    %c0_158 = arith.constant 0 : index
    %195 = vector.load %arg18[%c0_156, %c1_157, %c0_158] : memref<6x6x256xf32, #tpu.memory_space<vmem>>, vector<4x4x256xf32>
    %196 = vector.shape_cast %195 : vector<4x4x256xf32> to vector<16x256xf32>
    %c0_159 = arith.constant 0 : index
    %c2_160 = arith.constant 2 : index
    %c0_161 = arith.constant 0 : index
    %197 = vector.load %arg18[%c0_159, %c2_160, %c0_161] : memref<6x6x256xf32, #tpu.memory_space<vmem>>, vector<4x4x256xf32>
    %198 = vector.shape_cast %197 : vector<4x4x256xf32> to vector<16x256xf32>
    %c1_162 = arith.constant 1 : index
    %c0_163 = arith.constant 0 : index
    %c0_164 = arith.constant 0 : index
    %199 = vector.load %arg18[%c1_162, %c0_163, %c0_164] : memref<6x6x256xf32, #tpu.memory_space<vmem>>, vector<4x4x256xf32>
    %200 = vector.shape_cast %199 : vector<4x4x256xf32> to vector<16x256xf32>
    %c1_165 = arith.constant 1 : index
    %c1_166 = arith.constant 1 : index
    %c0_167 = arith.constant 0 : index
    %201 = vector.load %arg18[%c1_165, %c1_166, %c0_167] : memref<6x6x256xf32, #tpu.memory_space<vmem>>, vector<4x4x256xf32>
    %202 = vector.shape_cast %201 : vector<4x4x256xf32> to vector<16x256xf32>
    %c1_168 = arith.constant 1 : index
    %c2_169 = arith.constant 2 : index
    %c0_170 = arith.constant 0 : index
    %203 = vector.load %arg18[%c1_168, %c2_169, %c0_170] : memref<6x6x256xf32, #tpu.memory_space<vmem>>, vector<4x4x256xf32>
    %204 = vector.shape_cast %203 : vector<4x4x256xf32> to vector<16x256xf32>
    %c2_171 = arith.constant 2 : index
    %c0_172 = arith.constant 0 : index
    %c0_173 = arith.constant 0 : index
    %205 = vector.load %arg18[%c2_171, %c0_172, %c0_173] : memref<6x6x256xf32, #tpu.memory_space<vmem>>, vector<4x4x256xf32>
    %206 = vector.shape_cast %205 : vector<4x4x256xf32> to vector<16x256xf32>
    %c2_174 = arith.constant 2 : index
    %c1_175 = arith.constant 1 : index
    %c0_176 = arith.constant 0 : index
    %207 = vector.load %arg18[%c2_174, %c1_175, %c0_176] : memref<6x6x256xf32, #tpu.memory_space<vmem>>, vector<4x4x256xf32>
    %208 = vector.shape_cast %207 : vector<4x4x256xf32> to vector<16x256xf32>
    %c2_177 = arith.constant 2 : index
    %c2_178 = arith.constant 2 : index
    %c0_179 = arith.constant 0 : index
    %209 = vector.load %arg18[%c2_177, %c2_178, %c0_179] : memref<6x6x256xf32, #tpu.memory_space<vmem>>, vector<4x4x256xf32>
    %210 = vector.shape_cast %209 : vector<4x4x256xf32> to vector<16x256xf32>
    %211 = tpu.concatenate %194, %196, %198, %200, %202, %204, %206, %208, %210 in 1 : vector<16x256xf32>, vector<16x256xf32>, vector<16x256xf32>, vector<16x256xf32>, vector<16x256xf32>, vector<16x256xf32>, vector<16x256xf32>, vector<16x256xf32>, vector<16x256xf32> -> vector<16x2304xf32>
    %c0_180 = arith.constant 0 : index
    %c0_181 = arith.constant 0 : index
    %212 = vector.load %arg10[%c0_180, %c0_181] : memref<16x2304xf32, #tpu.memory_space<vmem>>, vector<16x2304xf32>
    %cst_182 = arith.constant dense<0.000000e+00> : vector<16x16xf32>
    %213 = tpu.matmul %212, %211, %cst_182 {dimension_numbers = #tpu.dot_dimension_numbers<[1], [1], [0], [0], [0, 0, 1, 0], [], []>} : vector<16x2304xf32>, vector<16x2304xf32>, vector<16x16xf32> -> vector<16x16xf32>
    %c0_183 = arith.constant 0 : index
    %c0_184 = arith.constant 0 : index
    %214 = vector.load %arg12[%c0_183, %c0_184] : memref<16x9xf32, #tpu.memory_space<vmem>>, vector<16x1xf32>
    %215 = vector.broadcast %214 : vector<16x1xf32> to vector<16x16xf32>
    %216 = arith.mulf %215, %213 : vector<16x16xf32>
    %c0_185 = arith.constant 0 : index
    %c1_186 = arith.constant 1 : index
    %217 = vector.load %arg12[%c0_185, %c1_186] : memref<16x9xf32, #tpu.memory_space<vmem>>, vector<16x1xf32>
    %218 = vector.broadcast %217 : vector<16x1xf32> to vector<16x16xf32>
    %219 = arith.mulf %218, %213 : vector<16x16xf32>
    %c0_187 = arith.constant 0 : index
    %c2_188 = arith.constant 2 : index
    %220 = vector.load %arg12[%c0_187, %c2_188] : memref<16x9xf32, #tpu.memory_space<vmem>>, vector<16x1xf32>
    %221 = vector.broadcast %220 : vector<16x1xf32> to vector<16x16xf32>
    %222 = arith.mulf %221, %213 : vector<16x16xf32>
    %c0_189 = arith.constant 0 : index
    %c3_190 = arith.constant 3 : index
    %223 = vector.load %arg12[%c0_189, %c3_190] : memref<16x9xf32, #tpu.memory_space<vmem>>, vector<16x1xf32>
    %224 = vector.broadcast %223 : vector<16x1xf32> to vector<16x16xf32>
    %225 = arith.mulf %224, %213 : vector<16x16xf32>
    %c0_191 = arith.constant 0 : index
    %c4_192 = arith.constant 4 : index
    %226 = vector.load %arg12[%c0_191, %c4_192] : memref<16x9xf32, #tpu.memory_space<vmem>>, vector<16x1xf32>
    %227 = vector.broadcast %226 : vector<16x1xf32> to vector<16x16xf32>
    %228 = arith.mulf %227, %213 : vector<16x16xf32>
    %c0_193 = arith.constant 0 : index
    %c5_194 = arith.constant 5 : index
    %229 = vector.load %arg12[%c0_193, %c5_194] : memref<16x9xf32, #tpu.memory_space<vmem>>, vector<16x1xf32>
    %230 = vector.broadcast %229 : vector<16x1xf32> to vector<16x16xf32>
    %231 = arith.mulf %230, %213 : vector<16x16xf32>
    %c0_195 = arith.constant 0 : index
    %c6_196 = arith.constant 6 : index
    %232 = vector.load %arg12[%c0_195, %c6_196] : memref<16x9xf32, #tpu.memory_space<vmem>>, vector<16x1xf32>
    %233 = vector.broadcast %232 : vector<16x1xf32> to vector<16x16xf32>
    %234 = arith.mulf %233, %213 : vector<16x16xf32>
    %c0_197 = arith.constant 0 : index
    %c7_198 = arith.constant 7 : index
    %235 = vector.load %arg12[%c0_197, %c7_198] : memref<16x9xf32, #tpu.memory_space<vmem>>, vector<16x1xf32>
    %236 = vector.broadcast %235 : vector<16x1xf32> to vector<16x16xf32>
    %237 = arith.mulf %236, %213 : vector<16x16xf32>
    %c0_199 = arith.constant 0 : index
    %c8_200 = arith.constant 8 : index
    %238 = vector.load %arg12[%c0_199, %c8_200] : memref<16x9xf32, #tpu.memory_space<vmem>>, vector<16x1xf32>
    %239 = vector.broadcast %238 : vector<16x1xf32> to vector<16x16xf32>
    %240 = arith.mulf %239, %213 : vector<16x16xf32>
    %241 = tpu.concatenate %216, %219, %222, %225, %228, %231, %234, %237, %240 in 1 : vector<16x16xf32>, vector<16x16xf32>, vector<16x16xf32>, vector<16x16xf32>, vector<16x16xf32>, vector<16x16xf32>, vector<16x16xf32>, vector<16x16xf32>, vector<16x16xf32> -> vector<16x144xf32>
    %c0_201 = arith.constant 0 : index
    %c0_202 = arith.constant 0 : index
    %242 = vector.load %arg11[%c0_201, %c0_202] : memref<144x256xf32, #tpu.memory_space<vmem>>, vector<144x256xf32>
    %cst_203 = arith.constant dense<0.000000e+00> : vector<16x256xf32>
    %243 = tpu.matmul %241, %242, %cst_203 {dimension_numbers = #tpu.dot_dimension_numbers<[1], [0], [0], [1], [0, 0, 1, 1], [], []>} : vector<16x144xf32>, vector<144x256xf32>, vector<16x256xf32> -> vector<16x256xf32>
    %c0_204 = arith.constant 0 : index
    %c0_205 = arith.constant 0 : index
    %244 = vector.load %arg13[%c0_204, %c0_205] : memref<16x1xf32, #tpu.memory_space<vmem>>, vector<16x1xf32>
    %245 = vector.broadcast %244 : vector<16x1xf32> to vector<16x256xf32>
    %246 = arith.addf %243, %245 : vector<16x256xf32>
    %c0_206 = arith.constant 0 : index
    %c0_207 = arith.constant 0 : index
    %c0_208 = arith.constant 0 : index
    %247 = vector.load %arg16[%c0_206, %c0_207, %c0_208] : memref<1x16x256xf32, #tpu.memory_space<vmem>>, vector<1x16x256xf32>
    %248 = vector.shape_cast %247 : vector<1x16x256xf32> to vector<16x256xf32>
    %249 = vector.shape_cast %246 : vector<16x256xf32> to vector<1x16x256xf32>
    tpu.vector_store %arg16[%c0_206, %c0_207, %c0_208], %249 {strides = array<i32>} : memref<1x16x256xf32, #tpu.memory_space<vmem>>, vector<1x16x256xf32>,
    return
  }
  func.func @transform_0(%arg0: i32) -> (i32, i32, i32) {
    %c0_i32 = arith.constant 0 : i32
    %c0_i32_0 = arith.constant 0 : i32
    %c0_i32_1 = arith.constant 0 : i32
    return %arg0, %c0_i32, %c0_i32_0 : i32, i32, i32
  }
  func.func @transform_1(%arg0: i32) -> (i32, i32) {
    %c0_i32 = arith.constant 0 : i32
    %c0_i32_0 = arith.constant 0 : i32
    %c0_i32_1 = arith.constant 0 : i32
    return %c0_i32, %c0_i32_0 : i32, i32
  }
  func.func @transform_2(%arg0: i32) -> (i32, i32) {
    %c0_i32 = arith.constant 0 : i32
    %c0_i32_0 = arith.constant 0 : i32
    %c0_i32_1 = arith.constant 0 : i32
    return %c0_i32, %c0_i32_0 : i32, i32
  }
  func.func @transform_3(%arg0: i32) -> (i32, i32, i32) {
    %c0_i32 = arith.constant 0 : i32
    %c0_i32_0 = arith.constant 0 : i32
    %c0_i32_1 = arith.constant 0 : i32
    return %arg0, %c0_i32, %c0_i32_0 : i32, i32, i32
  }
  func.func @transform_4(%arg0: i32) -> (i32, i32, i32) {
    %c0_i32 = arith.constant 0 : i32
    %c0_i32_0 = arith.constant 0 : i32
    %c0_i32_1 = arith.constant 0 : i32
    return %arg0, %c0_i32, %c0_i32_0 : i32, i32, i32
  }
  func.func @transform_5(%arg0: i32) -> (i32, i32) {
    %c0_i32 = arith.constant 0 : i32
    %c0_i32_0 = arith.constant 0 : i32
    %c0_i32_1 = arith.constant 0 : i32
    return %c0_i32, %c0_i32_0 : i32, i32
  }
  func.func @transform_6(%arg0: i32) -> (i32, i32) {
    %c0_i32 = arith.constant 0 : i32
    %c0_i32_0 = arith.constant 0 : i32
    %c0_i32_1 = arith.constant 0 : i32
    return %c0_i32, %c0_i32_0 : i32, i32
  }
  func.func @transform_7(%arg0: i32) -> (i32, i32) {
    %c0_i32 = arith.constant 0 : i32
    %c0_i32_0 = arith.constant 0 : i32
    %c0_i32_1 = arith.constant 0 : i32
    return %c0_i32, %c0_i32_0 : i32, i32
  }
  func.func @transform_8(%arg0: i32) -> (i32, i32) {
    %c0_i32 = arith.constant 0 : i32
    %c0_i32_0 = arith.constant 0 : i32
    %c0_i32_1 = arith.constant 0 : i32
    return %c0_i32, %c0_i32_0 : i32, i32
  }
  func.func @transform_9(%arg0: i32) -> (i32, i32) {
    %c0_i32 = arith.constant 0 : i32
    %c0_i32_0 = arith.constant 0 : i32
    %c0_i32_1 = arith.constant 0 : i32
    return %c0_i32, %c0_i32_0 : i32, i32
  }
  func.func @transform_10(%arg0: i32) -> (i32, i32) {
    %c0_i32 = arith.constant 0 : i32
    %c0_i32_0 = arith.constant 0 : i32
    %c0_i32_1 = arith.constant 0 : i32
    return %c0_i32, %c0_i32_0 : i32, i32
  }
  func.func @transform_11(%arg0: i32) -> (i32, i32) {
    %c0_i32 = arith.constant 0 : i32
    %c0_i32_0 = arith.constant 0 : i32
    %c0_i32_1 = arith.constant 0 : i32
    return %c0_i32, %c0_i32_0 : i32, i32
  }
  func.func @transform_12(%arg0: i32) -> (i32, i32) {
    %c0_i32 = arith.constant 0 : i32
    %c0_i32_0 = arith.constant 0 : i32
    %c0_i32_1 = arith.constant 0 : i32
    return %c0_i32, %c0_i32_0 : i32, i32
  }
  func.func @transform_13(%arg0: i32) -> (i32, i32, i32) {
    %c0_i32 = arith.constant 0 : i32
    %c0_i32_0 = arith.constant 0 : i32
    %c0_i32_1 = arith.constant 0 : i32
    return %arg0, %c0_i32, %c0_i32_0 : i32, i32, i32
  }
  func.func @transform_14(%arg0: i32) -> (i32, i32, i32) {
    %c0_i32 = arith.constant 0 : i32
    %c0_i32_0 = arith.constant 0 : i32
    %c0_i32_1 = arith.constant 0 : i32
    return %arg0, %c0_i32, %c0_i32_0 : i32, i32, i32
  }
  func.func @transform_15(%arg0: i32) -> (i32, i32, i32) {
    %c0_i32 = arith.constant 0 : i32
    %c0_i32_0 = arith.constant 0 : i32
    %c0_i32_1 = arith.constant 0 : i32
    return %arg0, %c0_i32, %c0_i32_0 : i32, i32, i32
  }
}

</mosaic_0001>

<bundles_post_ra>
// kernel: controller_forward.1
= control target key start
LH: loop header
LB: loop body
LE: loop exit
PB: predicated region body
PF: predicated region fallthrough
CT: control target
= control target key end

     0   :  { %21 = vsyncpa [#allocation5], 0  ;;  %s8751_s0 = inlined_call_operand.vmem [shape: f32[2,4,256], index: 0, kind: input, shape index: {}]   ;;  %s8752_s1 = inlined_call_operand.vmem [shape: f32[256,4], index: 1, kind: input, shape index: {}]   ;;  %s8753_s2 = inlined_call_operand.vmem [shape: f32[4,256], index: 2, kind: input, shape index: {}]   ;;  %s8754_s3 = inlined_call_operand.vmem [shape: f32[2,64,4], index: 3, kind: input, shape index: {}]   ;;  %s8755_s4 = inlined_call_operand.vmem [shape: f32[2,16,4], index: 4, kind: input, shape index: {}]   ;;  %s8756_s5 = inlined_call_operand.vmem [shape: f32[16,2304], index: 5, kind: input, shape index: {}]   ;;  %s8757_s6 = inlined_call_operand.hbm [shape: f32[576,256], index: 6, kind: input, shape index: {}]   ;;  %s8758_s7 = inlined_call_operand.vmem [shape: f32[16,9], index: 7, kind: input, shape index: {}]   ;;  %s8759_s8 = inlined_call_operand.vmem [shape: f32[16,1], index: 8, kind: input, shape index: {}]   ;;  %s8760_s9 = inlined_call_operand.vmem [shape: f32[16,2304], index: 9, kind: input, shape index: {}]   ;;  %s8761_s10 = inlined_call_operand.hbm [shape: f32[144,256], index: 10, kind: input, shape index: {}]   ;;  %s8762_s11 = inlined_call_operand.vmem [shape: f32[16,9], index: 11, kind: input, shape index: {}]   ;;  %s8763_s12 = inlined_call_operand.vmem [shape: f32[16,1], index: 12, kind: input, shape index: {}]   ;;  %s8764_s13 = inlined_call_operand.vmem [shape: f32[2,256,256], index: 13, kind: output, shape index: {0}]   ;;  %s8765_s14 = inlined_call_operand.vmem [shape: f32[2,16,256], index: 14, kind: output, shape index: {1}]   ;;  %s8766_s15 = inlined_call_operand.vmem [shape: f32[2,16,256], index: 15, kind: output, shape index: {2}]  }
   0x1   :  { %22 = vsyncpa [#allocation7], 0  ;;  %s5961_s18 = smov 0  }
   0x2 LB: > { %s419_s21 = sshll.u32 %s8757_s6, 4  ;;  %s5970_s22 = sadd.s32 4294967295, %s5858_s18   ;;  %s5858_s18 = sphi %s5961_s18, %s28_s18   ;;  %s420_s21 = int_to_ptr.hbm [resolvable:$true] %s419_s21 }
   0x3   : > { %p5492_p0 = scmp.ge.s32.totalorder %s5858_s18, 1  ;;  %p399_p1 = scmp.lt.s32.totalorder %s5858_s18, 3 }
   0x4   : > { %p5603_p2 = scmp.eq.s32.totalorder %s5970_s22, 0  ;;  %s5860_s24 = smov [#allocation4]  }
   0x5   : > { %p5975_p3 = pnand %p5492_p0, %p399_p1  ;;  %s421_s25 = sshll.u32 %s5860_s24, 4  ;;  %s422_s25 = int_to_ptr.vmem [resolvable:$true] %s421_s25 }
   0x6   : > { %s442_s28 = sshll.u32 %s8761_s10, 4  ;;  %s5861_s29 = smov [#allocation6]   ;;  %s443_s28 = int_to_ptr.hbm [resolvable:$true] %s442_s28 }
   0x7   : > { %p5596_p4 = pneg %p5975_p3  ;;  %s444_s30 = sshll.u32 %s5861_s29, 4  ;;  %s445_s30 = int_to_ptr.vmem [resolvable:$true] %s444_s30 }
   0x8   : > { %s5862_s16 = smov 256   ;;  %s5863_s17 = smov 16  }
   0x9   : > { %p5597_p5 = pnand %p5603_p2, %p5596_p4  ;;  %490 = sbr.rel (%p5975_p3) target bundleno = 1497 (0x5d9), region = 72 }
   0xb   : > { %5599 = dma.hbm_to_vmem [thread:$0]  (!%p5597_p5), %s420_s21, 18432, %s422_s25, [#allocation5], %s5862_s16, %s5862_s16, %s5863_s17  }
   0xc   : > { %5602 = dma.hbm_to_vmem [thread:$0]  (!%p5597_p5), %s443_s28, 4608, %s445_s30, [#allocation7], %s5862_s16, %s5862_s16, %s5863_s17  }
   0xe   : > { %5849 = dma.done.wait (%p5603_p2), [#allocation5], 18432  }
   0xf   : > { %5851 = vsyncadd (%p5603_p2), [#allocation5], 4294948864 }
  0x10   : > { %5853 = dma.done.wait (%p5603_p2), [#allocation7], 4608  }
  0x11   : > { %5855 = vsyncadd (%p5603_p2), [#allocation7], 4294962688  ;;  %p564_p6 = scmp.lt.s32.totalorder %s5970_s22, 1  ;;  %v8767_v0 = vmov 3   ;;  %v8773_v1 = vmov 0   ;;  %v6015_v3 = vld [vmem:[%s8752_s1 + $0x20] sm:$0xff] }
  0x12   : > { %5645 = vset.pattern.permute.xlu0 %v8767_v0  ;;  %5637 = vset.pattern.permute.xlu2 %v8773_v1  ;;  %v6020_v4 = vld [vmem:[%s8752_s1 + $0x10] sm:$0xff]  ;;  %v6028_v5 = vld [vmem:[%s8752_s1 + $0x28] sm:$0xff]  ;;  %v6033_v6 = vld [vmem:[%s8752_s1 + $0x18] sm:$0xff]  ;;  %v8777_v8 = vmov 2   ;;  %v8769_v35 = vmov 1   ;;  %vm2200_vm0 = vcmask 1046528  }
  0x13   : > { %5636 = vset.pattern.permute.xlu1 %v8773_v1  ;;  %s9085_s22 = smov (!%p564_p6, %s5970_s22), 1  ;;  %649 = vperm.xlu2 %5637, %v6015_v3   ;;  %v6038_v7 = vld [vmem:[%s8752_s1 + $0x8] sm:$0xff]  ;;  %v6047_v9 = vld [vmem:[%s8752_s1 + $0x40] sm:$0xff]  ;;  %v6052_v10 = vld [vmem:[%s8752_s1 + $0x38] sm:$0xff]  ;;  %vm2329_vm1 = vcmask 1045504   ;;  %vm3514_vm2 = vcmask 523264  }
  0x14   : > { %s5579_s19 = sshll.u32 %s9085_s22, 6  ;;  %639 = vperm.xlu1 %5636, %v6020_v4   ;;  %v6057_v11 = vld [vmem:[%s8752_s1 + $0x30] sm:$0xff]  ;;  %v6065_v12 = vld [vmem:[%s8752_s1 + $0x58] sm:$0xff]  ;;  %v6075_v14 = vld [vmem:[%s8752_s1 + $0x48] sm:$0xff]  ;;  %s5581_s27 = sshll.u32 %s9085_s22, 9  ;;  %vm4071_vm3 = vcmask 1043456  }
  0x15   : > { %s6007_s23 = scalar_lea.vmem %s8754_s3, %s5579_s19  ;;  %v6070_v13 = vld [vmem:[%s8752_s1 + $0x50] sm:$0xff]  ;;  %v6088_v16 = vld [vmem:[%s8752_s1 + $0x68] sm:$0xff]  ;;  %v6093_v17 = vld [vmem:[%s8752_s1 + $0x60] sm:$0xff]  ;;  %s6873_s29 = scalar_lea.vmem %s8764_s13, %s5581_s27  ;;  %vm4108_vm4 = vcmask 1042432   ;;  %vm4109_vm5 = vcmask 1046532   ;;  %vm4159_vm6 = vcmask 1041408  }
  0x16   : > { %v6010_v2 = vld [vmem:[%s6007_s23 + $0x30] sm:$0xff]  ;;  %v6101_v18 = vld [vmem:[%s8752_s1 + $0x88] sm:$0xff]  ;;  %v6106_v19 = vld [vmem:[%s8752_s1 + $0x80] sm:$0xff]  ;;  %s5580_s20 = sshll.u32 %s9085_s22, 4  ;;  %vm4160_vm8 = vcmask 1045508   ;;  %s5875_s17 = smov 96  }
  0x17   : > { %1948 = vperm.xlu0 %5645, %v6010_v2   ;;  %v6083_v15 = vld [vmem:[%s8752_s1 + $0x70] sm:$0xff]  ;;  %v6111_v20 = vld [vmem:[%s8752_s1 + $0x78] sm:$0xff]  ;;  %v6119_v21 = vld [vmem:[%s8752_s1 + $0xa0] sm:$0xff]  ;;  %s7212_s25 = scalar_lea.vmem %s8755_s4, %s5580_s20  ;;  %s5876_s19 = smov 32   ;;  %vm5153_vm10 = vcmask 130048   ;;  %vm5156_vm11 = vcmask 261120  }
  0x18   : > { %v6124_v22 = vld [vmem:[%s8752_s1 + $0x98] sm:$0xff]  ;;  %v6129_v23 = vld [vmem:[%s8752_s1 + $0x90] sm:$0xff]  ;;  %v6147_v26 = vld [vmem:[%s8752_s1 + $0xa8] sm:$0xff]  ;;  %s5877_s20 = smov 16   ;;  %s5878_s21 = smov 48   ;;  %vm5159_vm12 = vcmask 392192  }
  0x19   : > { %v6137_v24 = vld [vmem:[%s8752_s1 + $0xb8] sm:$0xff]  ;;  %v6142_v25 = vld [vmem:[%s8752_s1 + $0xb0] sm:$0xff]  ;;  %v6160_v28 = vld [vmem:[%s8752_s1 + $0xc8] sm:$0xff]  ;;  %s5879_s24 = smov 80   ;;  %s5880_s26 = smov 112   ;;  %vm5164_vm13 = vcmask 654336  }
  0x1a   : > { %v6155_v27 = vld [vmem:[%s8752_s1 + $0xd0] sm:$0xff]  ;;  %v6165_v29 = vld [vmem:[%s8752_s1 + $0xc0] sm:$0xff]  ;;  %v6173_v30 = vld [vmem:[%s8752_s1 + $0xe8] sm:$0xff]  ;;  %vm5167_vm14 = vcmask 785408   ;;  %vm5170_vm15 = vcmask 916480  }
  0x1b   : > { %654 = vperm.xlu2 %5637, %v6028_v5   ;;  %v6178_v31 = vld [vmem:[%s8752_s1 + $0xe0] sm:$0xff]  ;;  %v6189_v33 = vld [vmem:[%s8752_s1 + $0xf8] sm:$0xff]  ;;  %v6270_v55 = vld [vmem:[%s8752_s1 + $0xf0] sm:$0xff] }
  0x1c   : > { %644 = vperm.xlu1 %5636, %v6033_v6   ;;  %v6181_v32 = vld [vmem:[%s6007_s23 + $0x20] sm:$0xff]  ;;  %v6256_v51 = vld [vmem:[%s8752_s1 + $0xd8] sm:$0xff]  ;;  %v6282_v59 = vld [vmem:[%s6007_s23 + $0x8] sm:$0xff] }
  0x1d   : > { %v6194_v34 = vld [vmem:[%s8752_s1] sm:$0xff]  ;;  %vm7862_vm7 = vmor %vm4108_vm4, %vm4109_vm5 }
  0x1e   : > { %vm7912_vm9 = vmor %vm4159_vm6, %vm4160_vm8 }
  0x1f   : > { %5646 = vset.pattern.permute.xlu0 %v8777_v8 }
  0x20   : > { %1126 = vperm.xlu0 %5646, %v6038_v7  }
  0x23   : > { %669 = vperm.xlu2 %5637, %v6047_v9  }
  0x24   : > { %664 = vperm.xlu1 %5636, %v6052_v10  }
  0x28   : > { %1146 = vperm.xlu0 %5646, %v6057_v11  }
  0x2b   : > { %684 = vperm.xlu2 %5637, %v6065_v12  }
  0x2c   : > { %679 = vperm.xlu1 %5636, %v6070_v13  }
  0x30   : > { %1158 = vperm.xlu0 %5646, %v6075_v14  }
  0x33   : > { %699 = vperm.xlu2 %5637, %v6083_v15  }
  0x34   : > { %694 = vperm.xlu1 %5636, %v6088_v16  }
  0x38   : > { %1170 = vperm.xlu0 %5646, %v6093_v17  }
  0x3b   : > { %714 = vperm.xlu2 %5637, %v6101_v18  }
  0x3c   : > { %709 = vperm.xlu1 %5636, %v6106_v19  }
  0x40   : > { %1182 = vperm.xlu0 %5646, %v6111_v20  }
  0x43   : > { %729 = vperm.xlu2 %5637, %v6119_v21  }
  0x44   : > { %724 = vperm.xlu1 %5636, %v6124_v22  }
  0x48   : > { %1194 = vperm.xlu0 %5646, %v6129_v23  }
  0x4b   : > { %744 = vperm.xlu2 %5637, %v6137_v24  }
  0x4c   : > { %739 = vperm.xlu1 %5636, %v6142_v25  }
  0x50   : > { %1206 = vperm.xlu0 %5646, %v6147_v26  }
  0x53   : > { %759 = vperm.xlu2 %5637, %v6155_v27  }
  0x54   : > { %754 = vperm.xlu1 %5636, %v6160_v28  }
  0x58   : > { %1218 = vperm.xlu0 %5646, %v6165_v29  }
  0x5b   : > { %774 = vperm.xlu2 %5637, %v6173_v30  }
  0x5c   : > { %769 = vperm.xlu1 %5636, %v6178_v31  }
  0x60   : > { %1869 = vperm.xlu0 %5646, %v6181_v32  }
  0x63   : > { %5638 = vset.pattern.permute.xlu2 %v8769_v35 }
  0x64   : > { %784 = vperm.xlu1 %5636, %v6189_v33   ;;  %859 = vperm.xlu2 %5638, %v6194_v34  }
  0x68   : > { %5651 = vset.pattern.permute.xlu0 %v8769_v35 }
  0x69   : > { %863 = vperm.xlu0 %5651, %v6038_v7  }
  0x6c   : > { %5639 = vset.pattern.permute.xlu1 %v8769_v35  ;;  %871 = vperm.xlu2 %5638, %v6033_v6  }
  0x6d   : > { %867 = vperm.xlu1 %5639, %v6020_v4   ;;  %v6204_v36 = vpop.permute.xlu2 %649 }
  0x6e   : > { %8871 = vst [vmem:[#allocation10_spill] sm:$0xff] %v6204_v36 }
  0x71   : > { %883 = vperm.xlu0 %5651, %v6057_v11  }
  0x74   : > { %879 = vperm.xlu2 %5638, %v6028_v5  }
  0x75   : > { %875 = vperm.xlu1 %5639, %v6015_v3   ;;  %v6209_v37 = vpop.permute.xlu2 %654 }
  0x76   : > { %8872 = vst [vmem:[#allocation11_spill] sm:$0xff] %v6209_v37 }
  0x79   : > { %895 = vperm.xlu0 %5651, %v6075_v14  }
  0x7c   : > { %891 = vperm.xlu2 %5638, %v6047_v9  }
  0x7d   : > { %887 = vperm.xlu1 %5639, %v6052_v10   ;;  %v6214_v38 = vpop.permute.xlu2 %669 }
  0x7e   : > { %8873 = vst [vmem:[#allocation12_spill] sm:$0xff] %v6214_v38 }
  0x81   : > { %907 = vperm.xlu0 %5651, %v6093_v17  }
  0x84   : > { %903 = vperm.xlu2 %5638, %v6065_v12  }
  0x85   : > { %899 = vperm.xlu1 %5639, %v6070_v13   ;;  %v6219_v39 = vpop.permute.xlu2 %684 }
  0x86   : > { %8874 = vst [vmem:[#allocation13_spill] sm:$0xff] %v6219_v39  ;;  %v6223_v41 = vpop.permute.xlu1 %639 }
  0x89   : > { %v6221_v40 = vpop.permute.xlu0 %1948  ;;  %919 = vperm.xlu0 %5651, %v6111_v20  }
  0x8c   : > { %915 = vperm.xlu2 %5638, %v6083_v15  }
  0x8d   : > { %911 = vperm.xlu1 %5639, %v6088_v16   ;;  %v6228_v42 = vpop.permute.xlu2 %699 }
  0x8e   : > { %8875 = vst [vmem:[#allocation14_spill] sm:$0xff] %v6228_v42  ;;  %v6230_v43 = vpop.permute.xlu1 %644 }
  0x8f   : > { %8876 = vst [vmem:[#allocation15_spill] sm:$0xff] %v6230_v43 }
  0x91   : > { %931 = vperm.xlu0 %5651, %v6129_v23  }
  0x92   : > { %v6233_v44 = vpop.permute.xlu0 %1126 }
  0x94   : > { %927 = vperm.xlu2 %5638, %v6101_v18  }
  0x95   : > { %923 = vperm.xlu1 %5639, %v6106_v19   ;;  %v6237_v45 = vpop.permute.xlu2 %714 }
  0x96   : > { %8877 = vst [vmem:[#allocation16_spill] sm:$0xff] %v6237_v45  ;;  %v6239_v46 = vpop.permute.xlu1 %664 }
  0x97   : > { %8878 = vst [vmem:[#allocation17_spill] sm:$0xff] %v6239_v46 }
  0x99   : > { %943 = vperm.xlu0 %5651, %v6147_v26  }
  0x9a   : > { %v6242_v47 = vpop.permute.xlu0 %1146 }
  0x9b   : > { %8879 = vst [vmem:[#allocation18_spill] sm:$0xff] %v6242_v47 }
  0x9c   : > { %939 = vperm.xlu2 %5638, %v6119_v21  }
  0x9d   : > { %935 = vperm.xlu1 %5639, %v6124_v22   ;;  %v6246_v48 = vpop.permute.xlu2 %729 }
  0x9e   : > { %8880 = vst [vmem:[#allocation19_spill] sm:$0xff] %v6246_v48  ;;  %v6248_v49 = vpop.permute.xlu1 %679 }
  0x9f   : > { %8881 = vst [vmem:[#allocation20_spill] sm:$0xff] %v6248_v49 }
  0xa1   : > { %955 = vperm.xlu0 %5651, %v6165_v29  }
  0xa2   : > { %v6251_v50 = vpop.permute.xlu0 %1158 }
  0xa3   : > { %8882 = vst [vmem:[#allocation21_spill] sm:$0xff] %v6251_v50 }
  0xa4   : > { %951 = vperm.xlu2 %5638, %v6137_v24  }
  0xa5   : > { %947 = vperm.xlu1 %5639, %v6142_v25   ;;  %v6260_v52 = vpop.permute.xlu2 %744 }
  0xa6   : > { %8883 = vst [vmem:[#allocation22_spill] sm:$0xff] %v6260_v52  ;;  %v6262_v53 = vpop.permute.xlu1 %694 }
  0xa7   : > { %8884 = vst [vmem:[#allocation23_spill] sm:$0xff] %v6262_v53 }
  0xa9   : > { %967 = vperm.xlu0 %5651, %v6256_v51  }
  0xaa   : > { %v6265_v54 = vpop.permute.xlu0 %1170 }
  0xab   : > { %8885 = vst [vmem:[#allocation24_spill] sm:$0xff] %v6265_v54 }
  0xac   : > { %963 = vperm.xlu2 %5638, %v6155_v27  }
  0xad   : > { %959 = vperm.xlu1 %5639, %v6160_v28   ;;  %v6274_v56 = vpop.permute.xlu2 %759 }
  0xae   : > { %8886 = vst [vmem:[#allocation25_spill] sm:$0xff] %v6274_v56  ;;  %v6276_v57 = vpop.permute.xlu1 %709 }
  0xaf   : > { %8887 = vst [vmem:[#allocation26_spill] sm:$0xff] %v6276_v57 }
  0xb1   : > { %979 = vperm.xlu0 %5651, %v6270_v55  }
  0xb2   : > { %v6279_v58 = vpop.permute.xlu0 %1182 }
  0xb3   : > { %8888 = vst [vmem:[#allocation27_spill] sm:$0xff] %v6279_v58  ;;  %v8918_v58 = vmov 2  }
  0xb4   : > { %975 = vperm.xlu2 %5638, %v6173_v30  }
  0xb5   : > { %971 = vperm.xlu1 %5639, %v6178_v31   ;;  %v6286_v60 = vpop.permute.xlu2 %774 }
  0xb6   : > { %8889 = vst [vmem:[#allocation28_spill] sm:$0xff] %v6286_v60  ;;  %v6288_v61 = vpop.permute.xlu1 %724 }
  0xb7   : > { %8890 = vst [vmem:[#allocation29_spill] sm:$0xff] %v6288_v61 }
  0xb9   : > { %1786 = vperm.xlu0 %5651, %v6282_v59  }
  0xba   : > { %v6291_v62 = vpop.permute.xlu0 %1194 }
  0xbb   : > { %8891 = vst [vmem:[#allocation30_spill] sm:$0xff] %v6291_v62  ;;  %v6407_v62 = vld [vmem:[%s6007_s23 + $0x10] sm:$0xff] }
  0xbc   : > { %5640 = vset.pattern.permute.xlu2 %v8777_v8 }
  0xbd   : > { %983 = vperm.xlu1 %5639, %v6189_v33   ;;  %1122 = vperm.xlu2 %5640, %v6194_v34  }
  0xbe   : > { %v6295_v63 = vpop.permute.xlu1 %739  ;;  %v6302_v35 = vpop.permute.xlu2 %859 }
  0xbf   : > { %8892 = vst [vmem:[#allocation31_spill] sm:$0xff] %v6295_v63 }
  0xc1   : > { %5660 = vset.pattern.permute.xlu0 %v8773_v1 }
  0xc2   : > { %v6299_v0 = vpop.permute.xlu0 %1206  ;;  %629 = vperm.xlu0 %5660, %v6194_v34  }
  0xc3   : > { %8893 = vst [vmem:[#allocation32_spill] sm:$0xff] %v6299_v0 }
  0xc5   : > { %5641 = vset.pattern.permute.xlu1 %v8777_v8  ;;  %1134 = vperm.xlu2 %5640, %v6033_v6  }
  0xc6   : > { %1130 = vperm.xlu1 %5641, %v6020_v4   ;;  %v6306_v52 = vpop.permute.xlu1 %754  ;;  %v6312_v1 = vpop.permute.xlu2 %871 }
  0xc7   : > { %8894 = vst [vmem:[#allocation33_spill] sm:$0xff] %v6306_v52 }
  0xca   : > { %v6309_v60 = vpop.permute.xlu0 %1218  ;;  %634 = vperm.xlu0 %5660, %v6038_v7  }
  0xcb   : > { %8895 = vst [vmem:[#allocation34_spill] sm:$0xff] %v6309_v60 }
  0xcd   : > { %1142 = vperm.xlu2 %5640, %v6028_v5  }
  0xce   : > { %1138 = vperm.xlu1 %5641, %v6015_v3   ;;  %v6315_v56 = vpop.permute.xlu1 %769  ;;  %v6321_v8 = vpop.permute.xlu2 %879 }
  0xcf   : > { %8896 = vst [vmem:[#allocation35_spill] sm:$0xff] %v6315_v56  ;;  %v8915_v56 = vmov 0  }
  0xd0   : > { %8897 = vst [vmem:[#allocation36_spill] sm:$0xff] %v6321_v8 }
  0xd2   : > { %v6318_v0 = vpop.permute.xlu0 %1869  ;;  %659 = vperm.xlu0 %5660, %v6057_v11  }
  0xd5   : > { %1154 = vperm.xlu2 %5640, %v6047_v9  }
  0xd6   : > { %1150 = vperm.xlu1 %5641, %v6052_v10   ;;  %v6324_v6 = vpop.permute.xlu1 %784  ;;  %v6328_v52 = vpop.permute.xlu2 %891 }
  0xd7   : > { %8898 = vst [vmem:[#allocation37_spill] sm:$0xff] %v6324_v6  ;;  %v1714_v6 = vld [vmem:[%s6007_s23 + $0x28] sm:$0xff] }
  0xd8   : > { %8899 = vst [vmem:[#allocation38_spill] sm:$0xff] %v6328_v52 }
  0xda   : > { %674 = vperm.xlu0 %5660, %v6075_v14  }
  0xdb   : > { %v6330_v3 = vpop.permute.xlu0 %863 }
  0xdd   : > { %1166 = vperm.xlu2 %5640, %v6065_v12  }
  0xde   : > { %1162 = vperm.xlu1 %5641, %v6070_v13   ;;  %v6337_v11 = vpop.permute.xlu2 %903 }
  0xdf   : > { %v6334_v5 = vpop.permute.xlu1 %867  ;;  %8900 = vst [vmem:[#allocation39_spill] sm:$0xff] %v6337_v11 }
  0xe2   : > { %689 = vperm.xlu0 %5660, %v6093_v17  }
  0xe3   : > { %v6339_v10 = vpop.permute.xlu0 %883 }
  0xe4   : > { %8901 = vst [vmem:[#allocation40_spill] sm:$0xff] %v6339_v10  ;;  %v1712_v10 = vld [vmem:[%s6007_s23 + $0x18] sm:$0xff] }
  0xe5   : > { %1178 = vperm.xlu2 %5640, %v6083_v15  }
  0xe6   : > { %1174 = vperm.xlu1 %5641, %v6088_v16   ;;  %v6346_v14 = vpop.permute.xlu2 %915 }
  0xe7   : > { %v6343_v9 = vpop.permute.xlu1 %875  ;;  %8903 = vst [vmem:[#allocation42_spill] sm:$0xff] %v6346_v14 }
  0xe8   : > { %8902 = vst [vmem:[#allocation41_spill] sm:$0xff] %v6343_v9 }
  0xea   : > { %704 = vperm.xlu0 %5660, %v6111_v20  }
  0xeb   : > { %v6348_v13 = vpop.permute.xlu0 %895 }
  0xed   : > { %1190 = vperm.xlu2 %5640, %v6101_v18  }
  0xee   : > { %1186 = vperm.xlu1 %5641, %v6106_v19   ;;  %v6355_v17 = vpop.permute.xlu2 %927 }
  0xef   : > { %v6352_v12 = vpop.permute.xlu1 %887  ;;  %8905 = vst [vmem:[#allocation44_spill] sm:$0xff] %v6355_v17 }
  0xf0   : > { %8904 = vst [vmem:[#allocation43_spill] sm:$0xff] %v6352_v12 }
  0xf2   : > { %719 = vperm.xlu0 %5660, %v6129_v23  }
  0xf3   : > { %v6357_v16 = vpop.permute.xlu0 %907 }
  0xf5   : > { %1202 = vperm.xlu2 %5640, %v6119_v21  }
  0xf6   : > { %1198 = vperm.xlu1 %5641, %v6124_v22   ;;  %v6364_v20 = vpop.permute.xlu2 %939 }
  0xf7   : > { %v6361_v15 = vpop.permute.xlu1 %899  ;;  %8907 = vst [vmem:[#allocation46_spill] sm:$0xff] %v6364_v20 }
  0xf8   : > { %8906 = vst [vmem:[#allocation45_spill] sm:$0xff] %v6361_v15  ;;  %v6420_v15 = vld [vmem:[%s6007_s23] sm:$0xff] }
  0xfa   : > { %734 = vperm.xlu0 %5660, %v6147_v26   ;;  %v8912_v26 = vmov 1  }
  0xfb   : > { %v6366_v19 = vpop.permute.xlu0 %919 }
  0xfd   : > { %1214 = vperm.xlu2 %5640, %v6137_v24  }
  0xfe   : > { %1210 = vperm.xlu1 %5641, %v6142_v25   ;;  %v6373_v22 = vpop.permute.xlu2 %951 }
  0xff   : > { %v6370_v18 = vpop.permute.xlu1 %911  ;;  %8909 = vst [vmem:[#allocation48_spill] sm:$0xff] %v6373_v22 }
 0x100   : > { %8908 = vst [vmem:[#allocation47_spill] sm:$0xff] %v6370_v18  ;;  %v6433_v18 = vld [vmem:[%s6007_s23 + $0x38] sm:$0xff]  ;;  %s5578_s23 = sshll.u32 %s9085_s22, 3 }
 0x101   : > { %s6467_s30 = scalar_lea.vmem %s8751_s0, %s5578_s23 }
 0x102   : > { %749 = vperm.xlu0 %5660, %v6165_v29  }
 0x103   : > { %v6375_v21 = vpop.permute.xlu0 %931 }
 0x105   : > { %1226 = vperm.xlu2 %5640, %v6155_v27  }
 0x106   : > { %1222 = vperm.xlu1 %5641, %v6160_v28   ;;  %v6382_v25 = vpop.permute.xlu2 %963 }
 0x107   : > { %v6379_v23 = vpop.permute.xlu1 %923  ;;  %8911 = vst [vmem:[#allocation50_spill] sm:$0xff] %v6382_v25 }
 0x108   : > { %8910 = vst [vmem:[#allocation49_spill] sm:$0xff] %v6379_v23  ;;  %v8922_v23 = vmov 3  }
 0x10a   : > { %764 = vperm.xlu0 %5660, %v6256_v51  }
 0x10b   : > { %v6384_v24 = vpop.permute.xlu0 %943 }
 0x10d   : > { %1877 = vperm.xlu2 %5640, %v6010_v2  }
 0x10e   : > { %5642 = vset.pattern.permute.xlu1 %v8912_v26  ;;  %v6392_v27 = vpop.permute.xlu2 %975 }
 0x10f   : > { %1806 = vperm.xlu1 %5642, %v6010_v2   ;;  %v6389_v29 = vpop.permute.xlu1 %935  ;;  %8914 = vst [vmem:[#allocation52_spill] sm:$0xff] %v6392_v27 }
 0x110   : > { %8913 = vst [vmem:[#allocation51_spill] sm:$0xff] %v6389_v29 }
 0x112   : > { %779 = vperm.xlu0 %5660, %v6270_v55  }
 0x113   : > { %v6394_v28 = vpop.permute.xlu0 %955 }
 0x115   : > { %5644 = vset.pattern.permute.xlu2 %v8912_v26 }
 0x116   : > { %1802 = vperm.xlu2 %5644, %v1714_v6  }
 0x117   : > { %5643 = vset.pattern.permute.xlu1 %v8915_v56  ;;  %v6399_v22 = vpop.permute.xlu1 %947  ;;  %v6404_v60 = vpop.permute.xlu2 %1122 }
 0x118   : > { %8916 = vst [vmem:[#allocation53_spill] sm:$0xff] %v6399_v22  ;;  %1745 = vperm.xlu1 %5643, %v1714_v6  }
 0x11a   : > { %1750 = vperm.xlu0 %5660, %v6010_v2  }
 0x11b   : > { %v6402_v25 = vpop.permute.xlu0 %967 }
 0x11e   : > { %5648 = vset.pattern.permute.xlu2 %v8915_v56 }
 0x11f   : > { %v6409_v27 = vpop.permute.xlu1 %959  ;;  %v6416_v2 = vpop.permute.xlu2 %1134  ;;  %1740 = vperm.xlu2 %5648, %v6181_v32  }
 0x120   : > { %8917 = vst [vmem:[#allocation54_spill] sm:$0xff] %v6409_v27  ;;  %5647 = vset.pattern.permute.xlu1 %v8918_v58 }
 0x121   : > { %8919 = vst [vmem:[#allocation55_spill] sm:$0xff] %v6416_v2  ;;  %1873 = vperm.xlu1 %5647, %v1714_v6  }
 0x122   : > { %1730 = vperm.xlu0 %5660, %v6407_v62  }
 0x123   : > { %v6414_v54 = vpop.permute.xlu0 %979 }
 0x127   : > { %v6422_v22 = vpop.permute.xlu1 %971  ;;  %v6427_v29 = vpop.permute.xlu2 %1142  ;;  %5650 = vset.pattern.permute.xlu2 %v8922_v23 }
 0x128   : > { %8920 = vst [vmem:[#allocation56_spill] sm:$0xff] %v6422_v22  ;;  %1944 = vperm.xlu2 %5650, %v1714_v6  }
 0x129   : > { %8921 = vst [vmem:[#allocation57_spill] sm:$0xff] %v6427_v29  ;;  %5649 = vset.pattern.permute.xlu1 %v8912_v26 }
 0x12a   : > { %1720 = vperm.xlu0 %5660, %v6420_v15   ;;  %1798 = vperm.xlu1 %5649, %v6181_v32  }
 0x12b   : > { %v6425_v27 = vpop.permute.xlu0 %1786 }
 0x12f   : > { %v6435_v20 = vpop.permute.xlu1 %983  ;;  %v6439_v22 = vpop.permute.xlu2 %1154 }
 0x130   : > { %8923 = vst [vmem:[#allocation58_spill] sm:$0xff] %v6435_v20  ;;  %5653 = vset.pattern.permute.xlu2 %v8912_v26 }
 0x131   : > { %8924 = vst [vmem:[#allocation59_spill] sm:$0xff] %v6439_v22  ;;  %1794 = vperm.xlu2 %5653, %v1712_v10  }
 0x132   : > { %5665 = vset.pattern.permute.xlu0 %v8922_v23  ;;  %5652 = vset.pattern.permute.xlu1 %v8915_v56 }
 0x133   : > { %1952 = vperm.xlu0 %5665, %v6433_v18   ;;  %1735 = vperm.xlu1 %5652, %v1712_v10  }
 0x134   : > { %v6442_v29 = vpop.permute.xlu0 %629 }
 0x137   : > { %v6449_v20 = vpop.permute.xlu2 %1166 }
 0x138   : > { %v6446_v6 = vpop.permute.xlu1 %1130  ;;  %8925 = vst [vmem:[#allocation60_spill] sm:$0xff] %v6449_v20  ;;  %v5511_v20 = vld [vmem:[%s6467_s30 + $0x1] ss:$4 sm:$0x3] }
 0x139   : > { %5655 = vset.pattern.permute.xlu2 %v8918_v58  ;;  %v6480_v11 = vperm.slane %v5511_v20, 1 }
 0x13a   : > { %1865 = vperm.xlu2 %5655, %v1712_v10  }
 0x13b   : > { %5667 = vset.pattern.permute.xlu0 %v8918_v58  ;;  %5654 = vset.pattern.permute.xlu1 %v8922_v23  ;;  %8932 = vst [vmem:[#allocation67_spill] sm:$0xff] %v6480_v11 }
 0x13c   : > { %1242 = vperm.xlu0 %5667, %v6270_v55   ;;  %v6452_v17 = vpop.permute.xlu0 %634  ;;  %1940 = vperm.xlu1 %5654, %v6181_v32   ;;  %v626_v55 = vld [vmem:[%s6467_s30] ss:$4 sm:$0x3] }
 0x13d   : > { %v6474_v32 = vperm.slane %v626_v55, 0 }
 0x13f   : > { %v6460_v12 = vpop.permute.xlu2 %1178  ;;  %8929 = vst [vmem:[#allocation64_spill] sm:$0xff] %v6474_v32 }
 0x140   : > { %v6458_v22 = vpop.permute.xlu1 %1138  ;;  %8927 = vst [vmem:[#allocation62_spill] sm:$0xff] %v6460_v12  ;;  %v6476_v12 = vperm.slane %v626_v55, 1 }
 0x141   : > { %8926 = vst [vmem:[#allocation61_spill] sm:$0xff] %v6458_v22 }
 0x142   : > { %5657 = vset.pattern.permute.xlu2 %v8922_v23  ;;  %8930 = vst [vmem:[#allocation65_spill] sm:$0xff] %v6476_v12 }
 0x143   : > { %1936 = vperm.xlu2 %5657, %v1712_v10   ;;  %v1010_v10 = vmul.f32 %v6480_v11, %v6348_v13 }
 0x144   : > { %v6462_v14 = vpop.permute.xlu0 %659  ;;  %5656 = vset.pattern.permute.xlu1 %v8912_v26 }
 0x145   : > { %8928 = vst [vmem:[#allocation63_spill] sm:$0xff] %v6462_v14  ;;  %1790 = vperm.xlu1 %5656, %v6407_v62   ;;  %v6478_v14 = vperm.slane %v5511_v20, 0 }
 0x147   : > { %8931 = vst [vmem:[#allocation66_spill] sm:$0xff] %v6478_v14  ;;  %v6484_v52 = vpop.permute.xlu2 %1190  ;;  %v1009_v8 = vmul.f32 %v6478_v14, %v6348_v13 }
 0x148   : > { %v6482_v63 = vpop.permute.xlu1 %1150  ;;  %8934 = vst [vmem:[#allocation69_spill] sm:$0xff] %v6484_v52 }
 0x149   : > { %8933 = vst [vmem:[#allocation68_spill] sm:$0xff] %v6482_v63 }
 0x14b   : > { %5659 = vset.pattern.permute.xlu2 %v8915_v56 }
 0x14c   : > { %v675_v61 = vpop.permute.xlu0 %674  ;;  %1725 = vperm.xlu2 %5659, %v6282_v59  }
 0x14d   : > { %v810_v57 = vmul.f32 %v6474_v32, %v675_v61  ;;  %v811_v55 = vmul.f32 %v6476_v12, %v675_v61  ;;  %5658 = vset.pattern.permute.xlu1 %v8918_v58  ;;  %v1015_v61 = vmul.f32 %v6478_v14, %v6357_v16 }
 0x14e   : > { %1861 = vperm.xlu1 %5658, %v6407_v62  }
 0x14f   : > { %v6492_v53 = vadd.f32 %v1009_v8, %v810_v57  ;;  %v6494_v50 = vadd.f32 %v1010_v10, %v811_v55  ;;  %v6502_v63 = vpop.permute.xlu2 %1202  ;;  %v1016_v8 = vmul.f32 %v6480_v11, %v6357_v16  ;;  %v1021_v16 = vmul.f32 %v6478_v14, %v6366_v19 }
 0x150   : > { %v6500_v20 = vpop.permute.xlu1 %1162  ;;  %8938 = vst [vmem:[#allocation73_spill] sm:$0xff] %v6502_v63 }
 0x151   : > { %8935 = vst [vmem:[#allocation70_spill] sm:$0xff] %v6492_v53 }
 0x152   : > { %8936 = vst [vmem:[#allocation71_spill] sm:$0xff] %v6494_v50 }
 0x153   : > { %8937 = vst [vmem:[#allocation72_spill] sm:$0xff] %v6500_v20 }
 0x154   : > { %v690_v13 = vpop.permute.xlu0 %689  ;;  %1755 = vperm.xlu2 %5659, %v6433_v18  }
 0x155   : > { %v816_v57 = vmul.f32 %v6474_v32, %v690_v13  ;;  %v817_v10 = vmul.f32 %v6476_v12, %v690_v13  ;;  %v1022_v13 = vmul.f32 %v6480_v11, %v6366_v19 }
 0x156   : > { %5661 = vset.pattern.permute.xlu1 %v8922_v23 }
 0x157   : > { %v6510_v55 = vadd.f32 %v1015_v61, %v816_v57  ;;  %v6512_v50 = vadd.f32 %v1016_v8, %v817_v10  ;;  %1932 = vperm.xlu1 %5661, %v6407_v62   ;;  %v6519_v63 = vpop.permute.xlu2 %1214 }
 0x158   : > { %v6517_v20 = vpop.permute.xlu1 %1174  ;;  %8942 = vst [vmem:[#allocation77_spill] sm:$0xff] %v6519_v63 }
 0x159   : > { %8939 = vst [vmem:[#allocation74_spill] sm:$0xff] %v6510_v55 }
 0x15a   : > { %8940 = vst [vmem:[#allocation75_spill] sm:$0xff] %v6512_v50  ;;  %v1033_v50 = vmul.f32 %v6478_v14, %v6384_v24 }
 0x15b   : > { %8941 = vst [vmem:[#allocation76_spill] sm:$0xff] %v6517_v20 }
 0x15c   : > { %v705_v53 = vpop.permute.xlu0 %704  ;;  %5663 = vset.pattern.permute.xlu2 %v8918_v58 }
 0x15d   : > { %v822_v61 = vmul.f32 %v6474_v32, %v705_v53  ;;  %v823_v8 = vmul.f32 %v6476_v12, %v705_v53  ;;  %1857 = vperm.xlu2 %5663, %v6282_v59   ;;  %v1027_v53 = vmul.f32 %v6478_v14, %v6375_v21 }
 0x15f   : > { %v6527_v57 = vadd.f32 %v1021_v16, %v822_v61  ;;  %v6529_v10 = vadd.f32 %v1022_v13, %v823_v8  ;;  %5662 = vset.pattern.permute.xlu1 %v8912_v26  ;;  %v6536_v63 = vpop.permute.xlu2 %1226  ;;  %v1028_v16 = vmul.f32 %v6480_v11, %v6375_v21  ;;  %v1034_v21 = vmul.f32 %v6480_v11, %v6384_v24 }
 0x160   : > { %v6534_v62 = vpop.permute.xlu1 %1186  ;;  %8946 = vst [vmem:[#allocation81_spill] sm:$0xff] %v6536_v63  ;;  %1810 = vperm.xlu1 %5662, %v6433_v18  }
 0x161   : > { %8943 = vst [vmem:[#allocation78_spill] sm:$0xff] %v6527_v57 }
 0x162   : > { %8944 = vst [vmem:[#allocation79_spill] sm:$0xff] %v6529_v10 }
 0x163   : > { %8945 = vst [vmem:[#allocation80_spill] sm:$0xff] %v6534_v62 }
 0x164   : > { %v720_v19 = vpop.permute.xlu0 %719 }
 0x165   : > { %v828_v13 = vmul.f32 %v6474_v32, %v720_v19  ;;  %v829_v61 = vmul.f32 %v6476_v12, %v720_v19  ;;  %1881 = vperm.xlu2 %5663, %v6433_v18  }
 0x167   : > { %v6545_v8 = vadd.f32 %v1027_v53, %v828_v13  ;;  %v6547_v10 = vadd.f32 %v1028_v16, %v829_v61  ;;  %v6557_v55 = vpop.permute.xlu2 %1877  ;;  %v8828_v16 = vmov 0.0   ;;  %v1040_v61 = vmul.f32 %v6480_v11, %v6394_v28 }
 0x168   : > { %v6550_v63 = vpop.permute.xlu1 %1198  ;;  %1782 = vperm.xlu1 %5662, %v6420_v15   ;;  %2020 = vst [vmem:[#allocation2 + $0x68] sm:$0xff] %v8828_v16 }
 0x169   : > { %8947 = vst [vmem:[#allocation82_spill] sm:$0xff] %v6545_v8 }
 0x16a   : > { %8948 = vst [vmem:[#allocation83_spill] sm:$0xff] %v6547_v10 }
 0x16b   : > { %8949 = vst [vmem:[#allocation84_spill] sm:$0xff] %v6550_v63 }
 0x16c   : > { %v735_v57 = vpop.permute.xlu0 %734  ;;  %2021 = vst [vmem:[#allocation2 + $0x130] sm:$0xff] %v8828_v16 }
 0x16d   : > { %v834_v19 = vmul.f32 %v6474_v32, %v735_v57  ;;  %v835_v53 = vmul.f32 %v6476_v12, %v735_v57  ;;  %2022 = vst [vmem:[#allocation2 + $0x50] sm:$0x3] %v8828_v16  ;;  %1853 = vperm.xlu2 %5663, %v6420_v15  }
 0x16e   : > { %2023 = vst [vmem:[#allocation2 + $0xe8] sm:$0x3] %v8828_v16 }
 0x16f   : > { %v6563_v18 = vadd.f32 %v1033_v50, %v834_v19  ;;  %v6565_v13 = vadd.f32 %v1034_v21, %v835_v53  ;;  %1992 = vst [vmem:[#allocation2 + $0xb0] sm:$0xff] %v8828_v16  ;;  %v1039_v50 = vmul.f32 %v6478_v14, %v6394_v28  ;;  %v1045_v28 = vmul.f32 %v6478_v14, %v6402_v25 }
 0x170   : > { %1993 = vst [vmem:[#allocation2 + $0xd0] sm:$0xff] %v8828_v16  ;;  %v6572_v24 = vpop.permute.xlu1 %1210  ;;  %5664 = vset.pattern.permute.xlu1 %v8922_v23  ;;  %v6584_v53 = vpop.permute.xlu2 %1802 }
 0x171   : > { %8950 = vst [vmem:[#allocation85_spill] sm:$0xff] %v6563_v18  ;;  %1928 = vperm.xlu1 %5664, %v6282_v59  }
 0x172   : > { %8951 = vst [vmem:[#allocation86_spill] sm:$0xff] %v6565_v13 }
 0x173   : > { %8952 = vst [vmem:[#allocation87_spill] sm:$0xff] %v6572_v24 }
 0x174   : > { %1994 = vst [vmem:[#allocation2 + $0x10] sm:$0x3] %v8828_v16  ;;  %v750_v57 = vpop.permute.xlu0 %749 }
 0x175   : > { %1995 = vst [vmem:[#allocation2 + $0x48] sm:$0x3] %v8828_v16  ;;  %v840_v21 = vmul.f32 %v6474_v32, %v750_v57  ;;  %v841_v19 = vmul.f32 %v6476_v12, %v750_v57  ;;  %1230 = vperm.xlu2 %5663, %v6256_v51   ;;  %v1046_v57 = vmul.f32 %v6480_v11, %v6402_v25 }
 0x176   : > { %1996 = vst [vmem:[#allocation2 + $0x120] sm:$0xff] %v8828_v16 }
 0x177   : > { %1997 = vst [vmem:[#allocation2 + $0x38] sm:$0xff] %v8828_v16  ;;  %v6588_v13 = vadd.f32 %v1039_v50, %v840_v21  ;;  %v6590_v18 = vadd.f32 %v1040_v61, %v841_v19 }
 0x178   : > { %1998 = vst [vmem:[#allocation2 + $0xf8] sm:$0x3] %v8828_v16  ;;  %v6597_v59 = vpop.permute.xlu1 %1222 }
 0x179   : > { %8953 = vst [vmem:[#allocation88_spill] sm:$0xff] %v6588_v13  ;;  %1924 = vperm.xlu1 %5664, %v6420_v15   ;;  %v6609_v21 = vpop.permute.xlu2 %1740 }
 0x17a   : > { %8954 = vst [vmem:[#allocation89_spill] sm:$0xff] %v6590_v18 }
 0x17b   : > { %1999 = vst [vmem:[#allocation2 + $0x100] sm:$0x3] %v8828_v16 }
 0x17c   : > { %2000 = vst [vmem:[#allocation2 + $0x80] sm:$0xff] %v8828_v16  ;;  %v765_v50 = vpop.permute.xlu0 %764 }
 0x17d   : > { %2001 = vst [vmem:[#allocation2 + $0x108] sm:$0xff] %v8828_v16  ;;  %v846_v61 = vmul.f32 %v6474_v32, %v765_v50  ;;  %v847_v51 = vmul.f32 %v6476_v12, %v765_v50  ;;  %1238 = vperm.xlu2 %5663, %v6173_v30   ;;  %v1052_v50 = vmul.f32 %v6480_v11, %v6414_v54 }
 0x17e   : > { %8955 = vst [vmem:[#allocation90_spill] sm:$0xff] %v6597_v59 }
 0x17f   : > { %2002 = vst [vmem:[#allocation2 + $0x138] sm:$0x3] %v8828_v16  ;;  %v6612_v19 = vadd.f32 %v1045_v28, %v846_v61  ;;  %v6614_v59 = vadd.f32 %v1046_v57, %v847_v51  ;;  %v1051_v28 = vmul.f32 %v6478_v14, %v6414_v54  ;;  %v1717_v61 = vld [vmem:[%s8753_s2] ss:$4 sm:$0x3] }
 0x180   : > { %2003 = vst [vmem:[#allocation2 + $0xf0] sm:$0x3] %v8828_v16  ;;  %v5516_v51 = vld [vmem:[%s8753_s2 + $0x3] ss:$4 sm:$0x3]  ;;  %v6652_v10 = vperm.slane %v1717_v61, 0 }
 0x181   : > { %2004 = vst [vmem:[#allocation2 + $0x18] sm:$0xff] %v8828_v16  ;;  %v1807_v15 = vpop.permute.xlu1 %1806  ;;  %5666 = vset.pattern.permute.xlu1 %v8918_v58  ;;  %v5515_v54 = vld [vmem:[%s8753_s2 + $0x2] ss:$4 sm:$0x3]  ;;  %v6654_v8 = vperm.slane %v1717_v61, 1 }
 0x182   : > { %2005 = vst [vmem:[#allocation2 + $0xc8] sm:$0xff] %v8828_v16  ;;  %1234 = vperm.xlu1 %5666, %v6178_v31   ;;  %v5514_v31 = vld [vmem:[%s8753_s2 + $0x1] ss:$4 sm:$0x3]  ;;  %v6669_v61 = vperm.slane %v5515_v54, 0 }
 0x183   : > { %2006 = vst [vmem:[#allocation2 + $0x70] sm:$0x3] %v8828_v16 }
 0x184   : > { %2007 = vst [vmem:[#allocation2 + $0x20] sm:$0x3] %v8828_v16  ;;  %v780_v25 = vpop.permute.xlu0 %779 }
 0x185   : > { %2008 = vst [vmem:[#allocation2 + $0x128] sm:$0xff] %v8828_v16  ;;  %v852_v57 = vmul.f32 %v6474_v32, %v780_v25  ;;  %v853_v30 = vmul.f32 %v6476_v12, %v780_v25  ;;  %v6645_v25 = vpop.permute.xlu2 %1944  ;;  %5668 = vset.pattern.permute.xlu2 %v8922_v23 }
 0x186   : > { %2009 = vst [vmem:[#allocation2 + $0x110] sm:$0xff] %v8828_v16  ;;  %1385 = vperm.xlu2 %5668, %v6194_v34  }
 0x187   : > { %2010 = vst [vmem:[#allocation2 + $0x8] sm:$0x3] %v8828_v16  ;;  %v6641_v18 = vadd.f32 %v1051_v28, %v852_v57  ;;  %v6643_v13 = vadd.f32 %v1052_v50, %v853_v30  ;;  %v6659_v28 = vperm.slane %v5514_v31, 0  ;;  %v6661_v50 = vperm.slane %v5514_v31, 1 }
 0x188   : > { %2011 = vst [vmem:[#allocation2 + $0x98] sm:$0x3] %v8828_v16  ;;  %v6665_v57 = vperm.slane %v5516_v51, 0  ;;  %v6667_v30 = vperm.slane %v5516_v51, 1  ;;  %v1901_v51 = vmul.f32 %v6669_v61, %v6557_v55 }
 0x189   : > { %2012 = vst [vmem:[#allocation2 + $0xa8] sm:$0xff] %v8828_v16  ;;  %v1830_v24 = vmul.f32 %v6659_v28, %v1807_v15  ;;  %v1831_v31 = vmul.f32 %v6661_v50, %v1807_v15  ;;  %v1821_v45 = vmul.f32 %v6661_v50, %v6425_v27 }
 0x18a   : > { %8956 = vst [vmem:[#allocation91_spill] sm:$0xff] %v6641_v18  ;;  %v1746_v62 = vpop.permute.xlu1 %1745  ;;  %1246 = vperm.xlu1 %5666, %v6189_v33   ;;  %v1972_v15 = vmul.f32 %v6665_v57, %v6221_v40  ;;  %v1973_v33 = vmul.f32 %v6667_v30, %v6221_v40  ;;  %v1829_v40 = vmul.f32 %v6661_v50, %v6584_v53 }
 0x18b   : > { %8957 = vst [vmem:[#allocation92_spill] sm:$0xff] %v6643_v13  ;;  %v6671_v13 = vperm.slane %v5515_v54, 1 }
 0x18c   : > { %2013 = vst [vmem:[#allocation2 + $0x90] sm:$0xff] %v8828_v16  ;;  %v1751_v18 = vpop.permute.xlu0 %1750 }
 0x18d   : > { %2014 = vst [vmem:[#allocation2 + $0xe0] sm:$0x3] %v8828_v16  ;;  %v1775_v63 = vmul.f32 %v6652_v10, %v1751_v18  ;;  %v1776_v34 = vmul.f32 %v6654_v8, %v1751_v18  ;;  %v1902_v54 = vmul.f32 %v6671_v13, %v6557_v55  ;;  %v6687_v18 = vpop.permute.xlu2 %1794 }
 0x18e   : > { %2015 = vst [vmem:[#allocation2 + $0x88] sm:$0x3] %v8828_v16  ;;  %1393 = vperm.xlu2 %5668, %v6020_v4  }
 0x18f   : > { %2016 = vst [vmem:[#allocation2 + $0xc0] sm:$0xff] %v8828_v16  ;;  %v1846_v20 = vadd.f32 %v1830_v24, %v1775_v63  ;;  %v1847_v52 = vadd.f32 %v1831_v31, %v1776_v34  ;;  %v1828_v24 = vmul.f32 %v6659_v28, %v6584_v53  ;;  %v1773_v31 = vmul.f32 %v6652_v10, %v1746_v62 }
 0x190   : > { %2017 = vst [vmem:[#allocation2 + $0x118] sm:$0xff] %v8828_v16 }
 0x191   : > { %2018 = vst [vmem:[#allocation2 + $0xd8] sm:$0x3] %v8828_v16  ;;  %v1917_v49 = vadd.f32 %v1901_v51, %v1846_v20  ;;  %v1918_v48 = vadd.f32 %v1902_v54, %v1847_v52 }
 0x192   : > { %2019 = vst [vmem:[#allocation2 + $0xa0] sm:$0x3] %v8828_v16  ;;  %5669 = vset.pattern.permute.xlu1 %v8922_v23 }
 0x193   : > { %2024 = vst [vmem:[#allocation2 + $0x58] sm:$0xff] %v8828_v16  ;;  %v1988_v63 = vadd.f32 %v1972_v15, %v1917_v49  ;;  %v1989_v55 = vadd.f32 %v1973_v33, %v1918_v48  ;;  %v1774_v48 = vmul.f32 %v6654_v8, %v1746_v62  ;;  %v1874_v4 = vpop.permute.xlu1 %1873  ;;  %1389 = vperm.xlu1 %5669, %v6038_v7  }
 0x194   : > { %2025 = vst [vmem:[#allocation2 + $0x78] sm:$0xff] %v8828_v16  ;;  %v1844_v49 = vadd.f32 %v1828_v24, %v1773_v31  ;;  %v1899_v34 = vmul.f32 %v6669_v61, %v1874_v4  ;;  %v1900_v53 = vmul.f32 %v6671_v13, %v1874_v4  ;;  %v1970_v62 = vmul.f32 %v6665_v57, %v6645_v25 }
 0x195   : > { %2026 = vst [vmem:[#allocation2 + $0x30] sm:$0x3] %v8828_v16  ;;  %v2100_v52 = vrot.slane %v1988_v63, 7  ;;  %v2101_v20 = vrot.slane %v1989_v55, 7  ;;  %v1845_v51 = vadd.f32 %v1829_v40, %v1774_v48  ;;  %v1866_v54 = vpop.permute.xlu2 %1865  ;;  %v1971_v33 = vmul.f32 %v6667_v30, %v6645_v25 }
 0x196   : > { %2027 = vst [vmem:[#allocation2 + $0x40] sm:$0x3] %v8828_v16  ;;  %v1915_v15 = vadd.f32 %v1899_v34, %v1844_v49 }
 0x197   : > { %2028 = vst [vmem:[#allocation2 + $0x28] sm:$0xff] %v8828_v16  ;;  %v1916_v7 = vadd.f32 %v1900_v53, %v1845_v51 }
 0x198   : > { %2029 = vst [vmem:[#allocation2] sm:$0xff] %v8828_v16  ;;  %v1986_v63 = vadd.f32 %v1970_v62, %v1915_v15 }
 0x199   : > { %2030 = vst [vmem:[#allocation2 + $0xb8] sm:$0x3] %v8828_v16  ;;  %v1987_v24 = vadd.f32 %v1971_v33, %v1916_v7 }
 0x19a   : > { %2031 = vst [vmem:[#allocation2 + $0x60] sm:$0x3] %v8828_v16  ;;  %v2089_v49 = vrot.slane %v1986_v63, 7  ;;  %v1824_v63 = vmul.f32 %v6659_v28, %v6687_v18 }
 0x19b   : > { %4007 = vst [vmem:[#allocation3 + $0x58] sm:$0x3f] %v8828_v16  ;;  %v2090_v62 = vrot.slane %v1987_v24, 7  ;;  %v1820_v24 = vmul.f32 %v6659_v28, %v6425_v27 }
 0x19c   : > { %2105 = vst [vmem:[#allocation2 + $0x68] sm:$0xfe] %v2100_v52  ;;  %v1799_v40 = vpop.permute.xlu1 %1798 }
 0x19d   : > { %2106 = vst [vmem:[#allocation2 + $0x130] sm:$0xfe] %v2101_v20  ;;  %v1937_v51 = vpop.permute.xlu2 %1936 }
 0x19e   : > { %2107 = vst [vmem:[#allocation2 + $0x50] sm:$0x1] %v2100_v52 }
 0x19f   : > { %2108 = vst [vmem:[#allocation2 + $0xe8] sm:$0x1] %v2101_v20 }
 0x1a0   : > { %4008 = vst [vmem:[#allocation3 + $0x30] sm:$0x3f] %v8828_v16 }
 0x1a1   : > { %4009 = vst [vmem:[#allocation3 + $0x38] sm:$0x3f] %v8828_v16 }
 0x1a2   : > { %4010 = vst [vmem:[#allocation3 + $0x28] sm:$0x3f] %v8828_v16 }
 0x1a3   : > { %4011 = vst [vmem:[#allocation3 + $0x48] sm:$0x3f] %v8828_v16  ;;  %v6718_v55 = vld [vmem:[#allocation2 + $0x68] sm:$0xff] }
 0x1a4   : > { %4012 = vst [vmem:[#allocation3 + $0x40] sm:$0x3f] %v8828_v16  ;;  %2982 = vmatpush.xpose.msra.mxu0 %v6718_v55  ;;  %v6722_v31 = vld [vmem:[#allocation2 + $0x130] sm:$0xff]  ;;  %v2164_v25 = vld [vmem:[#allocation2 + $0x68] sm:$0xfe] }
 0x1a5   : > { %4013 = vst [vmem:[#allocation3 + $0x8] sm:$0x3f] %v8828_v16  ;;  %3005 = vmatpush.xpose.msra.mxu1 %v6722_v31  ;;  %v2166_v52 = vld [vmem:[#allocation2 + $0x50] sm:$0x1]  ;;  %v2243_v20 = vrot.slane %v2164_v25, 1  ;;  %v1825_v25 = vmul.f32 %v6661_v50, %v6687_v18  ;;  %v1772_v18 = vmul.f32 %v6654_v8, %v6609_v21 }
 0x1a6   : > { %4014 = vst [vmem:[#allocation3 + $0x50] sm:$0x3f] %v8828_v16  ;;  %v2244_v48 = vrot.slane %v2166_v52, 1  ;;  %v2165_v4 = vld [vmem:[#allocation2 + $0x130] sm:$0xfe]  ;;  %v1771_v52 = vmul.f32 %v6652_v10, %v6609_v21 }
 0x1a7   : > { %4015 = vst [vmem:[#allocation3 + $0x10] sm:$0x3f] %v8828_v16  ;;  %v2167_v34 = vld [vmem:[#allocation2 + $0xe8] sm:$0x1]  ;;  %v2246_v53 = vrot.slane %v2165_v4, 1  ;;  %v1895_v4 = vmul.f32 %v6669_v61, %v1866_v54 }
 0x1a8   : > { %4016 = vst [vmem:[#allocation3 + $0x18] sm:$0x3f] %v8828_v16  ;;  %v2245_v15 = vsel %vm2200_vm0, %v2243_v20, %v2244_v48  ;;  %v2247_v33 = vrot.slane %v2167_v34, 1  ;;  %v1826_v20 = vmul.f32 %v6659_v28, %v1799_v40  ;;  %v1736_v48 = vpop.permute.xlu1 %1735  ;;  %v1896_v34 = vmul.f32 %v6671_v13, %v1866_v54 }
 0x1a9   : > { %4017 = vst [vmem:[#allocation3] sm:$0x3f] %v8828_v16  ;;  %3028 = vmatpush.xpose.msra.mxu2 %v2245_v15  ;;  %v1770_v15 = vmul.f32 %v6654_v8, %v1736_v48 }
 0x1aa   : > { %4018 = vst [vmem:[#allocation3 + $0x20] sm:$0x3f] %v8828_v16  ;;  %v2248_v7 = vsel %vm2200_vm0, %v2246_v53, %v2247_v33  ;;  %v1769_v53 = vmul.f32 %v6652_v10, %v1736_v48  ;;  %v1966_v33 = vmul.f32 %v6665_v57, %v1937_v51  ;;  %v1842_v48 = vadd.f32 %v1826_v20, %v1771_v52 }
 0x1ab   : > { %2094 = vst [vmem:[#allocation2 + $0xc0] sm:$0xfe] %v2089_v49  ;;  %3051 = vmatpush.xpose.msra.mxu3 %v2248_v7  ;;  %v1726_v7 = vpop.permute.xlu2 %1725  ;;  %v1841_v47 = vadd.f32 %v1825_v25, %v1770_v15  ;;  %v1897_v52 = vmul.f32 %v6669_v61, %v6318_v0 }
 0x1ac   : > { %2095 = vst [vmem:[#allocation2 + $0x118] sm:$0xfe] %v2090_v62  ;;  %v1840_v16 = vadd.f32 %v1824_v63, %v1769_v53  ;;  %v1765_v46 = vmul.f32 %v6652_v10, %v1726_v7  ;;  %v1766_v54 = vmul.f32 %v6654_v8, %v1726_v7 }
 0x1ad   : > { %2096 = vst [vmem:[#allocation2 + $0xd8] sm:$0x1] %v2089_v49  ;;  %v1827_v49 = vmul.f32 %v6661_v50, %v1799_v40 }
 0x1ae   : > { %2097 = vst [vmem:[#allocation2 + $0xa0] sm:$0x1] %v2090_v62  ;;  %v1967_v62 = vmul.f32 %v6667_v30, %v1937_v51  ;;  %v1911_v39 = vadd.f32 %v1895_v4, %v1840_v16  ;;  %v1912_v51 = vadd.f32 %v1896_v34, %v1841_v47  ;;  %v6760_v25 = vadd.f32 %v1820_v24, %v1765_v46 }
 0x1af   : > { %v1843_v53 = vadd.f32 %v1827_v49, %v1772_v18  ;;  %v6763_v27 = vadd.f32 %v1821_v45, %v1766_v54  ;;  %v1898_v47 = vmul.f32 %v6671_v13, %v6318_v0  ;;  %v1913_v18 = vadd.f32 %v1897_v52, %v1842_v48 }
 0x1b0   : > { %v1982_v20 = vadd.f32 %v1966_v33, %v1911_v39  ;;  %v1983_v37 = vadd.f32 %v1967_v62, %v1912_v51  ;;  %v1941_v34 = vpop.permute.xlu1 %1940 }
 0x1b1   : > { %v1914_v49 = vadd.f32 %v1898_v47, %v1843_v53  ;;  %v1968_v54 = vmul.f32 %v6665_v57, %v1941_v34  ;;  %v1969_v39 = vmul.f32 %v6667_v30, %v1941_v34 }
 0x1b2   : > { %v6755_v42 = vld [vmem:[#allocation2 + $0xc0] sm:$0xff]  ;;  %v2067_v46 = vrot.slane %v1982_v20, 7  ;;  %v2068_v24 = vrot.slane %v1983_v37, 7 }
 0x1b3   : > { %v2160_v21 = vld [vmem:[#allocation2 + $0xc0] sm:$0xfe]  ;;  %2983 = vmatpush.xpose.msra.mxu0 %v6755_v42  ;;  %v6758_v40 = vld [vmem:[#allocation2 + $0x118] sm:$0xff]  ;;  %v6773_v33 = vpop.permute.xlu2 %1755  ;;  %v1984_v0 = vadd.f32 %v1968_v54, %v1913_v18 }
 0x1b4   : > { %v2237_v38 = vrot.slane %v2160_v21, 1  ;;  %v2161_v63 = vld [vmem:[#allocation2 + $0x118] sm:$0xfe]  ;;  %3006 = vmatpush.xpose.msra.mxu1 %v6758_v40  ;;  %v2162_v15 = vld [vmem:[#allocation2 + $0xd8] sm:$0x1] }
 0x1b5   : > { %v2240_v7 = vrot.slane %v2161_v63, 1  ;;  %v2238_v22 = vrot.slane %v2162_v15, 1  ;;  %v2163_v36 = vld [vmem:[#allocation2 + $0xa0] sm:$0x1]  ;;  %2072 = vst [vmem:[#allocation2 + $0x128] sm:$0xfe] %v2067_v46 }
 0x1b6   : > { %v2241_v16 = vrot.slane %v2163_v36, 1  ;;  %2073 = vst [vmem:[#allocation2 + $0x110] sm:$0xfe] %v2068_v24  ;;  %v1985_v36 = vadd.f32 %v1969_v39, %v1914_v49  ;;  %v2078_v37 = vrot.slane %v1984_v0, 7 }
 0x1b7   : > { %v2239_v4 = vsel %vm2200_vm0, %v2237_v38, %v2238_v22  ;;  %2074 = vst [vmem:[#allocation2 + $0x8] sm:$0x1] %v2067_v46 }
 0x1b8   : > { %3029 = vmatpush.xpose.msra.mxu2 %v2239_v4  ;;  %v2242_v45 = vsel %vm2200_vm0, %v2240_v7, %v2241_v16  ;;  %2075 = vst [vmem:[#allocation2 + $0x98] sm:$0x1] %v2068_v24  ;;  %v2079_v38 = vrot.slane %v1985_v36, 7  ;;  %v1791_v22 = vpop.permute.xlu1 %1790  ;;  %v1731_v36 = vpop.permute.xlu0 %1730 }
 0x1b9   : > { %3052 = vmatpush.xpose.msra.mxu3 %v2242_v45  ;;  %2083 = vst [vmem:[#allocation2 + $0xa8] sm:$0xfe] %v2078_v37 }
 0x1ba   : > { %2084 = vst [vmem:[#allocation2 + $0x90] sm:$0xfe] %v2079_v38 }
 0x1bb   : > { %2085 = vst [vmem:[#allocation2 + $0xe0] sm:$0x1] %v2078_v37  ;;  %v6775_v62 = vpop.permute.xlu2 %1857 }
 0x1bc   : > { %2086 = vst [vmem:[#allocation2 + $0x88] sm:$0x1] %v2079_v38  ;;  %v2152_v51 = vld [vmem:[#allocation2 + $0x128] sm:$0xfe] }
 0x1bd   : > { %v2153_v7 = vld [vmem:[#allocation2 + $0x110] sm:$0xfe]  ;;  %v6783_v45 = vld [vmem:[#allocation2 + $0x128] sm:$0xff]  ;;  %v2225_v39 = vrot.slane %v2152_v51, 1  ;;  %v1768_v51 = vmul.f32 %v6654_v8, %v1731_v36 }
 0x1be   : > { %v2154_v47 = vld [vmem:[#allocation2 + $0x8] sm:$0x1]  ;;  %v6787_v54 = vld [vmem:[#allocation2 + $0x110] sm:$0xff]  ;;  %v2228_v38 = vrot.slane %v2153_v7, 1 }
 0x1bf   : > { %v2155_v24 = vld [vmem:[#allocation2 + $0x98] sm:$0x1]  ;;  %v2226_v0 = vrot.slane %v2154_v47, 1 }
 0x1c0   : > { %v6777_v48 = vld [vmem:[#allocation2 + $0xa8] sm:$0xff]  ;;  %v1862_v4 = vpop.permute.xlu1 %1861 }
 0x1c1   : > { %v2156_v21 = vld [vmem:[#allocation2 + $0xa8] sm:$0xfe]  ;;  %2984 = vmatpush.xpose.msra.mxu0 %v6777_v48  ;;  %v6780_v63 = vld [vmem:[#allocation2 + $0x90] sm:$0xff]  ;;  %v1893_v47 = vmul.f32 %v6669_v61, %v1862_v4 }
 0x1c2   : > { %v2231_v53 = vrot.slane %v2156_v21, 1  ;;  %v2157_v15 = vld [vmem:[#allocation2 + $0x90] sm:$0xfe]  ;;  %3007 = vmatpush.xpose.msra.mxu1 %v6780_v63  ;;  %v2158_v52 = vld [vmem:[#allocation2 + $0xe0] sm:$0x1]  ;;  %v2229_v21 = vrot.slane %v2155_v24, 1 }
 0x1c3   : > { %v2234_v20 = vrot.slane %v2157_v15, 1  ;;  %v2232_v16 = vrot.slane %v2158_v52, 1  ;;  %v2159_v46 = vld [vmem:[#allocation2 + $0x88] sm:$0x1]  ;;  %v1882_v18 = vpop.permute.xlu2 %1881  ;;  %v1822_v15 = vmul.f32 %v6659_v28, %v1791_v22  ;;  %v1823_v52 = vmul.f32 %v6661_v50, %v1791_v22 }
 0x1c4   : > { %v2235_v34 = vrot.slane %v2159_v46, 1  ;;  %v2230_v7 = vsel %vm2200_vm0, %v2228_v38, %v2229_v21 }
 0x1c5   : > { %v2233_v49 = vsel %vm2200_vm0, %v2231_v53, %v2232_v16  ;;  %2985 = vmatpush.xpose.msra.mxu0 %v6783_v45  ;;  %v1767_v53 = vmul.f32 %v6652_v10, %v1731_v36  ;;  %v2227_v16 = vsel %vm2200_vm0, %v2225_v39, %v2226_v0  ;;  %v1839_v24 = vadd.f32 %v1823_v52, %v1768_v51  ;;  %v5512_v0 = vld [vmem:[%s6467_s30 + $0x2] ss:$4 sm:$0x3]  ;;  %v6804_v36 = vpop.permute.xlu0 %1720 }
 0x1c6   : > { %3030 = vmatpush.xpose.msra.mxu2 %v2233_v49  ;;  %v2236_v37 = vsel %vm2200_vm0, %v2234_v20, %v2235_v34  ;;  %3008 = vmatpush.xpose.msra.mxu1 %v6787_v54  ;;  %v1894_v20 = vmul.f32 %v6671_v13, %v1862_v4  ;;  %v6806_v38 = vperm.slane %v5512_v0, 0  ;;  %v6808_v21 = vperm.slane %v5512_v0, 1 }
 0x1c7   : > { %3053 = vmatpush.xpose.msra.mxu3 %v2236_v37  ;;  %v1838_v46 = vadd.f32 %v1822_v15, %v1767_v53  ;;  %v1777_v51 = vmul.f32 %v6652_v10, %v6773_v33 }
 0x1c8   : > { %v1910_v37 = vadd.f32 %v1894_v20, %v1839_v24 }
 0x1c9   : > { %v1933_v22 = vpop.permute.xlu1 %1932  ;;  %v1909_v49 = vadd.f32 %v1893_v47, %v1838_v46  ;;  %v1904_v47 = vmul.f32 %v6671_v13, %v1882_v18 }
 0x1ca   : > { %3031 = vmatpush.xpose.msra.mxu2 %v2227_v16  ;;  %v1964_v9 = vmul.f32 %v6665_v57, %v1933_v22  ;;  %v1965_v39 = vmul.f32 %v6667_v30, %v1933_v22 }
 0x1cb   : > { %3054 = vmatpush.xpose.msra.mxu3 %v2230_v7  ;;  %v6799_v34 = vpop.permute.xlu2 %1853 }
 0x1cc   : > { %v1980_v2 = vadd.f32 %v1964_v9, %v1909_v49  ;;  %v1981_v4 = vadd.f32 %v1965_v39, %v1910_v37  ;;  %v1778_v9 = vmul.f32 %v6654_v8, %v6773_v33 }
 0x1cd   : > { %v1953_v49 = vpop.permute.xlu0 %1952 }
 0x1ce   : > { %v2056_v16 = vrot.slane %v1980_v2, 7  ;;  %v2057_v43 = vrot.slane %v1981_v4, 7  ;;  %v1903_v2 = vmul.f32 %v6669_v61, %v1882_v18  ;;  %v1974_v33 = vmul.f32 %v6665_v57, %v1953_v49 }
 0x1cf   : > { %v1975_v37 = vmul.f32 %v6667_v30, %v1953_v49 }
 0x1d0   : > { %2061 = vst [vmem:[#allocation2 + $0x18] sm:$0xfe] %v2056_v16 }
 0x1d1   : > { %2062 = vst [vmem:[#allocation2 + $0xc8] sm:$0xfe] %v2057_v43 }
 0x1d2   : > { %2063 = vst [vmem:[#allocation2 + $0x70] sm:$0x1] %v2056_v16  ;;  %v1811_v20 = vpop.permute.xlu1 %1810 }
 0x1d3   : > { %v1231_v15 = vpop.permute.xlu2 %1230  ;;  %2064 = vst [vmem:[#allocation2 + $0x20] sm:$0x1] %v2057_v43  ;;  %v1832_v24 = vmul.f32 %v6659_v28, %v1811_v20  ;;  %v1833_v22 = vmul.f32 %v6661_v50, %v1811_v20 }
 0x1d4   : > { %v1308_v52 = vmul.f32 %v6806_v38, %v1231_v15  ;;  %v1309_v53 = vmul.f32 %v6808_v21, %v1231_v15 }
 0x1d5   : > { %v1848_v39 = vadd.f32 %v1832_v24, %v1777_v51  ;;  %v1849_v18 = vadd.f32 %v1833_v22, %v1778_v9 }
 0x1d6   : > { %v6819_v7 = vadd.f32 %v1308_v52, %v6612_v19  ;;  %v6822_v46 = vadd.f32 %v1309_v53, %v6614_v59  ;;  %v792_v53 = vmul.f32 %v6474_v32, %v6442_v29 }
 0x1d7   : > { %v1919_v0 = vadd.f32 %v1903_v2, %v1848_v39  ;;  %v1920_v4 = vadd.f32 %v1904_v47, %v1849_v18  ;;  %v6828_v43 = vld [vmem:[#allocation2 + $0x18] sm:$0xff]  ;;  %v793_v2 = vmul.f32 %v6476_v12, %v6442_v29  ;;  %v991_v39 = vmul.f32 %v6478_v14, %v6302_v35 }
 0x1d8   : > { %8958 = vst [vmem:[#allocation93_spill] sm:$0xff] %v6819_v7  ;;  %v2148_v19 = vld [vmem:[#allocation2 + $0x18] sm:$0xfe]  ;;  %2986 = vmatpush.xpose.msra.mxu0 %v6828_v43  ;;  %v6831_v59 = vld [vmem:[#allocation2 + $0xc8] sm:$0xff]  ;;  %v1254_v29 = vmul.f32 %v6806_v38, %v6404_v60 }
 0x1d9   : > { %8959 = vst [vmem:[#allocation94_spill] sm:$0xff] %v6822_v46  ;;  %v2219_v15 = vrot.slane %v2148_v19, 1  ;;  %v2149_v52 = vld [vmem:[#allocation2 + $0xc8] sm:$0xfe]  ;;  %v1990_v20 = vadd.f32 %v1974_v33, %v1919_v0  ;;  %v1991_v51 = vadd.f32 %v1975_v37, %v1920_v4  ;;  %3009 = vmatpush.xpose.msra.mxu1 %v6831_v59  ;;  %v2150_v9 = vld [vmem:[#allocation2 + $0x70] sm:$0x1]  ;;  %v992_v33 = vmul.f32 %v6480_v11, %v6302_v35 }
 0x1da   : > { %v1783_v47 = vpop.permute.xlu1 %1782  ;;  %v2220_v24 = vrot.slane %v2150_v9, 1  ;;  %v2151_v22 = vld [vmem:[#allocation2 + $0x20] sm:$0x1]  ;;  %v2222_v49 = vrot.slane %v2149_v52, 1  ;;  %v1255_v4 = vmul.f32 %v6808_v21, %v6404_v60  ;;  %v1055_v52 = vadd.f32 %v991_v39, %v792_v53  ;;  %v8990_v7 = vld [vmem:[#allocation39_spill] sm:$0xff] }
 0x1db   : > { %v6833_v16 = vpop.permute.xlu2 %1238  ;;  %v2111_v18 = vrot.slane %v1990_v20, 7  ;;  %v2112_v19 = vrot.slane %v1991_v51, 7  ;;  %v5513_v46 = vld [vmem:[%s6467_s30 + $0x3] ss:$4 sm:$0x3]  ;;  %v2223_v0 = vrot.slane %v2151_v22, 1  ;;  %v1056_v9 = vadd.f32 %v992_v33, %v793_v2 }
 0x1dc   : > { %8960 = vst [vmem:[#allocation95_spill] sm:$0xff] %v6833_v16  ;;  %v2221_v37 = vsel %vm2200_vm0, %v2219_v15, %v2220_v24  ;;  %v6851_v51 = vperm.slane %v5513_v46, 0  ;;  %v6853_v35 = vperm.slane %v5513_v46, 1  ;;  %v1891_v15 = vmul.f32 %v6669_v61, %v6775_v62  ;;  %v3611_v16 = vld [vmem:[#allocation4 + $0x2c0] sm:$0xff] }
 0x1dd   : > { %2116 = vst [vmem:[#allocation2 + $0x58] sm:$0xfe] %v2111_v18  ;;  %3032 = vmatpush.xpose.msra.mxu2 %v2221_v37  ;;  %v2224_v20 = vsel %vm2200_vm0, %v2222_v49, %v2223_v0  ;;  %v1892_v24 = vmul.f32 %v6671_v13, %v6775_v62  ;;  %v995_v60 = vmul.f32 %v6478_v14, %v6334_v5 }
 0x1de   : > { %2117 = vst [vmem:[#allocation2 + $0x78] sm:$0xfe] %v2112_v19  ;;  %3055 = vmatpush.xpose.msra.mxu3 %v2224_v20  ;;  %v996_v53 = vmul.f32 %v6480_v11, %v6334_v5  ;;  %v1318_v22 = vadd.f32 %v1254_v29, %v1055_v52  ;;  %v1319_v46 = vadd.f32 %v1255_v4, %v1056_v9 }
 0x1df   : > { %2118 = vst [vmem:[#allocation2 + $0x30] sm:$0x1] %v2111_v18  ;;  %v1907_v33 = vadd.f32 %v1891_v15, %v6760_v25  ;;  %v1908_v62 = vadd.f32 %v1892_v24, %v6763_v27  ;;  %v1818_v18 = vmul.f32 %v6659_v28, %v1783_v47  ;;  %v796_v27 = vmul.f32 %v6474_v32, %v6223_v41 }
 0x1e0   : > { %2119 = vst [vmem:[#allocation2 + $0x40] sm:$0x1] %v2112_v19  ;;  %v1819_v19 = vmul.f32 %v6661_v50, %v1783_v47  ;;  %v797_v28 = vmul.f32 %v6476_v12, %v6223_v41  ;;  %v1763_v50 = vmul.f32 %v6652_v10, %v6804_v36  ;;  %v1764_v47 = vmul.f32 %v6654_v8, %v6804_v36 }
 0x1e1   : > { %v1258_v4 = vmul.f32 %v6806_v38, %v6446_v6  ;;  %v1259_v52 = vmul.f32 %v6808_v21, %v6446_v6  ;;  %v1889_v10 = vmul.f32 %v6669_v61, %v6799_v34  ;;  %v1890_v8 = vmul.f32 %v6671_v13, %v6799_v34 }
 0x1e2   : > { %v1834_v15 = vadd.f32 %v1818_v18, %v1763_v50  ;;  %v1835_v24 = vadd.f32 %v1819_v19, %v1764_v47  ;;  %v1060_v41 = vadd.f32 %v996_v53, %v797_v28 }
 0x1e3   : > { %v1386_v2 = vpop.permute.xlu2 %1385  ;;  %v1929_v5 = vpop.permute.xlu1 %1928 }
 0x1e4   : > { %v1517_v49 = vmul.f32 %v6851_v51, %v1386_v2  ;;  %v1518_v39 = vmul.f32 %v6853_v35, %v1386_v2  ;;  %v1962_v29 = vmul.f32 %v6665_v57, %v1929_v5  ;;  %v1963_v25 = vmul.f32 %v6667_v30, %v1929_v5 }
 0x1e5   : > { %v1059_v2 = vadd.f32 %v995_v60, %v796_v27  ;;  %v1323_v6 = vadd.f32 %v1259_v52, %v1060_v41  ;;  %v1905_v53 = vadd.f32 %v1889_v10, %v1834_v15  ;;  %v2136_v10 = vld [vmem:[#allocation2 + $0xb0] sm:$0xfe] }
 0x1e6   : > { %v1581_v37 = vadd.f32 %v1517_v49, %v1318_v22  ;;  %v1582_v0 = vadd.f32 %v1518_v39, %v1319_v46  ;;  %v1978_v9 = vadd.f32 %v1962_v29, %v1907_v33  ;;  %v1979_v20 = vadd.f32 %v1963_v25, %v1908_v62 }
 0x1e7   : > { %v1322_v49 = vadd.f32 %v1258_v4, %v1059_v2  ;;  %v1906_v62 = vadd.f32 %v1890_v8, %v1835_v24  ;;  %v2295_v24 = vld [vmem:[#allocation2 + $0x50] sm:$0x3] }
 0x1e8   : > { %1645 = vst [vmem:[%s6873_s29] sm:$0xff] %v1581_v37  ;;  %v2045_v22 = vrot.slane %v1978_v9, 7  ;;  %v2046_v46 = vrot.slane %v1979_v20, 7  ;;  %v2138_v8 = vld [vmem:[#allocation2 + $0x10] sm:$0x1] }
 0x1e9   : > { %1646 = vst [vmem:[%s6873_s29 + $0x8] sm:$0xff] %v1582_v0 }
 0x1ea   : > { %2050 = vst [vmem:[#allocation2 + $0x80] sm:$0xfe] %v2045_v22 }
 0x1eb   : > { %v1394_v36 = vpop.permute.xlu2 %1393  ;;  %2051 = vst [vmem:[#allocation2 + $0x108] sm:$0xfe] %v2046_v46  ;;  %v1925_v60 = vpop.permute.xlu1 %1924 }
 0x1ec   : > { %v1521_v39 = vmul.f32 %v6851_v51, %v1394_v36  ;;  %v1522_v33 = vmul.f32 %v6853_v35, %v1394_v36  ;;  %2052 = vst [vmem:[#allocation2 + $0x138] sm:$0x1] %v2045_v22  ;;  %v1960_v19 = vmul.f32 %v6665_v57, %v1925_v60  ;;  %v1961_v13 = vmul.f32 %v6667_v30, %v1925_v60  ;;  %v2293_v57 = vld [vmem:[#allocation2 + $0x68] sm:$0xfc]  ;;  %v2294_v22 = vld [vmem:[#allocation2 + $0x130] sm:$0xfc] }
 0x1ed   : > { %2053 = vst [vmem:[#allocation2 + $0xf0] sm:$0x1] %v2046_v46  ;;  %v2372_v41 = vrot.slane %v2293_v57, 2  ;;  %v2296_v46 = vld [vmem:[#allocation2 + $0xe8] sm:$0x3] }
 0x1ee   : > { %v1585_v18 = vadd.f32 %v1521_v39, %v1322_v49  ;;  %v1586_v61 = vadd.f32 %v1522_v33, %v1323_v6  ;;  %v1976_v34 = vadd.f32 %v1960_v19, %v1905_v53  ;;  %v1977_v5 = vadd.f32 %v1961_v13, %v1906_v62  ;;  %v2137_v39 = vld [vmem:[#allocation2 + $0xd0] sm:$0xfe]  ;;  %v2139_v62 = vld [vmem:[#allocation2 + $0x48] sm:$0x1]  ;;  %v2289_v13 = vld [vmem:[#allocation2 + $0xc0] sm:$0xfc] }
 0x1ef   : > { %v2373_v6 = vrot.slane %v2295_v24, 2  ;;  %v2375_v19 = vrot.slane %v2294_v22, 2  ;;  %v8963_v24 = vmov 0.0   ;;  %v2292_v22 = vld [vmem:[#allocation2 + $0xa0] sm:$0x3] }
 0x1f0   : > { %1649 = vst [vmem:[%s6873_s29 + $0x20] sm:$0xff] %v1585_v18  ;;  %v2034_v37 = vrot.slane %v1976_v34, 7  ;;  %v2035_v0 = vrot.slane %v1977_v5, 7 }
 0x1f1   : > { %1650 = vst [vmem:[%s6873_s29 + $0x28] sm:$0xff] %v1586_v61  ;;  %v6901_v29 = vld [vmem:[#allocation2 + $0x80] sm:$0xff] }
 0x1f2   : > { %v2144_v25 = vld [vmem:[#allocation2 + $0x80] sm:$0xfe]  ;;  %2039 = vst [vmem:[#allocation2 + $0x120] sm:$0xfe] %v2034_v37  ;;  %2987 = vmatpush.xpose.msra.mxu0 %v6901_v29  ;;  %v6904_v27 = vld [vmem:[#allocation2 + $0x108] sm:$0xff] }
 0x1f3   : > { %v2213_v28 = vrot.slane %v2144_v25, 1  ;;  %v2145_v50 = vld [vmem:[#allocation2 + $0x108] sm:$0xfe]  ;;  %2040 = vst [vmem:[#allocation2 + $0x38] sm:$0xfe] %v2035_v0  ;;  %3010 = vmatpush.xpose.msra.mxu1 %v6904_v27  ;;  %v2201_v25 = vrot.slane %v2136_v10, 1  ;;  %v994_v10 = vmul.f32 %v6480_v11, %v6330_v3 }
 0x1f4   : > { %v2146_v30 = vld [vmem:[#allocation2 + $0x138] sm:$0x1]  ;;  %v2216_v47 = vrot.slane %v2145_v50, 1  ;;  %2041 = vst [vmem:[#allocation2 + $0xf8] sm:$0x1] %v2034_v37  ;;  %v6907_v4 = vpop.permute.xlu1 %1234  ;;  %v794_v50 = vmul.f32 %v6474_v32, %v6452_v17 }
 0x1f5   : > { %8961 = vst [vmem:[#allocation96_spill] sm:$0xff] %v6907_v4  ;;  %v2214_v52 = vrot.slane %v2146_v30, 1  ;;  %v2147_v9 = vld [vmem:[#allocation2 + $0xf0] sm:$0x1]  ;;  %v2204_v30 = vrot.slane %v2137_v39, 1  ;;  %v3642_v4 = vld [vmem:[#allocation4 + $0x3b8] sm:$0xff] }
 0x1f6   : > { %2042 = vst [vmem:[#allocation2 + $0x100] sm:$0x1] %v2035_v0  ;;  %v2217_v20 = vrot.slane %v2147_v9, 1  ;;  %v2376_v0 = vrot.slane %v2296_v46, 2  ;;  %v993_v9 = vmul.f32 %v6478_v14, %v6330_v3  ;;  %v2938_v46 = vld [vmem:[%s8756_s5] sm:$0xff] }
 0x1f7   : > { %v2215_v15 = vsel %vm2200_vm0, %v2213_v28, %v2214_v52  ;;  %v2202_v28 = vrot.slane %v2138_v8, 1  ;;  %v2291_v52 = vld [vmem:[#allocation2 + $0xd8] sm:$0x3] }
 0x1f8   : > { %3033 = vmatpush.xpose.msra.mxu2 %v2215_v15  ;;  %v2218_v2 = vsel %vm2200_vm0, %v2216_v47, %v2217_v20  ;;  %v2205_v47 = vrot.slane %v2139_v62, 1  ;;  %v795_v20 = vmul.f32 %v6476_v12, %v6452_v17  ;;  %v2374_v17 = vsel %vm2329_vm1, %v2372_v41, %v2373_v6  ;;  %v2287_v41 = vld [vmem:[#allocation2 + $0xe0] sm:$0x3] }
 0x1f9   : > { %3056 = vmatpush.xpose.msra.mxu3 %v2218_v2  ;;  %v6911_v36 = vld [vmem:[#allocation2 + $0x120] sm:$0xff]  ;;  %v2290_v2 = vld [vmem:[#allocation2 + $0x118] sm:$0xfc]  ;;  %v2377_v39 = vsel %vm2329_vm1, %v2375_v19, %v2376_v0  ;;  %v2367_v62 = vrot.slane %v2291_v52, 2  ;;  %v1057_v3 = vadd.f32 %v993_v9, %v794_v50  ;;  %v1256_v19 = vmul.f32 %v6806_v38, %v6233_v44  ;;  %v2281_v52 = vld [vmem:[#allocation2 + $0x128] sm:$0xfc] }
 0x1fa   : > { %v2140_v49 = vld [vmem:[#allocation2 + $0x120] sm:$0xfe]  ;;  %2988 = vmatpush.xpose.msra.mxu0 %v6911_v36  ;;  %v6914_v33 = vld [vmem:[#allocation2 + $0x38] sm:$0xff]  ;;  %v1058_v6 = vadd.f32 %v994_v10, %v795_v20  ;;  %v2941_v9 = vld [vmem:[%s8756_s5 + $0x18] sm:$0xff] }
 0x1fb   : > { %v2207_v60 = vrot.slane %v2140_v49, 1  ;;  %v2141_v53 = vld [vmem:[#allocation2 + $0x38] sm:$0xfe]  ;;  %3011 = vmatpush.xpose.msra.mxu1 %v6914_v33  ;;  %v2142_v18 = vld [vmem:[#allocation2 + $0xf8] sm:$0x1]  ;;  %v2939_v49 = vld [vmem:[%s8756_s5 + $0x8] sm:$0xff] }
 0x1fc   : > { %v2210_v61 = vrot.slane %v2141_v53, 1  ;;  %v6917_v34 = vpop.permute.xlu1 %1246  ;;  %v2208_v5 = vrot.slane %v2142_v18, 1  ;;  %v2366_v53 = vrot.slane %v2289_v13, 2  ;;  %v2206_v18 = vsel %vm2200_vm0, %v2204_v30, %v2205_v47  ;;  %v6943_v0 = vld [vmem:[#allocation2 + $0x58] sm:$0xff]  ;;  %v2940_v13 = vld [vmem:[%s8756_s5 + $0x10] sm:$0xff] }
 0x1fd   : > { %8962 = vst [vmem:[#allocation97_spill] sm:$0xff] %v6917_v34  ;;  %v2143_v37 = vld [vmem:[#allocation2 + $0x100] sm:$0x1]  ;;  %v2361_v47 = vrot.slane %v2287_v41, 2 }
 0x1fe   : > { %v2211_v57 = vrot.slane %v2143_v37, 1  ;;  %v2209_v15 = vsel %vm2200_vm0, %v2207_v60, %v2208_v5  ;;  %2989 = vmatpush.xpose.msra.mxu0 %v8963_v24  ;;  %v2203_v60 = vsel %vm2200_vm0, %v2201_v25, %v2202_v28  ;;  %v2370_v5 = vrot.slane %v2292_v22, 2  ;;  %v2285_v37 = vld [vmem:[#allocation2 + $0xa8] sm:$0xfc]  ;;  %v6951_v28 = vld [vmem:[#allocation2 + $0x78] sm:$0xff] }
 0x1ff   : > { %3034 = vmatpush.xpose.msra.mxu2 %v2209_v15  ;;  %3012 = vmatpush.xpose.msra.mxu1 %v8963_v24  ;;  %v2288_v15 = vld [vmem:[#allocation2 + $0x88] sm:$0x3]  ;;  %v1257_v25 = vmul.f32 %v6808_v21, %v6233_v44  ;;  %v2368_v50 = vsel %vm2329_vm1, %v2366_v53, %v2367_v62  ;;  %v2360_v30 = vrot.slane %v2285_v37, 2  ;;  %v1320_v24 = vadd.f32 %v1256_v19, %v1057_v3  ;;  %v2280_v19 = vld [vmem:[#allocation2 + $0x20] sm:$0x3] }
 0x200   : > { %v2212_v8 = vsel %vm2200_vm0, %v2210_v61, %v2211_v57  ;;  %v2369_v61 = vrot.slane %v2290_v2, 2  ;;  %v2286_v57 = vld [vmem:[#allocation2 + $0x90] sm:$0xfc]  ;;  %v2364_v22 = vrot.slane %v2288_v15, 2  ;;  %v2956_v53 = vld [vmem:[%s8756_s5 + $0x90] sm:$0xff] }
 0x201   : > { %3057 = vmatpush.xpose.msra.mxu3 %v2212_v8  ;;  %2990 = vmatmul.f32.vlgmr.msra.gmra.mxu0 %v2938_v46  ;;  %v2363_v2 = vrot.slane %v2286_v57, 2  ;;  %v2283_v46 = vld [vmem:[#allocation2 + $0x8] sm:$0x3]  ;;  %v1321_v10 = vadd.f32 %v1257_v25, %v1058_v6  ;;  %v2277_v57 = vld [vmem:[#allocation2 + $0x18] sm:$0xfc] }
 0x202   : > { %3074 = vmatpush.xpose.msrb.mxu0 %v2374_v17  ;;  %3013 = vmatmul.f32.vlgmr.msra.gmra.mxu1 %v2939_v49  ;;  %v2371_v20 = vsel %vm2329_vm1, %v2369_v61, %v2370_v5  ;;  %v2282_v49 = vld [vmem:[#allocation2 + $0x110] sm:$0xfc]  ;;  %v2355_v61 = vrot.slane %v2283_v46, 2  ;;  %v2279_v15 = vld [vmem:[#allocation2 + $0x70] sm:$0x3]  ;;  %v2348_v25 = vrot.slane %v2277_v57, 2 }
 0x203   : > { %3097 = vmatpush.xpose.msrb.mxu1 %v2377_v39  ;;  %3035 = vmatpush.xpose.msra.mxu2 %v2203_v60  ;;  %v2284_v39 = vld [vmem:[#allocation2 + $0x98] sm:$0x3]  ;;  %v2354_v60 = vrot.slane %v2281_v52, 2  ;;  %v2957_v5 = vld [vmem:[%s8756_s5 + $0x98] sm:$0xff]  ;;  %v2365_v37 = vsel %vm2329_vm1, %v2363_v2, %v2364_v22  ;;  %v2357_v41 = vrot.slane %v2282_v49, 2 }
 0x204   : > { %v2358_v6 = vrot.slane %v2284_v39, 2  ;;  %v2276_v2 = vld [vmem:[#allocation2 + $0xf0] sm:$0x3]  ;;  %v6992_v49 = vld [vmem:[#allocation2 + $0xe8] sm:$0x1] }
 0x205   : > { %3058 = vmatpush.xpose.msra.mxu3 %v2206_v18  ;;  %v1390_v44 = vpop.permute.xlu1 %1389  ;;  %v2362_v18 = vsel %vm2329_vm1, %v2360_v30, %v2361_v47  ;;  %v2959_v30 = vld [vmem:[%s8756_s5 + $0xa8] sm:$0xff]  ;;  %v6981_v47 = vld [vmem:[#allocation2 + $0x68] sm:$0xfe]  ;;  %v6985_v22 = vld [vmem:[#allocation2 + $0x50] sm:$0x1] }
 0x206   : > { %3075 = vmatpush.xpose.msrb.mxu0 %v2368_v50  ;;  %v1519_v8 = vmul.f32 %v6851_v51, %v1390_v44  ;;  %v1520_v17 = vmul.f32 %v6853_v35, %v1390_v44  ;;  %3036 = vmatmul.f32.vlgmr.msra.gmra.mxu2 %v2940_v13  ;;  %v2958_v13 = vld [vmem:[%s8756_s5 + $0xa0] sm:$0xff]  ;;  %v2349_v50 = vrot.slane %v2279_v15, 2  ;;  %v2359_v52 = vsel %vm2329_vm1, %v2357_v41, %v2358_v6  ;;  %v2273_v44 = vld [vmem:[#allocation2 + $0x80] sm:$0xfc]  ;;  %v6987_v46 = vld [vmem:[#allocation2 + $0x130] sm:$0xfe] }
 0x207   : > { %3120 = vmatpush.xpose.msrb.mxu2 %v6943_v0  ;;  %3098 = vmatpush.xpose.msrb.mxu1 %v2371_v20  ;;  %v2352_v20 = vrot.slane %v2280_v19, 2  ;;  %v2267_v41 = vld [vmem:[#allocation2 + $0x10] sm:$0x3]  ;;  %v6998_v6 = vld [vmem:[#allocation2 + $0x68] sm:$0xfc] }
 0x208   : > { %3059 = vmatmul.f32.vlgmr.msra.gmra.mxu3 %v2941_v9  ;;  %v1583_v62 = vadd.f32 %v1519_v8, %v1320_v24  ;;  %v1584_v3 = vadd.f32 %v1520_v17, %v1321_v10  ;;  %v2275_v24 = vld [vmem:[#allocation2 + $0x138] sm:$0x3]  ;;  %v2342_v10 = vrot.slane %v2273_v44, 2  ;;  %v2510_v17 = vrot.slane %v6981_v47, 1  ;;  %v2268_v19 = vld [vmem:[#allocation2 + $0x48] sm:$0x3] }
 0x209   : > { %3143 = vmatpush.xpose.msrb.mxu3 %v6951_v28  ;;  %2993 = vmatmul.f32.gmra.mxu0 %v2956_v53  ;;  %v2343_v8 = vrot.slane %v2275_v24, 2  ;;  %v2346_v53 = vrot.slane %v2276_v2, 2  ;;  %v2334_v24 = vrot.slane %v2268_v19, 2  ;;  %v2441_v2 = vld [vmem:[#allocation2 + $0x40] sm:$0x1] }
 0x20a   : > { %3076 = vmatpush.xpose.msrb.mxu0 %v2362_v18  ;;  %1647 = vst [vmem:[%s6873_s29 + $0x10] sm:$0xff] %v1583_v62  ;;  %3016 = vmatmul.f32.gmra.mxu1 %v2957_v5  ;;  %v2269_v62 = vld [vmem:[#allocation2 + $0x120] sm:$0xfc]  ;;  %v2270_v18 = vld [vmem:[#allocation2 + $0x38] sm:$0xfc]  ;;  %v2513_v5 = vrot.slane %v6987_v46, 1 }
 0x20b   : > { %3121 = vmatpush.xpose.msrb.mxu2 %v6718_v55  ;;  %3099 = vmatpush.xpose.msrb.mxu1 %v2365_v37  ;;  %v2278_v55 = vld [vmem:[#allocation2 + $0xc8] sm:$0xfc]  ;;  %1648 = vst [vmem:[%s6873_s29 + $0x18] sm:$0xff] %v1584_v3  ;;  %v2271_v3 = vld [vmem:[#allocation2 + $0xf8] sm:$0x3]  ;;  %v2336_v57 = vrot.slane %v2269_v62, 2 }
 0x20c   : > { %v2351_v9 = vrot.slane %v2278_v55, 2  ;;  %v2265_v37 = vld [vmem:[#allocation2 + $0xb0] sm:$0xfc]  ;;  %v2337_v15 = vrot.slane %v2271_v3, 2  ;;  %v7023_v19 = vld [vmem:[#allocation2 + $0x118] sm:$0xfe] }
 0x20d   : > { %3144 = vmatpush.xpose.msrb.mxu3 %v6722_v31  ;;  %v2356_v31 = vsel %vm2329_vm1, %v2354_v60, %v2355_v61  ;;  %v2511_v61 = vrot.slane %v6985_v22, 1  ;;  %v2266_v55 = vld [vmem:[#allocation2 + $0xd0] sm:$0xfc] }
 0x20e   : > { %3077 = vmatpush.xpose.msrb.mxu0 %v2356_v31  ;;  %3039 = vmatmul.f32.gmra.mxu2 %v2958_v13  ;;  %v2353_v39 = vsel %vm2329_vm1, %v2351_v9, %v2352_v20  ;;  %v2339_v31 = vrot.slane %v2270_v18, 2  ;;  %v2438_v9 = vld [vmem:[#allocation2 + $0x58] sm:$0xfe]  ;;  %v2440_v20 = vld [vmem:[#allocation2 + $0x30] sm:$0x1]  ;;  %v2333_v44 = vrot.slane %v2266_v55, 2 }
 0x20f   : > { %3122 = vmatpush.xpose.msrb.mxu2 %v6755_v42  ;;  %3100 = vmatpush.xpose.msrb.mxu1 %v2359_v52  ;;  %v2274_v42 = vld [vmem:[#allocation2 + $0x108] sm:$0xfc]  ;;  %v2330_v52 = vrot.slane %v2265_v37, 2  ;;  %v2516_v62 = vrot.slane %v2438_v9, 1  ;;  %v2517_v3 = vrot.slane %v2440_v20, 1  ;;  %v2945_v46 = vld [vmem:[%s8756_s5 + $0x38] sm:$0xff] }
 0x210   : > { %3062 = vmatmul.f32.gmra.mxu3 %v2959_v30  ;;  %v2345_v60 = vrot.slane %v2274_v42, 2  ;;  %v7005_v30 = vld [vmem:[#allocation2 + $0x50] sm:$0x3]  ;;  %v2439_v42 = vld [vmem:[#allocation2 + $0x78] sm:$0xfe] }
 0x211   : > { %3145 = vmatpush.xpose.msrb.mxu3 %v6758_v40  ;;  %v2350_v40 = vsel %vm2329_vm1, %v2348_v25, %v2349_v50  ;;  %v2514_v50 = vrot.slane %v6992_v49, 1  ;;  %v2566_v18 = vld [vmem:[#allocation2 + $0x58] sm:$0xfc]  ;;  %v2519_v37 = vrot.slane %v2439_v42, 1  ;;  %v7021_v55 = vld [vmem:[#allocation2 + $0xd8] sm:$0x1] }
 0x212   : > { %3078 = vmatpush.xpose.msrb.mxu0 %v2350_v40  ;;  %v2347_v13 = vsel %vm2329_vm1, %v2345_v60, %v2346_v53  ;;  %v7007_v40 = vld [vmem:[#allocation2 + $0x130] sm:$0xfc]  ;;  %v7015_v60 = vld [vmem:[#allocation2 + $0xc0] sm:$0xfe]  ;;  %v7032_v9 = vld [vmem:[#allocation2 + $0xd8] sm:$0x3] }
 0x213   : > { %3123 = vmatpush.xpose.msrb.mxu2 %v6777_v48  ;;  %3101 = vmatpush.xpose.msrb.mxu1 %v2353_v39  ;;  %v2272_v48 = vld [vmem:[#allocation2 + $0x100] sm:$0x3]  ;;  %v7013_v39 = vld [vmem:[#allocation2 + $0xe8] sm:$0x3]  ;;  %v7034_v20 = vld [vmem:[#allocation2 + $0x118] sm:$0xfc] }
 0x214   : > { %v2340_v25 = vrot.slane %v2272_v48, 2  ;;  %v2568_v48 = vld [vmem:[#allocation2 + $0x30] sm:$0x3]  ;;  %v7075_v22 = vld [vmem:[#allocation2 + $0x90] sm:$0xfc] }
 0x215   : > { %3146 = vmatpush.xpose.msrb.mxu3 %v6780_v63  ;;  %v2344_v63 = vsel %vm2329_vm1, %v2342_v10, %v2343_v8  ;;  %v2638_v10 = vrot.slane %v6998_v6, 2  ;;  %v2639_v8 = vrot.slane %v7005_v30, 2  ;;  %v2960_v6 = vld [vmem:[%s8756_s5 + $0xb0] sm:$0xff] }
 0x216   : > { %3079 = vmatpush.xpose.msrb.mxu0 %v2344_v63  ;;  %v2341_v53 = vsel %vm2329_vm1, %v2339_v31, %v2340_v25  ;;  %v2567_v63 = vld [vmem:[#allocation2 + $0x78] sm:$0xfc]  ;;  %v2645_v31 = vrot.slane %v2568_v48, 2  ;;  %v2641_v25 = vrot.slane %v7007_v40, 2  ;;  %v7042_v40 = vld [vmem:[#allocation2 + $0xa0] sm:$0x3] }
 0x217   : > { %3124 = vmatpush.xpose.msrb.mxu2 %v6783_v45  ;;  %3102 = vmatpush.xpose.msrb.mxu1 %v2347_v13  ;;  %v2331_v45 = vrot.slane %v2267_v41, 2  ;;  %v2520_v41 = vrot.slane %v2441_v2, 1  ;;  %v2644_v13 = vrot.slane %v2566_v18, 2  ;;  %v2504_v2 = vrot.slane %v7015_v60, 1  ;;  %v7053_v18 = vld [vmem:[#allocation2 + $0x88] sm:$0x1] }
 0x218   : > { %v7055_v60 = vld [vmem:[#allocation2 + $0xa8] sm:$0xfc] }
 0x219   : > { %3147 = vmatpush.xpose.msrb.mxu3 %v6787_v54  ;;  %v2338_v54 = vsel %vm2329_vm1, %v2336_v57, %v2337_v15  ;;  %v2569_v57 = vld [vmem:[#allocation2 + $0x40] sm:$0x3]  ;;  %v2335_v15 = vsel %vm2329_vm1, %v2333_v44, %v2334_v24  ;;  %v2518_v44 = vsel %vm2200_vm0, %v2516_v62, %v2517_v3  ;;  %v2647_v24 = vrot.slane %v2567_v63, 2  ;;  %v7051_v3 = vld [vmem:[#allocation2 + $0x90] sm:$0xfe] }
 0x21a   : > { %3080 = vmatpush.xpose.msrb.mxu0 %v2338_v54  ;;  %v2648_v42 = vrot.slane %v2569_v57, 2  ;;  %v2521_v54 = vsel %vm2200_vm0, %v2519_v37, %v2520_v41  ;;  %v7049_v62 = vld [vmem:[#allocation2 + $0xe0] sm:$0x1]  ;;  %v2646_v48 = vsel %vm2329_vm1, %v2644_v13, %v2645_v31  ;;  %v2515_v37 = vsel %vm2200_vm0, %v2513_v5, %v2514_v50  ;;  %v2944_v41 = vld [vmem:[%s8756_s5 + $0x30] sm:$0xff] }
 0x21b   : > { %3125 = vmatpush.xpose.msrb.mxu2 %v6828_v43  ;;  %3103 = vmatpush.xpose.msrb.mxu1 %v2341_v53  ;;  %v2332_v43 = vsel %vm2329_vm1, %v2330_v52, %v2331_v45  ;;  %v2642_v52 = vrot.slane %v7013_v39, 2  ;;  %v7030_v45 = vld [vmem:[#allocation2 + $0xc0] sm:$0xfc]  ;;  %v2505_v39 = vrot.slane %v7021_v55, 1  ;;  %v7047_v53 = vld [vmem:[#allocation2 + $0xa8] sm:$0xfe] }
 0x21c   : > { %v7073_v63 = vld [vmem:[#allocation2 + $0xe0] sm:$0x3]  ;;  %v2649_v47 = vsel %vm2329_vm1, %v2647_v24, %v2648_v42  ;;  %v2632_v49 = vrot.slane %v7030_v45, 2  ;;  %v2635_v5 = vrot.slane %v7034_v20, 2  ;;  %v2498_v50 = vrot.slane %v7047_v53, 1 }
 0x21d   : > { %3148 = vmatpush.xpose.msrb.mxu3 %v6831_v59  ;;  %v7025_v59 = vld [vmem:[#allocation2 + $0xa0] sm:$0x1]  ;;  %v2499_v57 = vrot.slane %v7049_v62, 1  ;;  %v7092_v55 = vld [vmem:[#allocation2 + $0x88] sm:$0x3]  ;;  %v2627_v13 = vrot.slane %v7073_v63, 2  ;;  %v2640_v45 = vsel %vm2329_vm1, %v2638_v10, %v2639_v8  ;;  %v2643_v24 = vsel %vm2329_vm1, %v2641_v25, %v2642_v52 }
 0x21e   : > { %3081 = vmatpush.xpose.msrb.mxu0 %v2332_v43  ;;  %v2512_v43 = vsel %vm2200_vm0, %v2510_v17, %v2511_v61  ;;  %v2943_v17 = vld [vmem:[%s8756_s5 + $0x28] sm:$0xff]  ;;  %v2633_v61 = vrot.slane %v7032_v9, 2  ;;  %v2629_v31 = vrot.slane %v7075_v22, 2  ;;  %v2422_v9 = vld [vmem:[#allocation2 + $0x128] sm:$0xfe]  ;;  %v2506_v42 = vsel %vm2200_vm0, %v2504_v2, %v2505_v39  ;;  %v2961_v63 = vld [vmem:[%s8756_s5 + $0xb8] sm:$0xff] }
 0x21f   : > { %3126 = vmatpush.xpose.msrb.mxu2 %v6901_v29  ;;  %v2942_v29 = vld [vmem:[%s8756_s5 + $0x20] sm:$0xff]  ;;  %3104 = vmatpush.xpose.msrb.mxu1 %v2335_v15  ;;  %v2501_v15 = vrot.slane %v7051_v3, 1  ;;  %v2424_v20 = vld [vmem:[#allocation2 + $0x8] sm:$0x1]  ;;  %v2551_v8 = vld [vmem:[#allocation2 + $0x110] sm:$0xfc] }
 0x220   : > { %v2552_v10 = vld [vmem:[#allocation2 + $0x8] sm:$0x3]  ;;  %v2553_v53 = vld [vmem:[#allocation2 + $0x98] sm:$0x3]  ;;  %v2420_v52 = vld [vmem:[#allocation2 + $0x70] sm:$0x1]  ;;  %v2634_v39 = vsel %vm2329_vm1, %v2632_v49, %v2633_v61 }
 0x221   : > { %3149 = vmatpush.xpose.msrb.mxu3 %v6904_v27  ;;  %v2507_v27 = vrot.slane %v7023_v19, 1  ;;  %3082 = vmatmul.f32.vlgmr.msrb.gmra.mxu0 %v2942_v29  ;;  %v2502_v19 = vrot.slane %v7053_v18, 1  ;;  %v2630_v29 = vrot.slane %v7092_v55, 2  ;;  %v2418_v25 = vld [vmem:[#allocation2 + $0x18] sm:$0xfe]  ;;  %v2492_v3 = vrot.slane %v2422_v9, 1 }
 0x222   : > { %3166 = vmatpush.xpose.msra.mxu0 %v2518_v44  ;;  %3105 = vmatmul.f32.vlgmr.msrb.gmra.mxu1 %v2943_v17  ;;  %v7103_v44 = vld [vmem:[#allocation2 + $0x110] sm:$0xfe]  ;;  %v2419_v2 = vld [vmem:[#allocation2 + $0xc8] sm:$0xfe]  ;;  %v2421_v18 = vld [vmem:[#allocation2 + $0x20] sm:$0x1] }
 0x223   : > { %3189 = vmatpush.xpose.msra.mxu1 %v2521_v54  ;;  %3127 = vmatpush.xpose.msrb.mxu2 %v6911_v36  ;;  %v2508_v36 = vrot.slane %v7025_v59, 1  ;;  %v2626_v59 = vrot.slane %v7055_v60, 2  ;;  %v7108_v54 = vld [vmem:[#allocation2 + $0x128] sm:$0xfc]  ;;  %v7116_v60 = vld [vmem:[#allocation2 + $0x18] sm:$0xfc] }
 0x224   : > { %v2963_v22 = vld [vmem:[%s8756_s5 + $0xc8] sm:$0xff]  ;;  %v2621_v17 = vrot.slane %v2552_v10, 2  ;;  %v2623_v49 = vrot.slane %v2551_v8, 2  ;;  %v2624_v61 = vrot.slane %v2553_v53, 2  ;;  %v2614_v55 = vrot.slane %v7116_v60, 2 }
 0x225   : > { %3150 = vmatpush.xpose.msrb.mxu3 %v6914_v33  ;;  %v2636_v33 = vrot.slane %v7042_v40, 2  ;;  %v2425_v40 = vld [vmem:[#allocation2 + $0x98] sm:$0x1]  ;;  %v2509_v30 = vsel %vm2200_vm0, %v2507_v27, %v2508_v36  ;;  %v7124_v36 = vld [vmem:[#allocation2 + $0x70] sm:$0x3]  ;;  %v7139_v9 = vld [vmem:[%s8758_s7 + $0x8] sm:$0xff] }
 0x226   : > { %3167 = vmatpush.xpose.msra.mxu0 %v2512_v43  ;;  %3128 = vmatmul.f32.vlgmr.msrb.gmra.mxu2 %v2944_v41  ;;  %v2962_v27 = vld [vmem:[%s8756_s5 + $0xc0] sm:$0xff]  ;;  %v2503_v43 = vsel %vm2200_vm0, %v2501_v15, %v2502_v19  ;;  %v2495_v41 = vrot.slane %v7103_v44, 1  ;;  %v2490_v15 = vrot.slane %v2421_v18, 1  ;;  %v2615_v19 = vrot.slane %v7124_v36, 2  ;;  %v2545_v8 = vld [vmem:[#allocation2 + $0xf0] sm:$0x3] }
 0x227   : > { %3212 = vmatpush.xpose.msra.mxu2 %v2646_v48  ;;  %3190 = vmatpush.xpose.msra.mxu1 %v2515_v37  ;;  %v2637_v62 = vsel %vm2329_vm1, %v2635_v5, %v2636_v33  ;;  %v2500_v48 = vsel %vm2200_vm0, %v2498_v50, %v2499_v57  ;;  %v2493_v37 = vrot.slane %v2424_v20, 1  ;;  %v2486_v5 = vrot.slane %v2418_v25, 1 }
 0x228   : > { %3151 = vmatmul.f32.vlgmr.msrb.gmra.mxu3 %v2945_v46  ;;  %v2620_v46 = vrot.slane %v7108_v54, 2  ;;  %v2487_v33 = vrot.slane %v2420_v52, 1  ;;  %v2489_v50 = vrot.slane %v2419_v2, 1  ;;  %v2628_v57 = vsel %vm2329_vm1, %v2626_v59, %v2627_v13  ;;  %v2414_v59 = vld [vmem:[#allocation2 + $0x80] sm:$0xfe]  ;;  %3427 = vperm.xlu2 %5668, %v7139_v9  }
 0x229   : > { %3235 = vmatpush.xpose.msra.mxu3 %v2649_v47  ;;  %3085 = vmatmul.f32.gmra.mxu0 %v2960_v6  ;;  %v2496_v47 = vrot.slane %v2425_v40, 1  ;;  %v2631_v20 = vsel %vm2329_vm1, %v2629_v31, %v2630_v29  ;;  %v2494_v44 = vsel %vm2200_vm0, %v2492_v3, %v2493_v37  ;;  %v2416_v13 = vld [vmem:[#allocation2 + $0x138] sm:$0x1]  ;;  %v2415_v40 = vld [vmem:[#allocation2 + $0x108] sm:$0xfe]  ;;  %v2625_v10 = vsel %vm2329_vm1, %v2623_v49, %v2624_v61 }
 0x22a   : > { %3168 = vmatpush.xpose.msra.mxu0 %v2506_v42  ;;  %3108 = vmatmul.f32.gmra.mxu1 %v2961_v63  ;;  %v2417_v54 = vld [vmem:[#allocation2 + $0xf0] sm:$0x1]  ;;  %v2542_v6 = vld [vmem:[#allocation2 + $0x80] sm:$0xfc]  ;;  %v2544_v31 = vld [vmem:[#allocation2 + $0x138] sm:$0x3]  ;;  %v2488_v53 = vsel %vm2200_vm0, %v2486_v5, %v2487_v33  ;;  %v2491_v25 = vsel %vm2200_vm0, %v2489_v50, %v2490_v15 }
 0x22b   : > { %3213 = vmatpush.xpose.msra.mxu2 %v2640_v45  ;;  %3191 = vmatpush.xpose.msra.mxu1 %v2509_v30  ;;  %v2547_v45 = vld [vmem:[#allocation2 + $0xc8] sm:$0xfc]  ;;  %v2497_v42 = vsel %vm2200_vm0, %v2495_v41, %v2496_v47  ;;  %v2622_v30 = vsel %vm2329_vm1, %v2620_v46, %v2621_v17  ;;  %v2480_v3 = vrot.slane %v2414_v59, 1  ;;  %v2481_v18 = vrot.slane %v2416_v13, 1  ;;  %v2413_v47 = vld [vmem:[#allocation2 + $0x100] sm:$0x1] }
 0x22c   : > { %v2543_v29 = vld [vmem:[#allocation2 + $0x108] sm:$0xfc]  ;;  %v2617_v52 = vrot.slane %v2547_v45, 2  ;;  %v2483_v60 = vrot.slane %v2415_v40, 1  ;;  %v2612_v41 = vrot.slane %v2545_v8, 2  ;;  %v2616_v46 = vsel %vm2329_vm1, %v2614_v55, %v2615_v19 }
 0x22d   : > { %3236 = vmatpush.xpose.msra.mxu3 %v2643_v24  ;;  %v2549_v24 = vld [vmem:[#allocation2 + $0x20] sm:$0x3]  ;;  %v2611_v37 = vrot.slane %v2543_v29, 2  ;;  %v2538_v17 = vld [vmem:[#allocation2 + $0x120] sm:$0xfc]  ;;  %v2482_v33 = vsel %vm2200_vm0, %v2480_v3, %v2481_v18 }
 0x22e   : > { %3169 = vmatpush.xpose.msra.mxu0 %v2500_v48  ;;  %3131 = vmatmul.f32.gmra.mxu2 %v2962_v27  ;;  %v2618_v2 = vrot.slane %v2549_v24, 2  ;;  %v2484_v27 = vrot.slane %v2417_v54, 1  ;;  %v2608_v48 = vrot.slane %v2542_v6, 2  ;;  %v2710_v49 = vld [vmem:[#allocation2 + $0x28] sm:$0xfe] }
 0x22f   : > { %3214 = vmatpush.xpose.msra.mxu2 %v2634_v39  ;;  %3192 = vmatpush.xpose.msra.mxu1 %v2503_v43  ;;  %v2410_v39 = vld [vmem:[#allocation2 + $0x120] sm:$0xfe]  ;;  %v2609_v43 = vrot.slane %v2544_v31, 2  ;;  %v2712_v61 = vld [vmem:[#allocation2 + $0xb8] sm:$0x1]  ;;  %v2788_v59 = vrot.slane %v2710_v49, 1 }
 0x230   : > { %3154 = vmatmul.f32.gmra.mxu3 %v2963_v22  ;;  %v2474_v36 = vrot.slane %v2410_v39, 1  ;;  %v2411_v22 = vld [vmem:[#allocation2 + $0x38] sm:$0xfe]  ;;  %v2619_v5 = vsel %vm2329_vm1, %v2617_v52, %v2618_v2  ;;  %v2713_v15 = vld [vmem:[#allocation2 + $0x60] sm:$0x1]  ;;  %5671 = vset.pattern.permute.xlu2 %v8912_v26  ;;  %v2485_v45 = vsel %vm2200_vm0, %v2483_v60, %v2484_v27  ;;  %v2789_v13 = vrot.slane %v2712_v61, 1 }
 0x231   : > { %3237 = vmatpush.xpose.msra.mxu3 %v2637_v62  ;;  %v2412_v62 = vld [vmem:[#allocation2 + $0xf8] sm:$0x1]  ;;  %v2539_v55 = vld [vmem:[#allocation2 + $0x38] sm:$0xfc]  ;;  %v2541_v19 = vld [vmem:[#allocation2 + $0x100] sm:$0x3]  ;;  %v2610_v24 = vsel %vm2329_vm1, %v2608_v48, %v2609_v43  ;;  %3407 = vperm.xlu2 %5671, %v7139_v9  }
 0x232   : > { %3170 = vmatpush.xpose.msra.mxu0 %v2494_v44  ;;  %v2475_v63 = vrot.slane %v2412_v62, 1  ;;  %v2540_v50 = vld [vmem:[#allocation2 + $0xf8] sm:$0x3]  ;;  %v2478_v44 = vrot.slane %v2413_v47, 1  ;;  %v2792_v6 = vrot.slane %v2713_v15, 1  ;;  %v2605_v31 = vrot.slane %v2539_v55, 2 }
 0x233   : > { %3215 = vmatpush.xpose.msra.mxu2 %v2628_v57  ;;  %3193 = vmatpush.xpose.msra.mxu1 %v2497_v42  ;;  %v2711_v57 = vld [vmem:[#allocation2] sm:$0xfe]  ;;  %v2602_v42 = vrot.slane %v2538_v17, 2  ;;  %v2603_v40 = vrot.slane %v2540_v50, 2  ;;  %v2606_v29 = vrot.slane %v2541_v19, 2  ;;  %v5753_v2 = vld [vmem:[#allocation2 + $0xb0] sm:$0xff]  ;;  %v2790_v39 = vsel %vm2200_vm0, %v2788_v59, %v2789_v13 }
 0x234   : > { %v2791_v54 = vrot.slane %v2711_v57, 1  ;;  %v2708_v52 = vld [vmem:[#allocation2 + $0x30] sm:$0x1]  ;;  %v2707_v62 = vld [vmem:[#allocation2 + $0x78] sm:$0xfe]  ;;  %v2947_v27 = vld [vmem:[%s8756_s5 + $0x48] sm:$0xff] }
 0x235   : > { %3238 = vmatpush.xpose.msra.mxu3 %v2631_v20  ;;  %v2477_v20 = vrot.slane %v2411_v22, 1  ;;  %v2709_v3 = vld [vmem:[#allocation2 + $0x40] sm:$0x1]  ;;  %v2604_v18 = vsel %vm2329_vm1, %v2602_v42, %v2603_v40  ;;  %v2607_v48 = vsel %vm2329_vm1, %v2605_v31, %v2606_v29  ;;  %v2949_v22 = vld [vmem:[%s8756_s5 + $0x58] sm:$0xff]  ;;  %v2785_v47 = vrot.slane %v2707_v62, 1  ;;  %v7180_v61 = vld [vmem:[%s8758_s7] sm:$0xff] }
 0x236   : > { %3171 = vmatpush.xpose.msra.mxu0 %v2488_v53  ;;  %v2946_v53 = vld [vmem:[%s8756_s5 + $0x40] sm:$0xff]  ;;  %v2793_v60 = vsel %vm2200_vm0, %v2791_v54, %v2792_v6  ;;  %v2703_v17 = vld [vmem:[#allocation2 + $0x130] sm:$0xfe]  ;;  %v2705_v49 = vld [vmem:[#allocation2 + $0xe8] sm:$0x1]  ;;  %3423 = vperm.xlu1 %5669, %v7180_v61  }
 0x237   : > { %3216 = vmatpush.xpose.msra.mxu2 %v2622_v30  ;;  %3194 = vmatpush.xpose.msra.mxu1 %v2491_v25  ;;  %v2613_v30 = vsel %vm2329_vm1, %v2611_v37, %v2612_v41  ;;  %v2479_v8 = vsel %vm2200_vm0, %v2477_v20, %v2478_v44  ;;  %v2706_v25 = vld [vmem:[#allocation2 + $0x58] sm:$0xfe]  ;;  %v2783_v37 = vrot.slane %v2708_v52, 1  ;;  %v2702_v41 = vld [vmem:[#allocation2 + $0x68] sm:$0xfe]  ;;  %v2779_v15 = vrot.slane %v2703_v17, 1 }
 0x238   : > { %v2782_v43 = vrot.slane %v2706_v25, 1  ;;  %v2776_v50 = vrot.slane %v2702_v41, 1  ;;  %v2698_v20 = vld [vmem:[#allocation2 + $0xc0] sm:$0xfe]  ;;  %v2700_v44 = vld [vmem:[#allocation2 + $0xd8] sm:$0x1] }
 0x239   : > { %3239 = vmatpush.xpose.msra.mxu3 %v2625_v10  ;;  %v2476_v10 = vsel %vm2200_vm0, %v2474_v36, %v2475_v63  ;;  %v2704_v36 = vld [vmem:[#allocation2 + $0x50] sm:$0x1]  ;;  %v2948_v63 = vld [vmem:[%s8756_s5 + $0x50] sm:$0xff]  ;;  %5673 = vset.pattern.permute.xlu2 %v8918_v58  ;;  %v2699_v19 = vld [vmem:[#allocation2 + $0x118] sm:$0xfe]  ;;  %v2770_v40 = vrot.slane %v2698_v20, 1 }
 0x23a   : > { %3172 = vmatpush.xpose.msra.mxu0 %v2482_v33  ;;  %v2676_v33 = vld [vmem:[#allocation2 + $0x68] sm:$0xff]  ;;  %v2777_v57 = vrot.slane %v2704_v36, 1  ;;  %v2677_v55 = vld [vmem:[#allocation2 + $0x130] sm:$0xff]  ;;  %3413 = vperm.xlu2 %5673, %v7180_v61   ;;  %v2674_v42 = vld [vmem:[#allocation2 + $0xc0] sm:$0xff]  ;;  %v2771_v54 = vrot.slane %v2700_v44, 1  ;;  %v2773_v29 = vrot.slane %v2699_v19, 1 }
 0x23b   : > { %3217 = vmatpush.xpose.msra.mxu2 %v2616_v46  ;;  %3195 = vmatpush.xpose.msra.mxu1 %v2485_v45  ;;  %v2786_v46 = vrot.slane %v2709_v3, 1  ;;  %v2965_v59 = vld [vmem:[%s8756_s5 + $0xd8] sm:$0xff]  ;;  %v2694_v6 = vld [vmem:[#allocation2 + $0xa8] sm:$0xfe]  ;;  %v2967_v31 = vld [vmem:[%s8756_s5 + $0xe8] sm:$0xff] }
 0x23c   : > { %v2778_v13 = vsel %vm2200_vm0, %v2776_v50, %v2777_v57  ;;  %v2675_v25 = vld [vmem:[#allocation2 + $0x118] sm:$0xff]  ;;  %v2695_v52 = vld [vmem:[#allocation2 + $0x90] sm:$0xfe]  ;;  %v2764_v62 = vrot.slane %v2694_v6, 1  ;;  %v2672_v36 = vld [vmem:[#allocation2 + $0xa8] sm:$0xff] }
 0x23d   : > { %3240 = vmatpush.xpose.msra.mxu3 %v2619_v5  ;;  %v2784_v5 = vsel %vm2200_vm0, %v2782_v43, %v2783_v37  ;;  %v2787_v45 = vsel %vm2200_vm0, %v2785_v47, %v2786_v46  ;;  %v2691_v37 = vld [vmem:[#allocation2 + $0x110] sm:$0xfe]  ;;  %v2693_v41 = vld [vmem:[#allocation2 + $0x98] sm:$0x1]  ;;  %v2670_v17 = vld [vmem:[#allocation2 + $0x128] sm:$0xff] }
 0x23e   : > { %3173 = vmatpush.xpose.msra.mxu0 %v2476_v10  ;;  %v2966_v10 = vld [vmem:[%s8756_s5 + $0xe0] sm:$0xff]  ;;  %v2688_v57 = vld [vmem:[#allocation2 + $0x70] sm:$0x1]  ;;  %5670 = vset.pattern.permute.xlu1 %v8912_v26  ;;  %v2839_v44 = vld [vmem:[#allocation2] sm:$0xfc] }
 0x23f   : > { %3218 = vmatpush.xpose.msra.mxu2 %v2610_v24  ;;  %3196 = vmatpush.xpose.msra.mxu1 %v2479_v8  ;;  %v2701_v24 = vld [vmem:[#allocation2 + $0xa0] sm:$0x1]  ;;  %v2686_v50 = vld [vmem:[#allocation2 + $0x18] sm:$0xfe]  ;;  %v2684_v6 = vld [vmem:[#allocation2 + $0x138] sm:$0x1] }
 0x240   : > { %v2774_v8 = vrot.slane %v2701_v24, 1  ;;  %3403 = vperm.xlu1 %5670, %v7180_v61   ;;  %v2840_v20 = vld [vmem:[#allocation2 + $0xb8] sm:$0x3]  ;;  %v2752_v19 = vrot.slane %v2686_v50, 1  ;;  %v2753_v24 = vrot.slane %v2688_v57, 1 }
 0x241   : > { %3241 = vmatpush.xpose.msra.mxu3 %v2613_v30  ;;  %3174 = vmatmul.f32.vlgmr.msra.gmra.mxu0 %v2946_v53  ;;  %v2696_v53 = vld [vmem:[#allocation2 + $0xe0] sm:$0x1] }
 0x242   : > { %3258 = vmatpush.xpose.msrb.mxu0 %v5753_v2  ;;  %3197 = vmatmul.f32.vlgmr.msra.gmra.mxu1 %v2947_v27  ;;  %v2765_v3 = vrot.slane %v2696_v53, 1  ;;  %v2775_v27 = vsel %vm2200_vm0, %v2773_v29, %v2774_v8  ;;  %v2919_v29 = vrot.slane %v2839_v44, 2  ;;  %v7217_v53 = vld [vmem:[%s7212_s25] sm:$0xff] }
 0x243   : > { %3281 = vmatpush.xpose.msrb.mxu1 %v5753_v2  ;;  %3219 = vmatpush.xpose.msra.mxu2 %v2604_v18  ;;  %v2697_v2 = vld [vmem:[#allocation2 + $0x88] sm:$0x1]  ;;  %v2690_v18 = vld [vmem:[#allocation2 + $0x128] sm:$0xfe] }
 0x244   : > { %v2768_v43 = vrot.slane %v2697_v2, 1  ;;  %3417 = vperm.xlu2 %5673, %v7139_v9   ;;  %v2766_v46 = vsel %vm2200_vm0, %v2764_v62, %v2765_v3  ;;  %v2685_v2 = vld [vmem:[#allocation2 + $0xf0] sm:$0x1]  ;;  %v2754_v3 = vsel %vm2200_vm0, %v2752_v19, %v2753_v24 }
 0x245   : > { %3242 = vmatpush.xpose.msra.mxu3 %v2607_v48  ;;  %v2767_v48 = vrot.slane %v2695_v52, 1  ;;  %v2683_v52 = vld [vmem:[#allocation2 + $0x108] sm:$0xfe]  ;;  %v2836_v62 = vld [vmem:[#allocation2 + $0x30] sm:$0x3] }
 0x246   : > { %3259 = vmatpush.xpose.msrb.mxu0 %v6943_v0  ;;  %3220 = vmatmul.f32.vlgmr.msra.gmra.mxu2 %v2948_v63  ;;  %v2964_v0 = vld [vmem:[%s8756_s5 + $0xd0] sm:$0xff]  ;;  %v2673_v63 = vld [vmem:[#allocation2 + $0x90] sm:$0xff]  ;;  %v2911_v50 = vrot.slane %v2836_v62, 2 }
 0x247   : > { %3304 = vmatpush.xpose.msrb.mxu2 %v2790_v39  ;;  %3282 = vmatpush.xpose.msrb.mxu1 %v6951_v28  ;;  %v2780_v28 = vrot.slane %v2705_v49, 1  ;;  %v2772_v39 = vsel %vm2200_vm0, %v2770_v40, %v2771_v54  ;;  %v2671_v49 = vld [vmem:[#allocation2 + $0x110] sm:$0xff]  ;;  %v2682_v54 = vld [vmem:[#allocation2 + $0x80] sm:$0xfe] }
 0x248   : > { %3243 = vmatmul.f32.vlgmr.msra.gmra.mxu3 %v2949_v22  ;;  %v2758_v22 = vrot.slane %v2690_v18, 1  ;;  %v2953_v19 = vld [vmem:[%s8756_s5 + $0x78] sm:$0xff] }
 0x249   : > { %3327 = vmatpush.xpose.msrb.mxu3 %v2793_v60  ;;  %3177 = vmatmul.f32.gmra.mxu0 %v2964_v0  ;;  %v2781_v30 = vsel %vm2200_vm0, %v2779_v15, %v2780_v28  ;;  %v2692_v60 = vld [vmem:[#allocation2 + $0x8] sm:$0x1]  ;;  %v2769_v15 = vsel %vm2200_vm0, %v2767_v48, %v2768_v43  ;;  %v2689_v0 = vld [vmem:[#allocation2 + $0x20] sm:$0x1]  ;;  %v2838_v28 = vld [vmem:[#allocation2 + $0x28] sm:$0xfc] }
 0x24a   : > { %3260 = vmatpush.xpose.msrb.mxu0 %v2676_v33  ;;  %3200 = vmatmul.f32.gmra.mxu1 %v2965_v59  ;;  %v2759_v47 = vrot.slane %v2692_v60, 1  ;;  %v2762_v33 = vrot.slane %v2693_v41, 1  ;;  %v2756_v40 = vrot.slane %v2689_v0, 1  ;;  %v2746_v60 = vrot.slane %v2682_v54, 1  ;;  %v2835_v48 = vld [vmem:[#allocation2 + $0x78] sm:$0xfc] }
 0x24b   : > { %3305 = vmatpush.xpose.msrb.mxu2 %v2784_v5  ;;  %3283 = vmatpush.xpose.msrb.mxu1 %v2677_v55  ;;  %v2761_v5 = vrot.slane %v2691_v37, 1  ;;  %v2841_v55 = vld [vmem:[#allocation2 + $0x60] sm:$0x3]  ;;  %v2913_v57 = vrot.slane %v2835_v48, 2  ;;  %v2969_v48 = vld [vmem:[%s8756_s5 + $0xf8] sm:$0xff] }
 0x24c   : > { %v2760_v59 = vsel %vm2200_vm0, %v2758_v22, %v2759_v47  ;;  %v2920_v8 = vrot.slane %v2841_v55, 2  ;;  %5681 = vset.pattern.permute.xlu2 %v8915_v56  ;;  %v2837_v43 = vld [vmem:[#allocation2 + $0x40] sm:$0x3]  ;;  %v2830_v22 = vld [vmem:[#allocation2 + $0x68] sm:$0xfc]  ;;  %v8842_v47 = vmov 7  }
 0x24d   : > { %3328 = vmatpush.xpose.msrb.mxu3 %v2787_v45  ;;  %v2687_v45 = vld [vmem:[#allocation2 + $0xc8] sm:$0xfe]  ;;  %3924 = vperm.xlu2 %5681, %v7217_v53   ;;  %v2951_v0 = vld [vmem:[%s8756_s5 + $0x68] sm:$0xff]  ;;  %v2904_v24 = vrot.slane %v2830_v22, 2 }
 0x24e   : > { %3261 = vmatpush.xpose.msrb.mxu0 %v2674_v42  ;;  %3223 = vmatmul.f32.gmra.mxu2 %v2966_v10  ;;  %v2755_v42 = vrot.slane %v2687_v45, 1  ;;  %v2916_v10 = vrot.slane %v2838_v28, 2  ;;  %v2921_v41 = vsel %vm2329_vm1, %v2919_v29, %v2920_v8  ;;  %v2831_v28 = vld [vmem:[#allocation2 + $0x130] sm:$0xfc]  ;;  %v2952_v55 = vld [vmem:[%s8756_s5 + $0x70] sm:$0xff] }
 0x24f   : > { %3306 = vmatpush.xpose.msrb.mxu2 %v2778_v13  ;;  %3284 = vmatpush.xpose.msrb.mxu1 %v2675_v25  ;;  %v2763_v13 = vsel %vm2200_vm0, %v2761_v5, %v2762_v33  ;;  %v2669_v25 = vld [vmem:[#allocation2 + $0xc8] sm:$0xff]  ;;  %v2950_v5 = vld [vmem:[%s8756_s5 + $0x60] sm:$0xff]  ;;  %v2907_v54 = vrot.slane %v2831_v28, 2 }
 0x250   : > { %3246 = vmatmul.f32.gmra.mxu3 %v2967_v31  ;;  %v2917_v31 = vrot.slane %v2840_v20, 2  ;;  %v2757_v18 = vsel %vm2200_vm0, %v2755_v42, %v2756_v40  ;;  %5672 = vset.pattern.permute.xlu1 %v8842_v47  ;;  %v2833_v20 = vld [vmem:[#allocation2 + $0xe8] sm:$0x3] }
 0x251   : > { %3329 = vmatpush.xpose.msrb.mxu3 %v2781_v30  ;;  %v2668_v30 = vld [vmem:[#allocation2 + $0x18] sm:$0xff]  ;;  %3463 = vperm.xlu1 %5672, %v7180_v61  }
 0x252   : > { %3262 = vmatpush.xpose.msrb.mxu0 %v2672_v36  ;;  %v2918_v37 = vsel %vm2329_vm1, %v2916_v10, %v2917_v31  ;;  %v2749_v36 = vrot.slane %v2683_v52, 1  ;;  %v2827_v10 = vld [vmem:[#allocation2 + $0x118] sm:$0xfc]  ;;  %v2829_v31 = vld [vmem:[#allocation2 + $0xa0] sm:$0x3] }
 0x253   : > { %3307 = vmatpush.xpose.msrb.mxu2 %v2772_v39  ;;  %3285 = vmatpush.xpose.msrb.mxu1 %v2673_v63  ;;  %v2834_v39 = vld [vmem:[#allocation2 + $0x58] sm:$0xfc]  ;;  %v2750_v63 = vrot.slane %v2685_v2, 1  ;;  %v2822_v52 = vld [vmem:[#allocation2 + $0xa8] sm:$0xfc] }
 0x254   : > { %v2910_v33 = vrot.slane %v2834_v39, 2  ;;  %v2824_v2 = vld [vmem:[#allocation2 + $0xe0] sm:$0x3] }
 0x255   : > { %3330 = vmatpush.xpose.msrb.mxu3 %v2775_v27  ;;  %v2747_v27 = vrot.slane %v2684_v6, 1  ;;  %v2751_v44 = vsel %vm2200_vm0, %v2749_v36, %v2750_v63  ;;  %v2908_v6 = vrot.slane %v2833_v20, 2  ;;  %5682 = vset.pattern.permute.xlu2 %v8912_v26  ;;  %v2970_v36 = vld [vmem:[%s8756_s5 + $0x100] sm:$0xff]  ;;  %v2971_v63 = vld [vmem:[%s8756_s5 + $0x108] sm:$0xff] }
 0x256   : > { %3263 = vmatpush.xpose.msrb.mxu0 %v2670_v17  ;;  %v2667_v17 = vld [vmem:[#allocation2 + $0x108] sm:$0xff]  ;;  %v2912_v42 = vsel %vm2329_vm1, %v2910_v33, %v2911_v50  ;;  %3943 = vperm.xlu2 %5682, %v7217_v53   ;;  %v2819_v50 = vld [vmem:[#allocation2 + $0x110] sm:$0xfc]  ;;  %v2814_v20 = vld [vmem:[#allocation2 + $0x18] sm:$0xfc] }
 0x257   : > { %3308 = vmatpush.xpose.msrb.mxu2 %v2766_v46  ;;  %3286 = vmatpush.xpose.msrb.mxu1 %v2671_v49  ;;  %v2666_v46 = vld [vmem:[#allocation2 + $0x80] sm:$0xff]  ;;  %v2832_v49 = vld [vmem:[#allocation2 + $0x50] sm:$0x3]  ;;  %v2748_v45 = vsel %vm2200_vm0, %v2746_v60, %v2747_v27  ;;  %v2909_v62 = vsel %vm2329_vm1, %v2907_v54, %v2908_v6  ;;  %v2823_v60 = vld [vmem:[#allocation2 + $0x90] sm:$0xfc] }
 0x258   : > { %v2825_v27 = vld [vmem:[#allocation2 + $0x88] sm:$0x3]  ;;  %v2895_v22 = vrot.slane %v2823_v60, 2 }
 0x259   : > { %3331 = vmatpush.xpose.msrb.mxu3 %v2769_v15  ;;  %v2914_v15 = vrot.slane %v2837_v43, 2  ;;  %3467 = vperm.xlu1 %5672, %v7139_v9   ;;  %v2892_v43 = vrot.slane %v2822_v52, 2  ;;  %v2820_v33 = vld [vmem:[#allocation2 + $0x8] sm:$0x3] }
 0x25a   : > { %3264 = vmatpush.xpose.msrb.mxu0 %v2668_v30  ;;  %v2828_v30 = vld [vmem:[#allocation2 + $0xd8] sm:$0x3] }
 0x25b   : > { %3309 = vmatpush.xpose.msrb.mxu2 %v2760_v59  ;;  %3287 = vmatpush.xpose.msrb.mxu1 %v2669_v25  ;;  %v2905_v59 = vrot.slane %v2832_v49, 2  ;;  %v2915_v40 = vsel %vm2329_vm1, %v2913_v57, %v2914_v15  ;;  %v2899_v8 = vrot.slane %v2828_v30, 2  ;;  %v2901_v25 = vrot.slane %v2827_v10, 2  ;;  %v2821_v57 = vld [vmem:[#allocation2 + $0x98] sm:$0x3] }
 0x25c   : > { %v2890_v28 = vrot.slane %v2821_v57, 2  ;;  %v2810_v10 = vld [vmem:[#allocation2 + $0x80] sm:$0xfc] }
 0x25d   : > { %3332 = vmatpush.xpose.msrb.mxu3 %v2763_v13  ;;  %v2826_v13 = vld [vmem:[#allocation2 + $0xc0] sm:$0xfc]  ;;  %v2906_v39 = vsel %vm2329_vm1, %v2904_v24, %v2905_v59  ;;  %v2815_v24 = vld [vmem:[#allocation2 + $0xc8] sm:$0xfc]  ;;  %v2817_v59 = vld [vmem:[#allocation2 + $0x20] sm:$0x3] }
 0x25e   : > { %3265 = vmatpush.xpose.msrb.mxu0 %v2666_v46  ;;  %v2898_v29 = vrot.slane %v2826_v13, 2  ;;  %v2896_v46 = vrot.slane %v2825_v27, 2  ;;  %v2880_v13 = vrot.slane %v2814_v20, 2  ;;  %v2884_v54 = vrot.slane %v2817_v59, 2 }
 0x25f   : > { %3310 = vmatpush.xpose.msrb.mxu2 %v2754_v3  ;;  %3288 = vmatpush.xpose.msrb.mxu1 %v2667_v17  ;;  %v2968_v3 = vld [vmem:[%s8756_s5 + $0xf0] sm:$0xff] }
 0x260   : > { %v2818_v17 = vld [vmem:[#allocation2 + $0x128] sm:$0xfc]  ;;  %v2900_v49 = vsel %vm2329_vm1, %v2898_v29, %v2899_v8  ;;  %v2813_v8 = vld [vmem:[#allocation2 + $0xf0] sm:$0x3] }
 0x261   : > { %3333 = vmatpush.xpose.msrb.mxu3 %v2757_v18  ;;  %3266 = vmatmul.f32.vlgmr.msrb.gmra.mxu0 %v2950_v5  ;;  %v2902_v18 = vrot.slane %v2829_v31, 2  ;;  %v2886_v15 = vrot.slane %v2818_v17, 2  ;;  %v2812_v31 = vld [vmem:[#allocation2 + $0x138] sm:$0x3]  ;;  %v2811_v29 = vld [vmem:[#allocation2 + $0x108] sm:$0xfc] }
 0x262   : > { %3350 = vmatpush.xpose.msra.mxu0 %v2918_v37  ;;  %3289 = vmatmul.f32.vlgmr.msrb.gmra.mxu1 %v2951_v0  ;;  %v2893_v37 = vrot.slane %v2824_v2, 2  ;;  %v2889_v0 = vrot.slane %v2819_v50, 2  ;;  %v7274_v2 = vld [vmem:[%s7212_s25 + $0x8] sm:$0xff]  ;;  %s5872_s25 = smov 64  }
 0x263   : > { %3373 = vmatpush.xpose.msra.mxu1 %v2921_v41  ;;  %3311 = vmatpush.xpose.msrb.mxu2 %v2748_v45  ;;  %v8844_v41 = vmov 5   ;;  %v2903_v5 = vsel %vm2329_vm1, %v2901_v25, %v2902_v18  ;;  %v2887_v45 = vrot.slane %v2820_v33, 2  ;;  %v2878_v18 = vrot.slane %v2813_v8, 2 }
 0x264   : > { %5679 = vset.pattern.permute.xlu0 %v8844_v41  ;;  %5680 = vset.pattern.permute.xlu1 %v8915_v56  ;;  %v2891_v30 = vsel %vm2329_vm1, %v2889_v0, %v2890_v28 }
 0x265   : > { %3334 = vmatpush.xpose.msrb.mxu3 %v2751_v44  ;;  %v2894_v44 = vsel %vm2329_vm1, %v2892_v43, %v2893_v37  ;;  %5690 = vset.pattern.permute.xlu2 %v8844_v41  ;;  %v2888_v6 = vsel %vm2329_vm1, %v2886_v15, %v2887_v45  ;;  %v2955_v43 = vld [vmem:[%s8756_s5 + $0x88] sm:$0xff]  ;;  %v2972_v37 = vld [vmem:[%s8756_s5 + $0x110] sm:$0xff]  ;;  %v7311_v15 = vld [vmem:[%s8753_s2] ss:$4 sm:$0x3] }
 0x266   : > { %3351 = vmatpush.xpose.msra.mxu0 %v2912_v42  ;;  %3312 = vmatmul.f32.vlgmr.msrb.gmra.mxu2 %v2952_v55  ;;  %v2897_v55 = vsel %vm2329_vm1, %v2895_v22, %v2896_v46  ;;  %v3933_v28 = vperm.slane %v7311_v15, 0  ;;  %v3934_v20 = vperm.slane %v7311_v15, 1  ;;  %v997_v15 = vmul.f32 %v6478_v14, %v6312_v1 }
 0x267   : > { %3374 = vmatpush.xpose.msra.mxu1 %v2915_v40  ;;  %3392 = vperm.xlu1 %5680, %v7180_v61   ;;  %v2883_v40 = vrot.slane %v2815_v24, 2 }
 0x268   : > { %3335 = vmatmul.f32.vlgmr.msrb.gmra.mxu3 %v2953_v19  ;;  %v2816_v19 = vld [vmem:[#allocation2 + $0x70] sm:$0x3]  ;;  %3447 = vperm.xlu2 %5690, %v7139_v9  }
 0x269   : > { %3269 = vmatmul.f32.gmra.mxu0 %v2968_v3  ;;  %v2881_v42 = vrot.slane %v2816_v19, 2  ;;  %v2885_v52 = vsel %vm2329_vm1, %v2883_v40, %v2884_v54  ;;  %v2877_v3 = vrot.slane %v2811_v29, 2 }
 0x26a   : > { %3352 = vmatpush.xpose.msra.mxu0 %v2906_v39  ;;  %3292 = vmatmul.f32.gmra.mxu1 %v2969_v48  ;;  %v2874_v39 = vrot.slane %v2810_v10, 2  ;;  %v2954_v48 = vld [vmem:[%s8756_s5 + $0x80] sm:$0xff] }
 0x26b   : > { %3375 = vmatpush.xpose.msra.mxu1 %v2909_v62  ;;  %v2882_v25 = vsel %vm2329_vm1, %v2880_v13, %v2881_v42  ;;  %v2875_v62 = vrot.slane %v2812_v31, 2  ;;  %v2879_v27 = vsel %vm2329_vm1, %v2877_v3, %v2878_v18 }
 0x26d   : > { %v2876_v60 = vsel %vm2329_vm1, %v2874_v39, %v2875_v62 }
 0x26e   : > { %3353 = vmatpush.xpose.msra.mxu0 %v2900_v49  ;;  %3315 = vmatmul.f32.gmra.mxu2 %v2970_v36  ;;  %v2973_v36 = vld [vmem:[%s8756_s5 + $0x118] sm:$0xff] }
 0x26f   : > { %3376 = vmatpush.xpose.msra.mxu1 %v2903_v5  ;;  %3929 = vperm.xlu1 %5680, %v7274_v2  }
 0x270   : > { %3338 = vmatmul.f32.gmra.mxu3 %v2971_v63  ;;  %5692 = vset.pattern.permute.xlu2 %v8918_v58  ;;  %v8846_v63 = vmov 6  }
 0x271   : > { %3969 = vperm.xlu2 %5692, %v7274_v2  }
 0x272   : > { %3354 = vmatpush.xpose.msra.mxu0 %v2894_v44 }
 0x273   : > { %3377 = vmatpush.xpose.msra.mxu1 %v2897_v55  ;;  %v7318_v55 = vld [vmem:[%s8753_s2 + $0x1] ss:$4 sm:$0x3] }
 0x274   : > { %v8849_v59 = vperm.slane %v7318_v55, 0  ;;  %v8848_v13 = vperm.slane %v7318_v55, 1 }
 0x276   : > { %3355 = vmatpush.xpose.msra.mxu0 %v2888_v6 }
 0x277   : > { %3378 = vmatpush.xpose.msra.mxu1 %v2891_v30  ;;  %5691 = vset.pattern.permute.xlu1 %v8918_v58 }
 0x279   : > { %5694 = vset.pattern.permute.xlu2 %v8915_v56 }
 0x27a   : > { %3356 = vmatpush.xpose.msra.mxu0 %v2882_v25  ;;  %3397 = vperm.xlu2 %5694, %v7139_v9  }
 0x27b   : > { %3379 = vmatpush.xpose.msra.mxu1 %v2885_v52 }
 0x27e   : > { %3357 = vmatpush.xpose.msra.mxu0 %v2876_v60  ;;  %v2991_v5 = vpop.f32.mrf.mxu0 }
 0x27f   : > { %3380 = vmatpush.xpose.msra.mxu1 %v2879_v27  ;;  %v3014_v33 = vpop.f32.mrf.mxu1 }
 0x280   : > { %v3015_v62 = vadd.f32 %v3014_v33, %v2991_v5 }
 0x281   : > { %3358 = vmatmul.f32.vlgmr.msra.gmra.mxu0 %v2954_v48 }
 0x282   : > { %3381 = vmatmul.f32.vlgmr.msra.gmra.mxu1 %v2955_v43  ;;  %5696 = vset.pattern.permute.xlu2 %v8846_v63  ;;  %v7298_v22 = vpop.permute.xlu2 %3427 }
 0x283   : > { %3453 = vperm.xlu2 %5696, %v7180_v61  }
 0x286   : > { %v2994_v45 = vpop.f32.mrf.mxu0 }
 0x287   : > { %v3017_v0 = vpop.f32.mrf.mxu1 }
 0x288   : > { %v3018_v60 = vadd.f32 %v3017_v0, %v2994_v45 }
 0x289   : > { %3361 = vmatmul.f32.gmra.mxu0 %v2972_v37  ;;  %v3037_v57 = vpop.f32.mrf.mxu2 }
 0x28a   : > { %3384 = vmatmul.f32.gmra.mxu1 %v2973_v36  ;;  %v3038_v18 = vadd.f32 %v3037_v57, %v3015_v62 }
 0x28b   : > { %3457 = vperm.xlu2 %5696, %v7139_v9   ;;  %v7301_v46 = vpop.permute.xlu2 %3407  ;;  %v3060_v44 = vpop.f32.mrf.mxu3 }
 0x28c   : > { %v3061_v48 = vadd.f32 %v3060_v44, %v3038_v18 }
 0x291   : > { %v3040_v40 = vpop.f32.mrf.mxu2 }
 0x292   : > { %v3041_v43 = vadd.f32 %v3040_v40, %v3018_v60 }
 0x293   : > { %5699 = vset.pattern.permute.xlu2 %v8922_v23  ;;  %v3063_v8 = vpop.f32.mrf.mxu3 }
 0x294   : > { %v7304_v17 = vpop.permute.xlu2 %3413 }
 0x29e   : > { %v7306_v49 = vpop.permute.xlu2 %3417  ;;  %v3083_v31 = vpop.f32.mrf.mxu0 }
 0x29f   : > { %v3106_v29 = vpop.f32.mrf.mxu1 }
 0x2a6   : > { %v3086_v52 = vpop.f32.mrf.mxu0 }
 0x2a7   : > { %v3925_v50 = vpop.permute.xlu2 %3924  ;;  %v3109_v39 = vpop.f32.mrf.mxu1 }
 0x2a8   : > { %v3937_v19 = vmul.f32 %v3933_v28, %v3925_v50  ;;  %v3938_v24 = vmul.f32 %v3934_v20, %v3925_v50 }
 0x2a9   : > { %v3129_v25 = vpop.f32.mrf.mxu2 }
 0x2ab   : > { %v3152_v3 = vpop.f32.mrf.mxu3 }
 0x2b0   : > { %v3944_v42 = vpop.permute.xlu2 %3943 }
 0x2b1   : > { %v3955_v54 = vmul.f32 %v8849_v59, %v3944_v42  ;;  %v3956_v6 = vmul.f32 %v8848_v13, %v3944_v42  ;;  %v3132_v27 = vpop.f32.mrf.mxu2  ;;  %v3084_v42 = vadd.f32 %v3083_v31, %v3061_v48 }
 0x2b3   : > { %v7330_v30 = vadd.f32 %v3955_v54, %v3937_v19  ;;  %v7332_v10 = vadd.f32 %v3956_v6, %v3938_v24  ;;  %v3155_v50 = vpop.f32.mrf.mxu3  ;;  %v3064_v19 = vadd.f32 %v3063_v8, %v3041_v43  ;;  %v3107_v24 = vadd.f32 %v3106_v29, %v3084_v42 }
 0x2b5   : > { %v3087_v54 = vadd.f32 %v3086_v52, %v3064_v19  ;;  %v3130_v63 = vadd.f32 %v3129_v25, %v3107_v24 }
 0x2b7   : > { %v3110_v13 = vadd.f32 %v3109_v39, %v3087_v54  ;;  %v3153_v5 = vadd.f32 %v3152_v3, %v3130_v63 }
 0x2b9   : > { %v3133_v33 = vadd.f32 %v3132_v27, %v3110_v13 }
 0x2bb   : > { %v3156_v40 = vadd.f32 %v3155_v50, %v3133_v33 }
 0x2be   : > { %v3175_v37 = vpop.f32.mrf.mxu0 }
 0x2bf   : > { %v3198_v36 = vpop.f32.mrf.mxu1  ;;  %v3176_v57 = vadd.f32 %v3175_v37, %v3153_v5 }
 0x2c1   : > { %v3199_v62 = vadd.f32 %v3198_v36, %v3176_v57  ;;  %v3424_v36 = vpop.permute.xlu1 %3423 }
 0x2c6   : > { %v3178_v47 = vpop.f32.mrf.mxu0 }
 0x2c7   : > { %v3201_v41 = vpop.f32.mrf.mxu1  ;;  %v3179_v18 = vadd.f32 %v3178_v47, %v3156_v40 }
 0x2c9   : > { %v3221_v6 = vpop.f32.mrf.mxu2  ;;  %v3202_v31 = vadd.f32 %v3201_v41, %v3179_v18 }
 0x2ca   : > { %v3222_v8 = vadd.f32 %v3221_v6, %v3199_v62 }
 0x2cb   : > { %v3244_v59 = vpop.f32.mrf.mxu3 }
 0x2cc   : > { %v3245_v52 = vadd.f32 %v3244_v59, %v3222_v8 }
 0x2d1   : > { %v3224_v45 = vpop.f32.mrf.mxu2 }
 0x2d2   : > { %v3225_v48 = vadd.f32 %v3224_v45, %v3202_v31 }
 0x2d3   : > { %v3247_v60 = vpop.f32.mrf.mxu3 }
 0x2d4   : > { %v3248_v42 = vadd.f32 %v3247_v60, %v3225_v48  ;;  %v8852_v48 = vmov 4  }
 0x2de   : > { %v3267_v0 = vpop.f32.mrf.mxu0 }
 0x2df   : > { %v3290_v44 = vpop.f32.mrf.mxu1  ;;  %v3268_v25 = vadd.f32 %v3267_v0, %v3245_v52  ;;  %v3583_v52 = vld [vmem:[#allocation4 + $0x1e0] sm:$0xff] }
 0x2e1   : > { %v3291_v63 = vadd.f32 %v3290_v44, %v3268_v25  ;;  %v3404_v44 = vpop.permute.xlu1 %3403  ;;  %v3553_v25 = vld [vmem:[#allocation4 + $0xf0] sm:$0xff] }
 0x2e2   : > { %3685 = vmatpush.msra.mxu2 %v3553_v25  ;;  %v3529_v25 = vld [vmem:[#allocation4 + $0x30] sm:$0xff] }
 0x2e6   : > { %v3270_v43 = vpop.f32.mrf.mxu0 }
 0x2e7   : > { %v3293_v19 = vpop.f32.mrf.mxu1  ;;  %v3271_v13 = vadd.f32 %v3270_v43, %v3248_v42  ;;  %v3581_v43 = vld [vmem:[#allocation4 + $0x1d0] sm:$0xff] }
 0x2e8   : > { %v3577_v42 = vld [vmem:[#allocation4 + $0x1b0] sm:$0xff] }
 0x2e9   : > { %v3313_v29 = vpop.f32.mrf.mxu2  ;;  %v3294_v50 = vadd.f32 %v3293_v19, %v3271_v13  ;;  %v3579_v19 = vld [vmem:[#allocation4 + $0x1c0] sm:$0xff] }
 0x2ea   : > { %v3314_v3 = vadd.f32 %v3313_v29, %v3291_v63  ;;  %v5755_v29 = vld [vmem:[%s8752_s1 + $0x20] sm:$0xff]  ;;  %v3448_v63 = vpop.permute.xlu2 %3447 }
 0x2eb   : > { %v3336_v39 = vpop.f32.mrf.mxu3 }
 0x2ec   : > { %v3337_v47 = vadd.f32 %v3336_v39, %v3314_v3  ;;  %v3464_v39 = vpop.permute.xlu1 %3463  ;;  %v3573_v3 = vld [vmem:[#allocation4 + $0x190] sm:$0xff] }
 0x2f1   : > { %v3316_v27 = vpop.f32.mrf.mxu2 }
 0x2f2   : > { %v3317_v54 = vadd.f32 %v3316_v27, %v3294_v50  ;;  %v3549_v27 = vld [vmem:[#allocation4 + $0xd0] sm:$0xff] }
 0x2f3   : > { %v3339_v6 = vpop.f32.mrf.mxu3  ;;  %v3569_v50 = vld [vmem:[#allocation4 + $0x170] sm:$0xff] }
 0x2f4   : > { %v3340_v5 = vadd.f32 %v3339_v6, %v3317_v54  ;;  %v3567_v6 = vld [vmem:[#allocation4 + $0x160] sm:$0xff] }
 0x2fe   : > { %v3359_v37 = vpop.f32.mrf.mxu0 }
 0x2ff   : > { %v3382_v24 = vpop.f32.mrf.mxu1  ;;  %v3360_v41 = vadd.f32 %v3359_v37, %v3337_v47  ;;  %v3571_v37 = vld [vmem:[#allocation4 + $0x180] sm:$0xff]  ;;  %v3545_v47 = vld [vmem:[#allocation4 + $0xb0] sm:$0xff] }
 0x301   : > { %v7334_v57 = vadd.f32 %v3382_v24, %v3360_v41  ;;  %v3547_v24 = vld [vmem:[#allocation4 + $0xc0] sm:$0xff]  ;;  %v5756_v41 = vld [vmem:[%s8752_s1 + $0x30] sm:$0xff] }
 0x303   : > { %v3430_v40 = vmul.f32 %v3424_v36, %v7334_v57  ;;  %v3410_v18 = vmul.f32 %v3404_v44, %v7334_v57  ;;  %v3470_v13 = vmul.f32 %v3464_v39, %v7334_v57  ;;  %v3468_v36 = vpop.permute.xlu1 %3467  ;;  %v3539_v44 = vld [vmem:[#allocation4 + $0x80] sm:$0xff]  ;;  %v3550_v39 = vld [vmem:[#allocation4 + $0xd8] sm:$0xff] }
 0x306   : > { %v3362_v59 = vpop.f32.mrf.mxu0 }
 0x307   : > { %v3385_v33 = vpop.f32.mrf.mxu1  ;;  %v3363_v45 = vadd.f32 %v3362_v59, %v3340_v5  ;;  %v3543_v5 = vld [vmem:[#allocation4 + $0xa0] sm:$0xff]  ;;  %v3565_v59 = vld [vmem:[#allocation4 + $0x150] sm:$0xff] }
 0x309   : > { %v7336_v0 = vadd.f32 %v3385_v33, %v3363_v45  ;;  %v3541_v33 = vld [vmem:[#allocation4 + $0x90] sm:$0xff]  ;;  %v3563_v45 = vld [vmem:[#allocation4 + $0x140] sm:$0xff] }
 0x30b   : > { %v3431_v62 = vmul.f32 %v7298_v22, %v7336_v0  ;;  %v3411_v60 = vmul.f32 %v7301_v46, %v7336_v0  ;;  %v8850_v22 = vmov 8   ;;  %v5754_v46 = vld [vmem:[%s8752_s1 + $0x18] sm:$0xff]  ;;  %v3471_v54 = vmul.f32 %v3468_v36, %v7336_v0  ;;  %v3663_v36 = vld [vmem:[#allocation4 + $0x460] sm:$0xff] }
 0x30d   : > { %v5674_v8 = vpack.i.bf16 %v3431_v62, %v3430_v40  ;;  %v5685_v31 = vpack.i.bf16 %v3411_v60, %v3410_v18  ;;  %v3561_v40 = vld [vmem:[#allocation4 + $0x130] sm:$0xff]  ;;  %v3559_v18 = vld [vmem:[#allocation4 + $0x120] sm:$0xff] }
 0x30e   : > { %v3537_v62 = vld [vmem:[#allocation4 + $0x70] sm:$0xff]  ;;  %v5757_v60 = vld [vmem:[%s8758_s7 + $0x8] sm:$0xff] }
 0x30f   : > { %5675 = vrot.lane.b32.xlu0 %v5674_v8, %s5872_s25  ;;  %5686 = vrot.lane.b32.xlu1 %v5685_v31, %s5872_s25  ;;  %v5758_v8 = vld [vmem:[%s8752_s1 + $0x48] sm:$0xff] }
 0x310   : > { %v3535_v31 = vld [vmem:[#allocation4 + $0x60] sm:$0xff] }
 0x317   : > { %3443 = vperm.xlu0 %5679, %v7180_v61   ;;  %3965 = vperm.xlu1 %5691, %v7217_v53  }
 0x31f   : > { %5683 = vset.pattern.permute.xlu0 %v8912_v26  ;;  %5693 = vset.pattern.permute.xlu1 %v8922_v23 }
 0x320   : > { %3947 = vperm.xlu0 %5683, %v7274_v2   ;;  %3991 = vperm.xlu1 %5693, %v7274_v2   ;;  %v3585_v2 = vld [vmem:[#allocation4 + $0x1f0] sm:$0xff] }
 0x321   : > { %3708 = vmatpush.msra.mxu3 %v3585_v2  ;;  %v3555_v2 = vld [vmem:[#allocation4 + $0x100] sm:$0xff] }
 0x323   : > { %3709 = vmatpush.msra.mxu3 %v3583_v52  ;;  %v3554_v52 = vld [vmem:[#allocation4 + $0xf8] sm:$0xff] }
 0x325   : > { %3710 = vmatpush.msra.mxu3 %v3581_v43  ;;  %v3531_v43 = vld [vmem:[#allocation4 + $0x40] sm:$0xff] }
 0x327   : > { %3711 = vmatpush.msra.mxu3 %v3579_v19  ;;  %v3552_v19 = vld [vmem:[#allocation4 + $0xe8] sm:$0xff] }
 0x328   : > { %5684 = vset.pattern.permute.xlu0 %v8922_v23  ;;  %5695 = vset.pattern.permute.xlu1 %v8850_v22 }
 0x329   : > { %1397 = vperm.xlu0 %5684, %v5754_v46   ;;  %3473 = vperm.xlu1 %5695, %v7180_v61   ;;  %v3557_v46 = vld [vmem:[#allocation4 + $0x110] sm:$0xff] }
 0x32a   : > { %3712 = vmatpush.msra.mxu3 %v3577_v42  ;;  %v5759_v42 = vld [vmem:[%s8752_s1 + $0x40] sm:$0xff] }
 0x331   : > { %1401 = vperm.xlu0 %5684, %v5755_v29   ;;  %3477 = vperm.xlu1 %5695, %v7139_v9   ;;  %v3575_v9 = vld [vmem:[#allocation4 + $0x1a0] sm:$0xff]  ;;  %v3533_v29 = vld [vmem:[#allocation4 + $0x50] sm:$0xff] }
 0x332   : > { %3713 = vmatpush.msra.mxu3 %v3575_v9  ;;  %v5760_v9 = vld [vmem:[%s8752_s1 + $0x58] sm:$0xff] }
 0x334   : > { %3714 = vmatpush.msra.mxu3 %v3573_v3  ;;  %v3523_v3 = vld [vmem:[#allocation4] sm:$0xff] }
 0x336   : > { %3715 = vmatpush.msra.mxu3 %v3571_v37  ;;  %v3665_v37 = vld [vmem:[#allocation4 + $0x470] sm:$0xff] }
 0x338   : > { %3716 = vmatpush.msra.mxu3 %v3569_v50  ;;  %v5762_v50 = vld [vmem:[%s8752_s1 + $0x70] sm:$0xff] }
 0x339   : > { %3987 = vperm.xlu0 %5684, %v7217_v53   ;;  %5697 = vset.pattern.permute.xlu1 %v8852_v48  ;;  %v3451_v53 = vmul.f32 %v3448_v63, %v7336_v0  ;;  %v3527_v63 = vld [vmem:[#allocation4 + $0x20] sm:$0xff] }
 0x33a   : > { %3433 = vperm.xlu1 %5697, %v7180_v61   ;;  %v3551_v61 = vld [vmem:[#allocation4 + $0xe0] sm:$0xff]  ;;  %3717 = vmatpush.msra.mxu3 %v3567_v6  ;;  %v3661_v6 = vld [vmem:[#allocation4 + $0x450] sm:$0xff] }
 0x33b   : > { %3686 = vmatpush.msra.mxu2 %v3551_v61  ;;  %v3546_v61 = vld [vmem:[#allocation4 + $0xb8] sm:$0xff] }
 0x33c   : > { %3718 = vmatpush.msra.mxu3 %v3565_v59  ;;  %v3659_v59 = vld [vmem:[#allocation4 + $0x440] sm:$0xff] }
 0x33d   : > { %3687 = vmatpush.msra.mxu2 %v3549_v27  ;;  %v3544_v27 = vld [vmem:[#allocation4 + $0xa8] sm:$0xff] }
 0x33e   : > { %3719 = vmatpush.msra.mxu3 %v3563_v45  ;;  %v3647_v45 = vld [vmem:[#allocation4 + $0x3e0] sm:$0xff] }
 0x33f   : > { %3688 = vmatpush.msra.mxu2 %v3547_v24  ;;  %v5761_v24 = vld [vmem:[%s8752_s1 + $0x68] sm:$0xff] }
 0x340   : > { %3720 = vmatpush.msra.mxu3 %v3561_v40  ;;  %v5763_v40 = vld [vmem:[%s8752_s1 + $0x80] sm:$0xff] }
 0x341   : > { %3508 = vrot.lane.b32.xlu0 %v3470_v13, %s5872_s25  ;;  %3689 = vmatpush.msra.mxu2 %v3545_v47  ;;  %v3548_v13 = vld [vmem:[#allocation4 + $0xc8] sm:$0xff]  ;;  %v3542_v47 = vld [vmem:[#allocation4 + $0x98] sm:$0xff] }
 0x342   : > { %3502 = vrot.lane.b32.xlu1 %v3451_v53, %s5872_s25  ;;  %5698 = vset.pattern.permute.xlu0 %v8852_v48  ;;  %v3525_v53 = vld [vmem:[#allocation4 + $0x10] sm:$0xff] }
 0x343   : > { %5700 = vset.pattern.permute.xlu1 %v8922_v23  ;;  %3690 = vmatpush.msra.mxu2 %v3543_v5  ;;  %v3649_v5 = vld [vmem:[#allocation4 + $0x3f0] sm:$0xff] }
 0x344   : > { %3721 = vmatpush.msra.mxu3 %v3559_v18  ;;  %3754 = vmatpush.msrb.mxu1 %v3649_v5  ;;  %v3655_v18 = vld [vmem:[#allocation4 + $0x420] sm:$0xff] }
 0x345   : > { %3691 = vmatpush.msra.mxu2 %v3541_v33  ;;  %v3536_v33 = vld [vmem:[#allocation4 + $0x68] sm:$0xff] }
 0x346   : > { %3722 = vmatpush.msra.mxu3 %v3557_v46  ;;  %3755 = vmatpush.msrb.mxu1 %v3647_v45  ;;  %v3532_v46 = vld [vmem:[#allocation4 + $0x48] sm:$0xff] }
 0x347   : > { %3692 = vmatpush.msra.mxu2 %v3539_v44  ;;  %v3657_v44 = vld [vmem:[#allocation4 + $0x430] sm:$0xff] }
 0x348   : > { %3723 = vmatpush.msra.mxu3 %v3555_v2  ;;  %v3651_v2 = vld [vmem:[#allocation4 + $0x400] sm:$0xff] }
 0x349   : > { %3510 = vrot.lane.b32.xlu0 %v3471_v54, %s5872_s25  ;;  %3693 = vmatpush.msra.mxu2 %v3537_v62  ;;  %v3540_v54 = vld [vmem:[#allocation4 + $0x88] sm:$0xff]  ;;  %v5764_v62 = vld [vmem:[%s8752_s1 + $0x88] sm:$0xff] }
 0x34a   : > { %1409 = vperm.xlu1 %5700, %v5756_v41   ;;  %3800 = vmatpush.msrb.mxu3 %v3554_v52  ;;  %v3538_v41 = vld [vmem:[#allocation4 + $0x78] sm:$0xff] }
 0x34b   : > { %3694 = vmatpush.msra.mxu2 %v3535_v31  ;;  %v3653_v31 = vld [vmem:[#allocation4 + $0x410] sm:$0xff]  ;;  %v3530_v52 = vld [vmem:[#allocation4 + $0x38] sm:$0xff] }
 0x34c   : > { %3801 = vmatpush.msrb.mxu3 %v3552_v19  ;;  %v3641_v19 = vld [vmem:[#allocation4 + $0x3b0] sm:$0xff] }
 0x34d   : > { %3695 = vmatpush.msra.mxu2 %v3533_v29  ;;  %v3643_v29 = vld [vmem:[#allocation4 + $0x3c0] sm:$0xff] }
 0x34e   : > { %3802 = vmatpush.msrb.mxu3 %v3550_v39  ;;  %v5765_v39 = vld [vmem:[%s8752_s1 + $0x98] sm:$0xff] }
 0x34f   : > { %3696 = vmatpush.msra.mxu2 %v3531_v43  ;;  %v3393_v43 = vpop.permute.xlu1 %3392 }
 0x350   : > { %3803 = vmatpush.msrb.mxu3 %v3548_v13  ;;  %v3637_v13 = vld [vmem:[#allocation4 + $0x390] sm:$0xff] }
 0x351   : > { %3437 = vperm.xlu0 %5698, %v5757_v60   ;;  %3697 = vmatpush.msra.mxu2 %v3529_v25  ;;  %v3534_v60 = vld [vmem:[#allocation4 + $0x58] sm:$0xff]  ;;  %v3528_v25 = vld [vmem:[#allocation4 + $0x28] sm:$0xff] }
 0x352   : > { %1421 = vperm.xlu1 %5700, %v5758_v8   ;;  %3804 = vmatpush.msrb.mxu3 %v3546_v61  ;;  %v3645_v8 = vld [vmem:[#allocation4 + $0x3d0] sm:$0xff]  ;;  %v7407_v61 = vpop.permute.xlu0 %1242 }
 0x353   : > { %3698 = vmatpush.msra.mxu2 %v3527_v63  ;;  %3756 = vmatpush.msrb.mxu1 %v3645_v8  ;;  %v3526_v63 = vld [vmem:[#allocation4 + $0x18] sm:$0xff]  ;;  %8964 = vst [vmem:[#allocation98_spill] sm:$0xff] %v7407_v61 }
 0x354   : > { %3805 = vmatpush.msrb.mxu3 %v3544_v27  ;;  %v3970_v27 = vpop.permute.xlu2 %3969 }
 0x355   : > { %3699 = vmatpush.msra.mxu2 %v3525_v53  ;;  %3757 = vmatpush.msrb.mxu1 %v3643_v29 }
 0x356   : > { %3806 = vmatpush.msrb.mxu3 %v3542_v47 }
 0x357   : > { %3700 = vmatpush.msra.mxu2 %v3523_v3  ;;  %3758 = vmatpush.msrb.mxu1 %v3641_v19  ;;  %v3930_v53 = vpop.permute.xlu1 %3929  ;;  %v5767_v3 = vld [vmem:[%s8752_s1 + $0xb0] sm:$0xff] }
 0x358   : > { %3807 = vmatpush.msrb.mxu3 %v3540_v54  ;;  %v3420_v54 = vmul.f32 %v7304_v17, %v7334_v57 }
 0x359   : > { %5701 = vset.pattern.permute.xlu0 %v8922_v23  ;;  %3785 = vmatpush.msrb.mxu2 %v3665_v37  ;;  %v8998_v23 = vld [vmem:[#allocation47_spill] sm:$0xff] }
 0x35a   : > { %1417 = vperm.xlu0 %5701, %v5759_v42   ;;  %1429 = vperm.xlu1 %5700, %v5760_v9   ;;  %v5766_v42 = vld [vmem:[%s8752_s1 + $0xa0] sm:$0xff]  ;;  %v3639_v9 = vld [vmem:[#allocation4 + $0x3a0] sm:$0xff] }
 0x35b   : > { %3786 = vmatpush.msrb.mxu2 %v3663_v36  ;;  %3808 = vmatpush.msrb.mxu3 %v3538_v41 }
 0x35c   : > { %3759 = vmatpush.msrb.mxu1 %v3639_v9 }
 0x35d   : > { %3787 = vmatpush.msrb.mxu2 %v3661_v6  ;;  %3809 = vmatpush.msrb.mxu3 %v3536_v33  ;;  %v3586_v6 = vld [vmem:[#allocation4 + $0x1f8] sm:$0xff] }
 0x35e   : > { %3760 = vmatpush.msrb.mxu1 %v3637_v13  ;;  %v8965_v13 = vperm.slane %v7318_v55, 0 }
 0x35f   : > { %3788 = vmatpush.msrb.mxu2 %v3659_v59  ;;  %3810 = vmatpush.msrb.mxu3 %v3534_v60  ;;  %v3584_v59 = vld [vmem:[#allocation4 + $0x1e8] sm:$0xff]  ;;  %v3421_v60 = vmul.f32 %v7306_v49, %v7336_v0  ;;  %v7447_v49 = vld [vmem:[%s8753_s2 + $0x3] ss:$4 sm:$0x3] }
 0x360   : > { %v3995_v19 = vperm.slane %v7447_v49, 0 }
 0x361   : > { %3789 = vmatpush.msrb.mxu2 %v3657_v44  ;;  %3811 = vmatpush.msrb.mxu3 %v3532_v46  ;;  %v3398_v44 = vpop.permute.xlu2 %3397  ;;  %v7440_v46 = vld [vmem:[%s8753_s2 + $0x2] ss:$4 sm:$0x3] }
 0x362   : > { %1437 = vperm.xlu0 %5701, %v5761_v24   ;;  %1441 = vperm.xlu1 %5700, %v5762_v50   ;;  %v3400_v50 = vmul.f32 %v3393_v43, %v7334_v57  ;;  %v3973_v29 = vperm.slane %v7440_v46, 0  ;;  %v3940_v43 = vmul.f32 %v3934_v20, %v3930_v53  ;;  %v5768_v20 = vld [vmem:[%s8752_s1 + $0x28] sm:$0xff] }
 0x363   : > { %3790 = vmatpush.msrb.mxu2 %v3655_v18  ;;  %3812 = vmatpush.msrb.mxu3 %v3530_v52  ;;  %v3401_v18 = vmul.f32 %v3398_v44, %v7336_v0  ;;  %v3939_v52 = vmul.f32 %v3933_v28, %v3930_v53  ;;  %v8966_v28 = vperm.slane %v7318_v55, 1  ;;  %v998_v55 = vmul.f32 %v6480_v11, %v6312_v1 }
 0x364   : > { %v3979_v9 = vmul.f32 %v3973_v29, %v3970_v27 }
 0x365   : > { %3791 = vmatpush.msrb.mxu2 %v3653_v31  ;;  %3813 = vmatpush.msrb.mxu3 %v3528_v25  ;;  %v3996_v25 = vperm.slane %v7447_v49, 1 }
 0x367   : > { %3792 = vmatpush.msrb.mxu2 %v3651_v2  ;;  %3814 = vmatpush.msrb.mxu3 %v3526_v63  ;;  %v3974_v2 = vperm.slane %v7440_v46, 1  ;;  %v8973_v46 = vld [vmem:[#allocation12_spill] sm:$0xff] }
 0x369   : > { %v3980_v63 = vmul.f32 %v3974_v2, %v3970_v27 }
 0x36a   : > { %1449 = vperm.xlu0 %5701, %v5763_v40   ;;  %1453 = vperm.xlu1 %5700, %v5764_v62  }
 0x372   : > { %1461 = vperm.xlu0 %5701, %v5765_v39   ;;  %1465 = vperm.xlu1 %5700, %v5766_v42  }
 0x37a   : > { %1473 = vperm.xlu0 %5701, %v5767_v3   ;;  %5702 = vset.pattern.permute.xlu1 %v8912_v26  ;;  %v1017_v26 = vmul.f32 %v6478_v14, %v8998_v23 }
 0x381   : > { %v5676_v37 = vpop.permute.xlu0 %5675  ;;  %v5687_v24 = vpop.permute.xlu1 %5686 }
 0x382   : > { %v5677_v36 = vunpack.i.l.bf16 %v5676_v37  ;;  %v5688_v47 = vunpack.i.l.bf16 %v5687_v24  ;;  %v5678_v33 = vunpack.i.h.bf16 %v5676_v37  ;;  %v5689_v45 = vunpack.i.h.bf16 %v5687_v24 }
 0x384   : > { %v7417_v41 = vsel %vm3514_vm2, %v3400_v50, %v5688_v47  ;;  %v7420_v5 = vsel %vm3514_vm2, %v3420_v54, %v5677_v36  ;;  %v7432_v8 = vsel %vm3514_vm2, %v3401_v18, %v5689_v45  ;;  %v7435_v31 = vsel %vm3514_vm2, %v3421_v60, %v5678_v33  ;;  %v8967_v36 = vld [vmem:[#allocation15_spill] sm:$0xff] }
 0x385   : > { %3701 = vmatmul.f32.vlgmr.msra.gmra.mxu2 %v7417_v41  ;;  %3724 = vmatmul.f32.vlgmr.msra.gmra.mxu3 %v7420_v5  ;;  %v798_v47 = vmul.f32 %v6474_v32, %v8967_v36  ;;  %v8968_v54 = vld [vmem:[#allocation55_spill] sm:$0xff]  ;;  %v799_v45 = vmul.f32 %v6476_v12, %v8967_v36 }
 0x386   : > { %3823 = vmatpush.msra.mxu2 %v3586_v6  ;;  %v1260_v6 = vmul.f32 %v6806_v38, %v8968_v54  ;;  %v1261_v44 = vmul.f32 %v6808_v21, %v8968_v54 }
 0x387   : > { %v1062_v60 = vadd.f32 %v998_v55, %v799_v45  ;;  %v3664_v55 = vld [vmem:[#allocation4 + $0x468] sm:$0xff] }
 0x388   : > { %3824 = vmatpush.msra.mxu2 %v3584_v59 }
 0x389   : > { %v3444_v40 = vpop.permute.xlu0 %3443  ;;  %v7425_v62 = vpop.permute.xlu1 %3965 }
 0x38a   : > { %v3450_v17 = vmul.f32 %v3444_v40, %v7334_v57  ;;  %v1061_v40 = vadd.f32 %v997_v15, %v798_v47  ;;  %v8969_v47 = vld [vmem:[#allocation41_spill] sm:$0xff] }
 0x38b   : > { %v999_v54 = vmul.f32 %v6478_v14, %v8969_v47  ;;  %v1000_v45 = vmul.f32 %v6480_v11, %v8969_v47  ;;  %v3656_v47 = vld [vmem:[#allocation4 + $0x428] sm:$0xff] }
 0x38c   : > { %3500 = vrot.lane.b32.xlu2 %v3450_v17, %s5872_s25 }
 0x38d   : > { %3704 = vmatmul.f32.gmra.mxu2 %v7432_v8  ;;  %3727 = vmatmul.f32.gmra.mxu3 %v7435_v31 }
 0x392   : > { %v3948_v39 = vpop.permute.xlu0 %3947  ;;  %v3992_v42 = vpop.permute.xlu1 %3991 }
 0x393   : > { %v3957_v3 = vmul.f32 %v8965_v13, %v3948_v39  ;;  %v3958_v37 = vmul.f32 %v8966_v28, %v3948_v39  ;;  %v4001_v50 = vmul.f32 %v3995_v19, %v3992_v42  ;;  %v4002_v27 = vmul.f32 %v3996_v25, %v3992_v42  ;;  %v3582_v42 = vld [vmem:[#allocation4 + $0x1d8] sm:$0xff]  ;;  %v3524_v13 = vld [vmem:[#allocation4 + $0x8] sm:$0xff] }
 0x394   : > { %1405 = vperm.xlu2 %5699, %v5768_v20   ;;  %3825 = vmatpush.msra.mxu2 %v3582_v42  ;;  %v3580_v20 = vld [vmem:[#allocation4 + $0x1c8] sm:$0xff]  ;;  %v3574_v42 = vld [vmem:[#allocation4 + $0x198] sm:$0xff] }
 0x395   : > { %v3961_v53 = vadd.f32 %v3957_v3, %v3939_v52  ;;  %v3962_v24 = vadd.f32 %v3958_v37, %v3940_v43  ;;  %v1324_v52 = vadd.f32 %v1260_v6, %v1061_v40  ;;  %3815 = vmatpush.msrb.mxu3 %v3524_v13  ;;  %v3635_v37 = vld [vmem:[#allocation4 + $0x380] sm:$0xff]  ;;  %v5769_v40 = vld [vmem:[%s8752_s1 + $0x38] sm:$0xff]  ;;  %v3660_v13 = vld [vmem:[#allocation4 + $0x448] sm:$0xff] }
 0x396   : > { %3761 = vmatpush.msrb.mxu1 %v3635_v37  ;;  %3816 = vmatmul.f32.vlgmr.msrb.gmra.mxu3 %v7417_v41  ;;  %v3631_v6 = vld [vmem:[#allocation4 + $0x360] sm:$0xff]  ;;  %v3576_v41 = vld [vmem:[#allocation4 + $0x1a8] sm:$0xff]  ;;  %v3658_v37 = vld [vmem:[#allocation4 + $0x438] sm:$0xff] }
 0x397   : > { %v3983_v59 = vadd.f32 %v3979_v9, %v3961_v53  ;;  %v3984_v33 = vadd.f32 %v3980_v63, %v3962_v24  ;;  %v1325_v9 = vadd.f32 %v1261_v44, %v1062_v60  ;;  %v3666_v53 = vld [vmem:[#allocation4 + $0x478] sm:$0xff]  ;;  %3826 = vmatpush.msra.mxu2 %v3580_v20 }
 0x398   : > { %3900 = vmatpush.msra.mxu3 %v3666_v53  ;;  %v3662_v44 = vld [vmem:[#allocation4 + $0x458] sm:$0xff] }
 0x399   : > { %v4005_v17 = vadd.f32 %v4001_v50, %v3983_v59  ;;  %v4006_v18 = vadd.f32 %v4002_v27, %v3984_v33  ;;  %v3633_v50 = vld [vmem:[#allocation4 + $0x370] sm:$0xff]  ;;  %v3578_v27 = vld [vmem:[#allocation4 + $0x1b8] sm:$0xff] }
 0x39a   : > { %3762 = vmatpush.msrb.mxu1 %v3633_v50  ;;  %v8971_v60 = vld [vmem:[#allocation61_spill] sm:$0xff]  ;;  %3827 = vmatpush.msra.mxu2 %v3578_v27 }
 0x39b   : > { %v4037_v1 = vrot.slane %v4005_v17, 7  ;;  %v4038_v43 = vrot.slane %v4006_v18, 7  ;;  %v4044_v39 = vrot.slane %v4005_v17, 3  ;;  %v1398_v3 = vpop.permute.xlu0 %1397  ;;  %v3474_v28 = vpop.permute.xlu1 %3473  ;;  %v4045_v63 = vrot.slane %v4006_v18, 3  ;;  %v8970_v17 = vld [vmem:[#allocation10_spill] sm:$0xff]  ;;  %3901 = vmatpush.msra.mxu3 %v3664_v55  ;;  %v3570_v55 = vld [vmem:[#allocation4 + $0x178] sm:$0xff] }
 0x39c   : > { %v1523_v15 = vmul.f32 %v6851_v51, %v1398_v3  ;;  %v1524_v24 = vmul.f32 %v6853_v35, %v1398_v3  ;;  %v7488_v36 = vmul.f32 %v3474_v28, %v7334_v57  ;;  %1413 = vperm.xlu2 %5699, %v5769_v40   ;;  %v800_v18 = vmul.f32 %v6474_v32, %v8970_v17  ;;  %v3627_v28 = vld [vmem:[#allocation4 + $0x340] sm:$0xff] }
 0x39d   : > { %4042 = vst [vmem:[#allocation3 + $0x8] sm:$0x1e] %v4037_v1  ;;  %v3629_v1 = vld [vmem:[#allocation4 + $0x350] sm:$0xff]  ;;  %3763 = vmatpush.msrb.mxu1 %v3631_v6  ;;  %3828 = vmatpush.msra.mxu2 %v3576_v41 }
 0x39e   : > { %4043 = vst [vmem:[#allocation3 + $0x50] sm:$0x1e] %v4038_v43  ;;  %v1587_v59 = vadd.f32 %v1523_v15, %v1324_v52  ;;  %v1588_v33 = vadd.f32 %v1524_v24, %v1325_v9  ;;  %v1262_v52 = vmul.f32 %v6806_v38, %v8971_v60  ;;  %v801_v43 = vmul.f32 %v6476_v12, %v8970_v17  ;;  %v3625_v15 = vld [vmem:[#allocation4 + $0x330] sm:$0xff]  ;;  %v3566_v17 = vld [vmem:[#allocation4 + $0x158] sm:$0xff] }
 0x39f   : > { %4049 = vst [vmem:[#allocation3 + $0x10] sm:$0x1e] %v4044_v39  ;;  %v1263_v39 = vmul.f32 %v6808_v21, %v8971_v60  ;;  %5517 = vmatmul.msk.f32.vlgmr.msrb.gmra.mxu2 %vm3514_vm2, %v7488_v36  ;;  %v1063_v3 = vadd.f32 %v999_v54, %v800_v18  ;;  %3902 = vmatpush.msra.mxu3 %v3662_v44  ;;  %v3623_v54 = vld [vmem:[#allocation4 + $0x320] sm:$0xff]  ;;  %v3654_v44 = vld [vmem:[#allocation4 + $0x418] sm:$0xff]  ;;  %v3652_v18 = vld [vmem:[#allocation4 + $0x408] sm:$0xff] }
 0x3a0   : > { %4050 = vst [vmem:[#allocation3 + $0x18] sm:$0x1e] %v4045_v63  ;;  %v1064_v9 = vadd.f32 %v1000_v45, %v801_v43  ;;  %3764 = vmatpush.msrb.mxu1 %v3629_v1  ;;  %v3572_v63 = vld [vmem:[#allocation4 + $0x188] sm:$0xff]  ;;  %3829 = vmatpush.msra.mxu2 %v3574_v42  ;;  %v3619_v60 = vld [vmem:[#allocation4 + $0x300] sm:$0xff] }
 0x3a1   : > { %1651 = vst [vmem:[%s6873_s29 + $0x30] sm:$0xff] %v1587_v59  ;;  %v1326_v53 = vadd.f32 %v1262_v52, %v1063_v3  ;;  %3903 = vmatpush.msra.mxu3 %v3660_v13  ;;  %v3568_v59 = vld [vmem:[#allocation4 + $0x168] sm:$0xff]  ;;  %v3650_v13 = vld [vmem:[#allocation4 + $0x3f8] sm:$0xff] }
 0x3a2   : > { %1652 = vst [vmem:[%s6873_s29 + $0x38] sm:$0xff] %v1588_v33  ;;  %v1327_v27 = vadd.f32 %v1263_v39, %v1064_v9  ;;  %3765 = vmatpush.msrb.mxu1 %v3627_v28  ;;  %3819 = vmatmul.f32.gmra.mxu3 %v7432_v8  ;;  %v5770_v45 = vld [vmem:[%s8752_s1 + $0x50] sm:$0xff]  ;;  %v3621_v8 = vld [vmem:[#allocation4 + $0x310] sm:$0xff]  ;;  %v5771_v28 = vld [vmem:[%s8752_s1 + $0x60] sm:$0xff]  ;;  %v3977_v9 = vmul.f32 %v3973_v29, %v7425_v62 }
 0x3a3   : > { %v1402_v20 = vpop.permute.xlu0 %1401  ;;  %3830 = vmatpush.msra.mxu2 %v3572_v63  ;;  %3904 = vmatpush.msra.mxu3 %v3658_v37  ;;  %v3478_v40 = vpop.permute.xlu1 %3477  ;;  %v3564_v39 = vld [vmem:[#allocation4 + $0x148] sm:$0xff]  ;;  %v3978_v63 = vmul.f32 %v3974_v2, %v7425_v62  ;;  %v3562_v37 = vld [vmem:[#allocation4 + $0x138] sm:$0xff]  ;;  %v7546_v2 = vmul.f32 %v6474_v32, %v8973_v46 }
 0x3a4   : > { %v1525_v24 = vmul.f32 %v6851_v51, %v1402_v20  ;;  %v1526_v50 = vmul.f32 %v6853_v35, %v1402_v20  ;;  %3766 = vmatpush.msrb.mxu1 %v3625_v15  ;;  %1425 = vperm.xlu2 %5699, %v5770_v45   ;;  %v3481_v1 = vmul.f32 %v3478_v40, %v7336_v0  ;;  %v4057_v43 = vld [vmem:[#allocation3 + $0x8] sm:$0xf]  ;;  %v8977_v40 = vld [vmem:[#allocation17_spill] sm:$0xff] }
 0x3a5   : > { %v4058_v41 = vld [vmem:[#allocation3 + $0x50] sm:$0xf]  ;;  %3831 = vmatpush.msra.mxu2 %v3570_v55  ;;  %3905 = vmatpush.msra.mxu3 %v3656_v47  ;;  %v3648_v20 = vld [vmem:[#allocation4 + $0x3e8] sm:$0xff]  ;;  %v3981_v15 = vadd.f32 %v3977_v9, %v7330_v30  ;;  %v7550_v30 = vmul.f32 %v6476_v12, %v8973_v46 }
 0x3a6   : > { %v1589_v6 = vadd.f32 %v1525_v24, %v1326_v53  ;;  %v1590_v33 = vadd.f32 %v1526_v50, %v1327_v27  ;;  %3767 = vmatpush.msrb.mxu1 %v3623_v54  ;;  %v4070_v52 = vrot.slane %v4058_v41, 4  ;;  %v3560_v53 = vld [vmem:[#allocation4 + $0x128] sm:$0xff]  ;;  %v3617_v24 = vld [vmem:[#allocation4 + $0x2f0] sm:$0xff]  ;;  %v3646_v50 = vld [vmem:[#allocation4 + $0x3d8] sm:$0xff] }
 0x3a7   : > { %3832 = vmatpush.msra.mxu2 %v3568_v59  ;;  %3906 = vmatpush.msra.mxu3 %v3654_v44  ;;  %v8972_v27 = vld [vmem:[#allocation11_spill] sm:$0xff]  ;;  %v4052_v55 = vld [vmem:[#allocation3 + $0x30] sm:$0xf]  ;;  %v8974_v54 = vld [vmem:[#allocation13_spill] sm:$0xff] }
 0x3a8   : > { %1653 = vst [vmem:[%s6873_s29 + $0x40] sm:$0xff] %v1589_v6  ;;  %3768 = vmatpush.msrb.mxu1 %v3621_v8  ;;  %v4075_v42 = vsel %vm4071_vm3, %v4057_v43, %v4070_v52  ;;  %5518 = vmatmul.msk.f32.gmra.mxu2 %vm3514_vm2, %v3481_v1  ;;  %v7536_v29 = vmul.f32 %v6474_v32, %v8972_v27  ;;  %v8976_v41 = vld [vmem:[#allocation16_spill] sm:$0xff]  ;;  %v8979_v52 = vld [vmem:[#allocation18_spill] sm:$0xff]  ;;  %v3454_v43 = vpop.permute.xlu2 %3453 }
 0x3a9   : > { %1654 = vst [vmem:[%s6873_s29 + $0x48] sm:$0xff] %v1590_v33  ;;  %3833 = vmatpush.msra.mxu2 %v3566_v17  ;;  %3907 = vmatpush.msra.mxu3 %v3652_v18  ;;  %v7554_v6 = vmul.f32 %v6474_v32, %v8974_v54  ;;  %v7558_v49 = vmul.f32 %v6476_v12, %v8974_v54  ;;  %v4051_v18 = vld [vmem:[#allocation3 + $0x58] sm:$0xf] }
 0x3aa   : > { %3769 = vmatpush.msrb.mxu1 %v3619_v60  ;;  %5519 = vmatmul.msk.f32.vlgmr.msra.gmra.mxu3 %vm3514_vm2, %v7488_v36  ;;  %4424 = vst [vmem:[#allocation1 + $0x11] ss:$2 sm:$0xff] %v4075_v42  ;;  %v3982_v33 = vadd.f32 %v3978_v63, %v7332_v10  ;;  %v7572_v44 = vmul.f32 %v6474_v32, %v8976_v41  ;;  %v5772_v10 = vld [vmem:[%s8752_s1 + $0x78] sm:$0xff] }
 0x3ab   : > { %3834 = vmatpush.msra.mxu2 %v3564_v39  ;;  %v3988_v3 = vpop.permute.xlu0 %3987  ;;  %3731 = vmatpush.msrb.mxu0 %v3617_v24  ;;  %v7576_v8 = vmul.f32 %v6476_v12, %v8976_v41  ;;  %v7580_v17 = vmul.f32 %v6474_v32, %v8977_v40  ;;  %v7587_v60 = vmul.f32 %v6476_v12, %v8977_v40  ;;  %v4067_v39 = vrot.slane %v4052_v55, 4  ;;  %v8981_v63 = vld [vmem:[#allocation20_spill] sm:$0xff]  ;;  %v8983_v24 = vld [vmem:[#allocation21_spill] sm:$0xff] }
 0x3ac   : > { %1433 = vperm.xlu2 %5699, %v5771_v28   ;;  %3869 = vmatpush.msra.mxu1 %v3650_v13  ;;  %v3999_v36 = vmul.f32 %v3995_v19, %v3988_v3  ;;  %v7540_v19 = vmul.f32 %v6476_v12, %v8972_v27  ;;  %v4000_v62 = vmul.f32 %v3996_v25, %v3988_v3  ;;  %v8975_v25 = vld [vmem:[#allocation14_spill] sm:$0xff]  ;;  %v8980_v3 = vld [vmem:[#allocation19_spill] sm:$0xff]  ;;  %v7645_v22 = vpop.permute.xlu1 %3433 }
 0x3ad   : > { %3835 = vmatpush.msra.mxu2 %v3562_v37  ;;  %v7562_v59 = vmul.f32 %v6474_v32, %v8975_v25  ;;  %v7568_v45 = vmul.f32 %v6476_v12, %v8975_v25  ;;  %8978 = vst [vmem:[#allocation15_spill] sm:$0xff] %v7587_v60  ;;  %v7595_v13 = vmul.f32 %v6808_v21, %v8979_v52  ;;  %v8985_v25 = vld [vmem:[#allocation26_spill] sm:$0xff]  ;;  %v3628_v60 = vld [vmem:[#allocation4 + $0x348] sm:$0xff] }
 0x3ae   : > { %3870 = vmatpush.msra.mxu1 %v3648_v20  ;;  %v4003_v47 = vadd.f32 %v3999_v36, %v3981_v15  ;;  %v4004_v42 = vadd.f32 %v4000_v62, %v3982_v33  ;;  %v7599_v28 = vmul.f32 %v6474_v32, %v8980_v3  ;;  %v7603_v9 = vmul.f32 %v6476_v12, %v8980_v3  ;;  %v8984_v62 = vld [vmem:[#allocation23_spill] sm:$0xff]  ;;  %v8986_v33 = vld [vmem:[#allocation36_spill] sm:$0xff] }
 0x3af   : > { %3836 = vmatpush.msra.mxu2 %v3560_v53  ;;  %v7607_v37 = vmul.f32 %v6474_v32, %v8981_v63  ;;  %v4072_v20 = vsel %vm4071_vm3, %v4051_v18, %v4067_v39  ;;  %v7616_v27 = vmul.f32 %v6808_v21, %v8983_v24  ;;  %v7620_v46 = vmul.f32 %v6474_v32, %v8984_v62  ;;  %v8988_v39 = vld [vmem:[#allocation38_spill] sm:$0xff] }
 0x3b0   : > { %3871 = vmatpush.msra.mxu1 %v3646_v50  ;;  %v4021_v36 = vrot.slane %v4003_v47, 7  ;;  %v4022_v53 = vrot.slane %v4004_v42, 7  ;;  %v4028_v15 = vrot.slane %v4003_v47, 3  ;;  %v7612_v50 = vmul.f32 %v6806_v38, %v8983_v24  ;;  %4418 = vst [vmem:[#allocation1] ss:$2 sm:$0xff] %v4072_v20  ;;  %v3558_v20 = vld [vmem:[#allocation4 + $0x118] sm:$0xff] }
 0x3b1   : > { %8982 = vst [vmem:[#allocation55_spill] sm:$0xff] %v7607_v37  ;;  %v4029_v55 = vrot.slane %v4004_v42, 3  ;;  %v7624_v54 = vmul.f32 %v6476_v12, %v8984_v62  ;;  %v7628_v47 = vmul.f32 %v6474_v32, %v8985_v25  ;;  %v1001_v41 = vmul.f32 %v6478_v14, %v8986_v33  ;;  %v3615_v24 = vld [vmem:[#allocation4 + $0x2e0] sm:$0xff]  ;;  %v3644_v62 = vld [vmem:[#allocation4 + $0x3c8] sm:$0xff]  ;;  %3837 = vmatpush.msra.mxu2 %v3558_v20 }
 0x3b2   : > { %5520 = vmatmul.msk.f32.gmra.mxu3 %vm3514_vm2, %v3481_v1  ;;  %v7591_v1 = vmul.f32 %v6806_v38, %v8979_v52  ;;  %v1002_v40 = vmul.f32 %v6480_v11, %v8986_v33  ;;  %4026 = vst [vmem:[#allocation3 + $0x38] sm:$0x1e] %v4021_v36  ;;  %v7636_v18 = vmul.f32 %v6476_v12, %v8985_v25  ;;  %v8989_v33 = vld [vmem:[#allocation31_spill] sm:$0xff] }
 0x3b3   : > { %v1007_v42 = vmul.f32 %v6478_v14, %v8988_v39  ;;  %v3460_v3 = vmul.f32 %v3454_v43, %v7334_v57  ;;  %4027 = vst [vmem:[#allocation3 + $0x28] sm:$0x1e] %v4022_v53  ;;  %v3509_v36 = vpop.permute.xlu0 %3508  ;;  %v7653_v48 = vmul.f32 %v6474_v32, %v8989_v33  ;;  %v1008_v34 = vmul.f32 %v6480_v11, %v8988_v39  ;;  %v3556_v43 = vld [vmem:[#allocation4 + $0x108] sm:$0xff]  ;;  %v3613_v53 = vld [vmem:[#allocation4 + $0x2d0] sm:$0xff] }
 0x3b4   : > { %1445 = vperm.xlu2 %5699, %v5772_v10   ;;  %v8987_v10 = vld [vmem:[#allocation29_spill] sm:$0xff]  ;;  %4033 = vst [vmem:[#allocation3 + $0x48] sm:$0x1e] %v4028_v15  ;;  %3732 = vmatpush.msrb.mxu0 %v3615_v24  ;;  %v7659_v61 = vmul.f32 %v6476_v12, %v8989_v33  ;;  %v5773_v15 = vld [vmem:[%s8752_s1 + $0x90] sm:$0xff]  ;;  %v7670_v39 = vadd.f32 %v1001_v41, %v7536_v29  ;;  %v3609_v29 = vld [vmem:[#allocation4 + $0x2b0] sm:$0xff] }
 0x3b5   : > { %v7640_v52 = vmul.f32 %v6474_v32, %v8987_v10  ;;  %v7649_v25 = vmul.f32 %v6476_v12, %v8987_v10  ;;  %v1013_v10 = vmul.f32 %v6478_v14, %v8990_v7  ;;  %4034 = vst [vmem:[#allocation3 + $0x40] sm:$0x1e] %v4029_v55  ;;  %3872 = vmatpush.msra.mxu1 %v3644_v62  ;;  %v3640_v55 = vld [vmem:[#allocation4 + $0x3a8] sm:$0xff]  ;;  %v8993_v62 = vld [vmem:[#allocation42_spill] sm:$0xff] }
 0x3b6   : > { %v7664_v56 = vsel %vm3514_vm2, %v3460_v3, %v3509_v36  ;;  %8991 = vst [vmem:[#allocation41_spill] sm:$0xff] %v7670_v39  ;;  %v7673_v20 = vadd.f32 %v1002_v40, %v7540_v19  ;;  %v1014_v24 = vmul.f32 %v6480_v11, %v8990_v7  ;;  %3838 = vmatpush.msra.mxu2 %v3556_v43  ;;  %v8994_v7 = vld [vmem:[#allocation43_spill] sm:$0xff]  ;;  %v8995_v40 = vld [vmem:[#allocation44_spill] sm:$0xff]  ;;  %v3638_v43 = vld [vmem:[#allocation4 + $0x398] sm:$0xff] }
 0x3b7   : > { %3733 = vmatpush.msrb.mxu0 %v3613_v53  ;;  %v7678_v3 = vadd.f32 %v1007_v42, %v7546_v2  ;;  %v1019_v36 = vmul.f32 %v6478_v14, %v8993_v62  ;;  %v1020_v33 = vmul.f32 %v6480_v11, %v8993_v62  ;;  %3839 = vmatmul.f32.vlgmr.msra.gmra.mxu2 %v7420_v5  ;;  %v3458_v42 = vpop.permute.xlu2 %3457  ;;  %v8996_v5 = vld [vmem:[#allocation40_spill] sm:$0xff]  ;;  %v8997_v62 = vld [vmem:[#allocation46_spill] sm:$0xff] }
 0x3b8   : > { %8992 = vst [vmem:[#allocation10_spill] sm:$0xff] %v7673_v20  ;;  %3873 = vmatpush.msra.mxu1 %v3642_v4  ;;  %v7686_v19 = vadd.f32 %v1008_v34, %v7550_v30  ;;  %v1005_v41 = vmul.f32 %v6478_v14, %v8994_v7  ;;  %v1025_v2 = vmul.f32 %v6478_v14, %v8995_v40 }
 0x3b9   : > { %3734 = vmatpush.msrb.mxu0 %v3611_v16  ;;  %3770 = vmatmul.f32.vlgmr.msrb.gmra.mxu1 %v7664_v56  ;;  %v7694_v53 = vadd.f32 %v1013_v10, %v7554_v6  ;;  %v7698_v4 = vmul.f32 %v6478_v14, %v8996_v5  ;;  %v7702_v34 = vmul.f32 %v6480_v11, %v8996_v5  ;;  %v3636_v5 = vld [vmem:[#allocation4 + $0x388] sm:$0xff] }
 0x3ba   : > { %v1026_v30 = vmul.f32 %v6480_v11, %v8995_v40  ;;  %3874 = vmatpush.msra.mxu1 %v3640_v55  ;;  %v7707_v16 = vadd.f32 %v1014_v24, %v7558_v49  ;;  %v1031_v6 = vmul.f32 %v6478_v14, %v8997_v62  ;;  %v1032_v10 = vmul.f32 %v6480_v11, %v8997_v62  ;;  %v7724_v40 = vpop.permute.xlu1 %3502  ;;  %v3605_v62 = vld [vmem:[#allocation4 + $0x290] sm:$0xff] }
 0x3bb   : > { %3735 = vmatpush.msrb.mxu0 %v3609_v29  ;;  %v7716_v37 = vadd.f32 %v1019_v36, %v7562_v59  ;;  %v7719_v55 = vadd.f32 %v1020_v33, %v7568_v45  ;;  %v1018_v49 = vmul.f32 %v6480_v11, %v8998_v23  ;;  %v3461_v24 = vmul.f32 %v3458_v42, %v7336_v0  ;;  %v3511_v63 = vpop.permute.xlu0 %3510  ;;  %v9001_v36 = vld [vmem:[#allocation49_spill] sm:$0xff] }
 0x3bc   : > { %1457 = vperm.xlu2 %5699, %v5773_v15   ;;  %v3607_v15 = vld [vmem:[#allocation4 + $0x2a0] sm:$0xff]  ;;  %3875 = vmatpush.msra.mxu1 %v3638_v43  ;;  %v7728_v29 = vmul.f32 %v6480_v11, %v8994_v7  ;;  %v7731_v59 = vadd.f32 %v1005_v41, %v7580_v17  ;;  %v7734_v45 = vadd.f32 %v1025_v2, %v7572_v44  ;;  %v3634_v33 = vld [vmem:[#allocation4 + $0x378] sm:$0xff]  ;;  %v9002_v2 = vld [vmem:[#allocation51_spill] sm:$0xff] }
 0x3bd   : > { %v1023_v23 = vmul.f32 %v6478_v14, %v9001_v36  ;;  %3736 = vmatpush.msrb.mxu0 %v3607_v15  ;;  %v7739_v42 = vadd.f32 %v1026_v30, %v7576_v8  ;;  %v1024_v43 = vmul.f32 %v6480_v11, %v9001_v36  ;;  %v3603_v7 = vld [vmem:[#allocation4 + $0x280] sm:$0xff]  ;;  %v7750_v17 = vadd.f32 %v1031_v6, %v7599_v28  ;;  %v4054_v15 = vld [vmem:[#allocation3 + $0x28] sm:$0xf]  ;;  %v9003_v28 = vld [vmem:[#allocation53_spill] sm:$0xff] }
 0x3be   : > { %8999 = vst [vmem:[#allocation61_spill] sm:$0xff] %v7728_v29  ;;  %3876 = vmatpush.msra.mxu1 %v3636_v5  ;;  %v7744_v29 = vsel %vm3514_vm2, %v3461_v24, %v3511_v63  ;;  %v5774_v44 = vld [vmem:[%s8752_s1 + $0xa8] sm:$0xff]  ;;  %v7753_v41 = vadd.f32 %v1032_v10, %v7603_v9  ;;  %v7756_v8 = vadd.f32 %v1017_v26, %v7620_v46  ;;  %v3632_v63 = vld [vmem:[#allocation4 + $0x368] sm:$0xff]  ;;  %v3601_v26 = vld [vmem:[#allocation4 + $0x270] sm:$0xff] }
 0x3bf   : > { %9000 = vst [vmem:[#allocation11_spill] sm:$0xff] %v7731_v59  ;;  %v1029_v30 = vmul.f32 %v6478_v14, %v9002_v2  ;;  %3737 = vmatpush.msrb.mxu0 %v3605_v62  ;;  %v7761_v5 = vadd.f32 %v1018_v49, %v7624_v54  ;;  %v1030_v24 = vmul.f32 %v6480_v11, %v9002_v2  ;;  %v4056_v9 = vld [vmem:[#allocation3 + $0x40] sm:$0xf]  ;;  %v9004_v62 = vld [vmem:[#allocation59_spill] sm:$0xff]  ;;  %v3630_v49 = vld [vmem:[#allocation4 + $0x358] sm:$0xff] }
 0x3c0   : > { %v1035_v6 = vmul.f32 %v6478_v14, %v9003_v28  ;;  %3842 = vmatmul.f32.gmra.mxu2 %v7435_v31  ;;  %3877 = vmatpush.msra.mxu1 %v3634_v33  ;;  %v7769_v46 = vadd.f32 %v1023_v23, %v7628_v47  ;;  %v1036_v10 = vmul.f32 %v6480_v11, %v9003_v28  ;;  %v9005_v33 = vld [vmem:[#allocation63_spill] sm:$0xff]  ;;  %v4068_v23 = vrot.slane %v4054_v15, 4  ;;  %v9006_v28 = vld [vmem:[#allocation60_spill] sm:$0xff] }
 0x3c1   : > { %v1270_v54 = vmul.f32 %v6806_v38, %v9004_v62  ;;  %3738 = vmatpush.msrb.mxu0 %v3603_v7  ;;  %3773 = vmatmul.f32.gmra.mxu1 %v7744_v29  ;;  %v7777_v36 = vadd.f32 %v1024_v43, %v7636_v18  ;;  %v1271_v31 = vmul.f32 %v6808_v21, %v9004_v62  ;;  %v4069_v18 = vrot.slane %v4056_v9, 4  ;;  %v4079_v43 = vld [vmem:[#allocation3 + $0x28] sm:$0x1e]  ;;  %v3597_v9 = vld [vmem:[#allocation4 + $0x250] sm:$0xff] }
 0x3c2   : > { %v804_v47 = vmul.f32 %v6474_v32, %v9005_v33  ;;  %3878 = vmatpush.msra.mxu1 %v3632_v63  ;;  %v7784_v2 = vadd.f32 %v1029_v30, %v7640_v52  ;;  %v1276_v7 = vmul.f32 %v6806_v38, %v9006_v28  ;;  %v805_v11 = vmul.f32 %v6476_v12, %v9005_v33  ;;  %v9007_v30 = vld [vmem:[#allocation62_spill] sm:$0xff]  ;;  %v7800_v59 = vpop.permute.xlu1 %1409  ;;  %v4053_v12 = vld [vmem:[#allocation3 + $0x38] sm:$0xf] }
 0x3c3   : > { %3739 = vmatpush.msrb.mxu0 %v3601_v26  ;;  %v7791_v62 = vadd.f32 %v1030_v24, %v7649_v25  ;;  %v7794_v15 = vadd.f32 %v1035_v6, %v7653_v48  ;;  %v1277_v52 = vmul.f32 %v6808_v21, %v9006_v28  ;;  %v1282_v63 = vmul.f32 %v6806_v38, %v9007_v30  ;;  %v4081_v32 = vld [vmem:[#allocation3 + $0x40] sm:$0x1e]  ;;  %v7802_v33 = vpop.permute.xlu0 %3437  ;;  %v9009_v24 = vld [vmem:[#allocation69_spill] sm:$0xff]  ;;  %v4083_v28 = vld [vmem:[#allocation3 + $0x50] sm:$0x1e] }
 0x3c4   : > { %1469 = vperm.xlu2 %5699, %v5774_v44   ;;  %v3599_v44 = vld [vmem:[#allocation4 + $0x260] sm:$0xff]  ;;  %3879 = vmatpush.msra.mxu1 %v3630_v49  ;;  %v7805_v26 = vadd.f32 %v1036_v10, %v7659_v61  ;;  %v7808_v25 = vadd.f32 %v1270_v54, %v7678_v3  ;;  %v1283_v48 = vmul.f32 %v6808_v21, %v9007_v30  ;;  %v3626_v49 = vld [vmem:[#allocation4 + $0x338] sm:$0xff]  ;;  %v4055_v61 = vld [vmem:[#allocation3 + $0x48] sm:$0xf]  ;;  %v4093_v3 = vrot.slane %v4079_v43, 4 }
 0x3c5   : > { %v1288_v6 = vmul.f32 %v6806_v38, %v9009_v24  ;;  %3740 = vmatpush.msrb.mxu0 %v3599_v44  ;;  %v7815_v20 = vadd.f32 %v1271_v31, %v7686_v19  ;;  %v1067_v14 = vadd.f32 %v7698_v4, %v804_v47  ;;  %v4073_v10 = vsel %vm4071_vm3, %v4053_v12, %v4068_v23  ;;  %v3595_v54 = vld [vmem:[#allocation4 + $0x240] sm:$0xff]  ;;  %v4082_v12 = vld [vmem:[#allocation3 + $0x8] sm:$0x1e]  ;;  %v3622_v47 = vld [vmem:[#allocation4 + $0x318] sm:$0xff] }
 0x3c6   : > { %9008 = vst [vmem:[#allocation12_spill] sm:$0xff] %v7805_v26  ;;  %3880 = vmatpush.msra.mxu1 %v3628_v60  ;;  %v7820_v30 = vadd.f32 %v1276_v7, %v7694_v53  ;;  %v1068_v39 = vadd.f32 %v7702_v34, %v805_v11  ;;  %v4074_v26 = vsel %vm4071_vm3, %v4055_v61, %v4069_v18  ;;  %v4094_v44 = vrot.slane %v4081_v32, 4  ;;  %v3624_v31 = vld [vmem:[#allocation4 + $0x328] sm:$0xff]  ;;  %v3591_v43 = vld [vmem:[#allocation4 + $0x220] sm:$0xff]  ;;  %v3589_v61 = vld [vmem:[#allocation4 + $0x210] sm:$0xff] }
 0x3c7   : > { %3741 = vmatpush.msrb.mxu0 %v3597_v9  ;;  %v7826_v19 = vadd.f32 %v1277_v52, %v7707_v16  ;;  %v7829_v4 = vadd.f32 %v1282_v63, %v7716_v37  ;;  %v4095_v60 = vrot.slane %v4083_v28, 4  ;;  %v1529_v53 = vmul.f32 %v6851_v51, %v7800_v59  ;;  %v4078_v16 = vld [vmem:[#allocation3 + $0x38] sm:$0x1e]  ;;  %4420 = vst [vmem:[#allocation1 + $0x1] ss:$2 sm:$0xff] %v4073_v10  ;;  %v3593_v37 = vld [vmem:[#allocation4 + $0x230] sm:$0xff] }
 0x3c8   : > { %3881 = vmatpush.msra.mxu1 %v3626_v49  ;;  %v7834_v11 = vadd.f32 %v1283_v48, %v7719_v55  ;;  %v7838_v32 = vmul.f32 %v6808_v21, %v9009_v24  ;;  %v7841_v34 = vadd.f32 %v1288_v6, %v7734_v45  ;;  %v4080_v23 = vld [vmem:[#allocation3 + $0x48] sm:$0x1e]  ;;  %v4099_v7 = vsel %vm4071_vm3, %v4078_v16, %v4093_v3  ;;  %v9010_v52 = vld [vmem:[#allocation76_spill] sm:$0xff] }
 0x3c9   : > { %3742 = vmatpush.msrb.mxu0 %v3595_v54  ;;  %v4100_v18 = vsel %vm4071_vm3, %v4093_v3, %v4078_v16  ;;  %4422 = vst [vmem:[#allocation1 + $0x10] ss:$2 sm:$0xff] %v4074_v26  ;;  %v1330_v55 = vadd.f32 %v7591_v1, %v1067_v14  ;;  %v7848_v63 = vmul.f32 %v6806_v38, %v9010_v52  ;;  %v4134_v45 = vld [vmem:[#allocation3 + $0x50] sm:$0x3c]  ;;  %v3620_v6 = vld [vmem:[#allocation4 + $0x308] sm:$0xff]  ;;  %v5526_v54 = vrot.slane %v4099_v7, 9 }
 0x3ca   : > { %3882 = vmatpush.msra.mxu1 %v3624_v31  ;;  %v4102_v9 = vsel %vm4071_vm3, %v4080_v23, %v4094_v44  ;;  %v4103_v48 = vsel %vm4071_vm3, %v4094_v44, %v4080_v23  ;;  %v1331_v24 = vadd.f32 %v7595_v13, %v1068_v39  ;;  %v4105_v26 = vsel %vm4071_vm3, %v4082_v12, %v4095_v60  ;;  %v4132_v1 = vld [vmem:[#allocation3 + $0x40] sm:$0x3c]  ;;  %v1422_v49 = vpop.permute.xlu1 %1421  ;;  %v4133_v3 = vld [vmem:[#allocation3 + $0x8] sm:$0x3c]  ;;  %v3618_v23 = vld [vmem:[#allocation4 + $0x2f8] sm:$0xff] }
 0x3cb   : > { %3743 = vmatpush.msrb.mxu0 %v3593_v37  ;;  %v4106_v14 = vsel %vm4071_vm3, %v4095_v60, %v4082_v12  ;;  %v1593_v28 = vadd.f32 %v1529_v53, %v1330_v55  ;;  %v5527_v44 = vrot.slane %v4100_v18, 9  ;;  %v1530_v13 = vmul.f32 %v6853_v35, %v7800_v59  ;;  %v3587_v12 = vld [vmem:[#allocation4 + $0x200] sm:$0xff]  ;;  %v4077_v7 = vld [vmem:[#allocation3 + $0x30] sm:$0x1e] }
 0x3cc   : > { %5703 = vset.pattern.permute.xlu2 %v8918_v58  ;;  %3883 = vmatpush.msra.mxu1 %v3622_v47  ;;  %v1418_v10 = vpop.permute.xlu0 %1417  ;;  %v4146_v39 = vrot.slane %v4134_v45, 4  ;;  %v5528_v31 = vrot.slane %v4102_v9, 9  ;;  %v5529_v16 = vrot.slane %v4103_v48, 9  ;;  %v5530_v60 = vrot.slane %v4105_v26, 9 }
 0x3cd   : > { %3744 = vmatpush.msrb.mxu0 %v3591_v43  ;;  %1657 = vst [vmem:[%s6873_s29 + $0x60] sm:$0xff] %v1593_v28  ;;  %v5531_v53 = vrot.slane %v4106_v14, 9  ;;  %v4145_v37 = vrot.slane %v4132_v1, 4  ;;  %v1535_v47 = vmul.f32 %v6851_v51, %v1422_v49  ;;  %v9013_v43 = vld [vmem:[#allocation70_spill] sm:$0xff]  ;;  %v1536_v9 = vmul.f32 %v6853_v35, %v1422_v49 }
 0x3ce   : > { %3884 = vmatpush.msra.mxu1 %v3620_v6  ;;  %v4425_v18 = vld.sshfl [vmem:[#allocation1] sm:$0xff pattern:$0x75316420]  ;;  %v7866_v55 = vld.sshfl [vmem:[#allocation1 + $0x8] sm:$0xff pattern:$0x75316420]  ;;  %v1336_v45 = vadd.f32 %v7612_v50, %v9013_v43  ;;  %v1533_v48 = vmul.f32 %v6851_v51, %v1418_v10  ;;  %v7875_v6 = vmul.f32 %v6808_v21, %v9010_v52  ;;  %v4118_v26 = vsel %vm7862_vm7, %v5526_v54, %v5527_v44 }
 0x3cf   : > { %3885 = vmatmul.f32.vlgmr.msra.gmra.mxu1 %v7664_v56  ;;  %3745 = vmatpush.msrb.mxu0 %v3589_v61  ;;  %v1534_v56 = vmul.f32 %v6853_v35, %v1418_v10  ;;  %v1594_v28 = vadd.f32 %v1530_v13, %v1331_v24  ;;  %v9014_v61 = vld [vmem:[#allocation71_spill] sm:$0xff]  ;;  %v7882_v50 = vsel %vm4071_vm3, %v4133_v3, %v4146_v39  ;;  %v4076_v54 = vld [vmem:[#allocation3 + $0x58] sm:$0x1e] }
 0x3d0   : > { %v4427_v14 = vld.sshfl [vmem:[#allocation1 + $0x10] sm:$0xff pattern:$0x75316420]  ;;  %v4428_v1 = vld.sshfl [vmem:[#allocation1 + $0x18] sm:$0xff pattern:$0x75316420]  ;;  %v1337_v58 = vadd.f32 %v7616_v27, %v9014_v61  ;;  %v4122_v49 = vsel %vm7862_vm7, %v5528_v31, %v5529_v16  ;;  %v1599_v52 = vadd.f32 %v1535_v47, %v1336_v45  ;;  %v4126_v24 = vsel %vm7862_vm7, %v5530_v60, %v5531_v53 }
 0x3d1   : > { %3746 = vmatpush.msrb.mxu0 %v3587_v12  ;;  %4435 = vst [vmem:[#allocation1 + $0x1] ss:$2 sm:$0xff] %v4118_v26  ;;  %4603 = vmatpush.xpose.msrb.mxu2 %v4427_v14  ;;  %v3616_v10 = vld [vmem:[#allocation4 + $0x2e8] sm:$0xff]  ;;  %v4157_v44 = vsel %vm4071_vm3, %v4146_v39, %v4133_v3  ;;  %v4092_v12 = vrot.slane %v4077_v7, 4  ;;  %v1597_v47 = vadd.f32 %v1533_v48, %v7808_v25  ;;  %v3614_v39 = vld [vmem:[#allocation4 + $0x2d8] sm:$0xff] }
 0x3d2   : > { %5584 = vmatpush.xpose.msrb.mxu3 %v4427_v14  ;;  %v4131_v27 = vld [vmem:[#allocation3 + $0x48] sm:$0x3c]  ;;  %4437 = vst [vmem:[#allocation1 + $0x10] ss:$2 sm:$0xff] %v4122_v49  ;;  %v1600_v13 = vadd.f32 %v1536_v9, %v1337_v58  ;;  %v1598_v60 = vadd.f32 %v1534_v56, %v7815_v20  ;;  %v1430_v3 = vpop.permute.xlu1 %1429  ;;  %v5538_v58 = vrot.slane %v7882_v50, 10  ;;  %v5539_v9 = vrot.slane %v4157_v44, 10 }
 0x3d3   : > { %3846 = vmatpush.msra.mxu0 %v3618_v23  ;;  %v4130_v43 = vld [vmem:[#allocation3 + $0x28] sm:$0x3c]  ;;  %v7890_v31 = vsel %vm4071_vm3, %v4131_v27, %v4145_v37  ;;  %v7893_v16 = vsel %vm4071_vm3, %v4145_v37, %v4131_v27  ;;  %4439 = vst [vmem:[#allocation1 + $0x11] ss:$2 sm:$0xff] %v4126_v24  ;;  %v1539_v23 = vmul.f32 %v6851_v51, %v1430_v3  ;;  %v7902_v45 = vld [vmem:[#allocation3 + $0x30] sm:$0x3c] }
 0x3d4   : > { %v1438_v53 = vpop.permute.xlu0 %1437  ;;  %1658 = vst [vmem:[%s6873_s29 + $0x68] sm:$0xff] %v1594_v28  ;;  %v1540_v7 = vmul.f32 %v6853_v35, %v1430_v3  ;;  %v4096_v37 = vsel %vm4071_vm3, %v4076_v54, %v4092_v12  ;;  %v3612_v20 = vld [vmem:[#allocation4 + $0x2c8] sm:$0xff]  ;;  %v4097_v48 = vsel %vm4071_vm3, %v4092_v12, %v4076_v54  ;;  %v4144_v28 = vrot.slane %v4130_v43, 4  ;;  %v4553_v49 = vld [vmem:[%s8760_s9] sm:$0xff] }
 0x3d5   : > { %3847 = vmatpush.msra.mxu0 %v3616_v10  ;;  %1663 = vst [vmem:[%s6873_s29 + $0x90] sm:$0xff] %v1599_v52  ;;  %4604 = vmatpush.xpose.msrb.mxu2 %v4425_v18  ;;  %v4571_v25 = vld [vmem:[%s8760_s9 + $0x90] sm:$0xff]  ;;  %v5524_v56 = vrot.slane %v4096_v37, 9  ;;  %v1543_v26 = vmul.f32 %v6851_v51, %v1438_v53  ;;  %v5525_v50 = vrot.slane %v4097_v48, 9  ;;  %v5536_v52 = vrot.slane %v7890_v31, 10  ;;  %v3610_v54 = vld [vmem:[#allocation4 + $0x2b8] sm:$0xff] }
 0x3d6   : > { %5585 = vmatpush.xpose.msrb.mxu3 %v4425_v18  ;;  %1664 = vst [vmem:[%s6873_s29 + $0x98] sm:$0xff] %v1600_v13  ;;  %v1603_v18 = vadd.f32 %v1539_v23, %v7820_v30  ;;  %v1604_v61 = vadd.f32 %v1540_v7, %v7826_v19  ;;  %v5537_v10 = vrot.slane %v7893_v16, 10  ;;  %v4143_v30 = vrot.slane %v7902_v45, 4  ;;  %v9017_v13 = vld [vmem:[#allocation80_spill] sm:$0xff]  ;;  %v7962_v23 = vld [vmem:[#allocation3 + $0x18] sm:$0xf] }
 0x3d7   : > { %3848 = vmatpush.msra.mxu0 %v3614_v39  ;;  %1661 = vst [vmem:[%s6873_s29 + $0x80] sm:$0xff] %v1597_v47  ;;  %3888 = vmatmul.f32.gmra.mxu1 %v7744_v29  ;;  %v7930_v19 = vadd.f32 %v7838_v32, %v7739_v42  ;;  %v1344_v24 = vadd.f32 %v7848_v63, %v7756_v8  ;;  %v4127_v29 = vld [vmem:[#allocation3 + $0x58] sm:$0x3c]  ;;  %v3608_v8 = vld [vmem:[#allocation4 + $0x2a8] sm:$0xff]  ;;  %v7944_v63 = vld [vmem:[#allocation3 + $0x50] sm:$0xf] }
 0x3d8   : > { %1662 = vst [vmem:[%s6873_s29 + $0x88] sm:$0xff] %v1598_v60  ;;  %v4114_v44 = vsel %vm7862_vm7, %v5524_v56, %v5525_v50  ;;  %v1345_v27 = vadd.f32 %v7875_v6, %v7761_v5  ;;  %v1286_v12 = vmul.f32 %v6806_v38, %v9017_v13  ;;  %v4177_v42 = vsel %vm7912_vm9, %v5538_v58, %v5539_v9  ;;  %v4129_v32 = vld [vmem:[#allocation3 + $0x38] sm:$0x3c]  ;;  %v9018_v9 = vld [vmem:[#allocation84_spill] sm:$0xff]  ;;  %v3604_v56 = vld [vmem:[#allocation4 + $0x288] sm:$0xff] }
 0x3d9   : > { %3849 = vmatpush.msra.mxu0 %v3612_v20  ;;  %4608 = vmatmul.f32.vlgmr.msrb.gmra.mxu3 %v4571_v25  ;;  %1667 = vst [vmem:[%s6873_s29 + $0xb0] sm:$0xff] %v1603_v18  ;;  %v7947_v43 = vsel %vm4071_vm3, %v4129_v32, %v4144_v28  ;;  %v7950_v31 = vsel %vm4071_vm3, %v4144_v28, %v4129_v32  ;;  %v3606_v39 = vld [vmem:[#allocation4 + $0x298] sm:$0xff]  ;;  %v4196_v25 = vrot.slane %v7944_v63, 4  ;;  %v7977_v18 = vld [vmem:[#allocation3 + $0x50] sm:$0x1e]  ;;  %v3600_v63 = vld [vmem:[#allocation4 + $0x268] sm:$0xff] }
 0x3da   : > { %4626 = vmatpush.xpose.msra.mxu3 %v4428_v1  ;;  %v1544_v1 = vmul.f32 %v6853_v35, %v1438_v53  ;;  %4605 = vmatmul.f32.vlgmr.msrb.gmra.mxu2 %v4553_v49  ;;  %1668 = vst [vmem:[%s6873_s29 + $0xb8] sm:$0xff] %v1604_v61  ;;  %v7953_v5 = vld.sshfl [vmem:[#allocation1 + $0x10] sm:$0xff pattern:$0x75316420]  ;;  %v1607_v6 = vadd.f32 %v1543_v26, %v1344_v24  ;;  %v1442_v3 = vpop.permute.xlu1 %1441  ;;  %v4554_v26 = vld [vmem:[%s8760_s9 + $0x8] sm:$0xff]  ;;  %v5534_v61 = vrot.slane %v7947_v43, 10 }
 0x3db   : > { %3850 = vmatpush.msra.mxu0 %v3610_v54  ;;  %v4173_v16 = vsel %vm7912_vm9, %v5536_v52, %v5537_v10  ;;  %5586 = vmatpush.xpose.msrb.mxu1 %v7953_v5  ;;  %4433 = vst [vmem:[#allocation1] ss:$2 sm:$0xff] %v4114_v44  ;;  %v7959_v47 = vld.sshfl [vmem:[#allocation1 + $0x18] sm:$0xff pattern:$0x75316420]  ;;  %v4147_v53 = vsel %vm4071_vm3, %v4127_v29, %v4143_v30  ;;  %v5535_v50 = vrot.slane %v7950_v31, 10 }
 0x3dc   : > { %v1608_v60 = vadd.f32 %v1544_v1, %v1345_v27  ;;  %v1450_v58 = vpop.permute.xlu0 %1449  ;;  %4452 = vst [vmem:[#allocation1 + $0x10] ss:$2 sm:$0xff] %v4173_v16  ;;  %v1546_v7 = vmul.f32 %v6853_v35, %v1442_v3  ;;  %v4148_v37 = vsel %vm4071_vm3, %v4143_v30, %v4127_v29  ;;  %v1287_v45 = vmul.f32 %v6808_v21, %v9017_v13  ;;  %v9019_v24 = vld [vmem:[#allocation73_spill] sm:$0xff]  ;;  %v4184_v29 = vld [vmem:[#allocation3 + $0x10] sm:$0xf] }
 0x3dd   : > { %3851 = vmatpush.msra.mxu0 %v3608_v8  ;;  %v1292_v20 = vmul.f32 %v6806_v38, %v9018_v9  ;;  %v3440_v48 = vmul.f32 %v7645_v22, %v7334_v57  ;;  %4454 = vst [vmem:[#allocation1 + $0x11] ss:$2 sm:$0xff] %v4177_v42  ;;  %v4182_v57 = vld [vmem:[#allocation3 + $0x8] sm:$0xf]  ;;  %v3602_v22 = vld [vmem:[#allocation4 + $0x278] sm:$0xff]  ;;  %v5532_v10 = vrot.slane %v4147_v53, 10  ;;  %v1549_v1 = vmul.f32 %v6851_v51, %v1450_v58 }
 0x3de   : > { %4627 = vmatpush.xpose.msra.mxu3 %v7866_v55  ;;  %v1545_v55 = vmul.f32 %v6851_v51, %v1442_v3  ;;  %1671 = vst [vmem:[%s6873_s29 + $0xd0] sm:$0xff] %v1607_v6  ;;  %v1610_v52 = vadd.f32 %v1546_v7, %v7834_v11  ;;  %v5533_v54 = vrot.slane %v4148_v37, 10  ;;  %v7991_v44 = vmul.f32 %v6806_v38, %v9019_v24  ;;  %v4209_v27 = vld [vmem:[#allocation3 + $0x18] sm:$0x1e]  ;;  %v4206_v32 = vld [vmem:[#allocation3 + $0x8] sm:$0x1e] }
 0x3df   : > { %3852 = vmatpush.msra.mxu0 %v3606_v39  ;;  %1672 = vst [vmem:[%s6873_s29 + $0xd8] sm:$0xff] %v1608_v60  ;;  %v1350_v11 = vadd.f32 %v1286_v12, %v7769_v46  ;;  %v1351_v13 = vadd.f32 %v1287_v45, %v7777_v36  ;;  %v4197_v42 = vrot.slane %v7962_v23, 4  ;;  %v4220_v8 = vrot.slane %v7977_v18, 4  ;;  %v4208_v6 = vld [vmem:[#allocation3 + $0x10] sm:$0x1e]  ;;  %v3598_v23 = vld [vmem:[#allocation4 + $0x258] sm:$0xff] }
 0x3e0   : > { %v1609_v49 = vadd.f32 %v1545_v55, %v7829_v4  ;;  %v7995_v4 = vmul.f32 %v6808_v21, %v9019_v24  ;;  %1674 = vst [vmem:[%s6873_s29 + $0xe8] sm:$0xff] %v1610_v52  ;;  %v1550_v43 = vmul.f32 %v6853_v35, %v1450_v58  ;;  %v1293_v46 = vmul.f32 %v6808_v21, %v9018_v9  ;;  %v4573_v55 = vld [vmem:[%s8760_s9 + $0xa0] sm:$0xff]  ;;  %v4179_v18 = vld [vmem:[#allocation3 + $0x28] sm:$0xf] }
 0x3e1   : > { %3853 = vmatpush.msra.mxu0 %v3604_v56  ;;  %4628 = vmatmul.f32.vlgmr.msra.gmra.mxu3 %v4554_v26  ;;  %v1356_v12 = vadd.f32 %v1292_v20, %v7784_v2  ;;  %v4200_v31 = vsel %vm4071_vm3, %v4182_v57, %v4196_v25  ;;  %v4169_v36 = vsel %vm7912_vm9, %v5534_v61, %v5535_v50  ;;  %v4221_v3 = vrot.slane %v4209_v27, 4  ;;  %v4572_v50 = vld [vmem:[%s8760_s9 + $0x98] sm:$0xff]  ;;  %v8060_v27 = vld [vmem:[#allocation3 + $0x40] sm:$0x1e] }
 0x3e2   : > { %1673 = vst [vmem:[%s6873_s29 + $0xe0] sm:$0xff] %v1609_v49  ;;  %v8011_v16 = vld.sshfl [vmem:[#allocation1] sm:$0xff pattern:$0x75316420]  ;;  %v3441_v39 = vmul.f32 %v7802_v33, %v7336_v0  ;;  %v4165_v2 = vsel %vm7912_vm9, %v5532_v10, %v5533_v54  ;;  %v1613_v53 = vadd.f32 %v1549_v1, %v1350_v11  ;;  %v1454_v58 = vpop.permute.xlu1 %1453  ;;  %v4201_v20 = vsel %vm4071_vm3, %v4184_v29, %v4197_v42  ;;  %v8046_v57 = vld [vmem:[#allocation3 + $0x50] sm:$0x3c] }
 0x3e3   : > { %v4441_v60 = vld.sshfl [vmem:[#allocation1 + $0x8] sm:$0xff pattern:$0x75316420]  ;;  %3854 = vmatpush.msra.mxu0 %v3602_v22  ;;  %5587 = vmatpush.xpose.msrb.mxu1 %v8011_v16  ;;  %v1551_v0 = vmul.f32 %v6851_v51, %v1454_v58  ;;  %v1552_v33 = vmul.f32 %v6853_v35, %v1454_v58  ;;  %v1614_v25 = vadd.f32 %v1550_v43, %v1351_v13  ;;  %v3594_v22 = vld [vmem:[#allocation4 + $0x238] sm:$0xff]  ;;  %v8051_v1 = vld [vmem:[#allocation3 + $0x28] sm:$0x1e] }
 0x3e4   : > { %4450 = vst [vmem:[#allocation1 + $0x1] ss:$2 sm:$0xff] %v4169_v36  ;;  %v1462_v7 = vpop.permute.xlu0 %1461  ;;  %v4457_v37 = vld.sshfl [vmem:[#allocation1 + $0x10] sm:$0xff pattern:$0x75316420]  ;;  %v8038_v49 = vsel %vm4071_vm3, %v4220_v8, %v4206_v32  ;;  %v8041_v52 = vsel %vm4071_vm3, %v4208_v6, %v4221_v3  ;;  %v1358_v10 = vadd.f32 %v7991_v44, %v7750_v17  ;;  %v8056_v11 = vsel %vm3514_vm2, %v3441_v39, %v7724_v40  ;;  %v9021_v58 = vld [vmem:[#allocation57_spill] sm:$0xff] }
 0x3e5   : > { %v4458_v45 = vld.sshfl [vmem:[#allocation1 + $0x18] sm:$0xff pattern:$0x75316420]  ;;  %3855 = vmatpush.msra.mxu0 %v3600_v63  ;;  %v1555_v9 = vmul.f32 %v6851_v51, %v1462_v7  ;;  %4695 = vmatpush.xpose.msra.mxu2 %v4457_v37  ;;  %v1556_v56 = vmul.f32 %v6853_v35, %v1462_v7  ;;  %v1615_v61 = vadd.f32 %v1551_v0, %v7841_v34  ;;  %v4181_v54 = vld [vmem:[#allocation3 + $0x40] sm:$0xf]  ;;  %v3592_v17 = vld [vmem:[#allocation4 + $0x228] sm:$0xff] }
 0x3e6   : > { %v3501_v28 = vpop.permute.xlu2 %3500  ;;  %4718 = vmatpush.xpose.msrb.mxu3 %v4458_v45  ;;  %4467 = vst [vmem:[#allocation1 + $0x10] ss:$2 sm:$0xff] %v4200_v31  ;;  %4654 = vmatmul.f32.vlgmr.msrb.gmra.mxu1 %v4573_v55  ;;  %v1616_v34 = vadd.f32 %v1552_v33, %v7930_v19  ;;  %v1359_v29 = vadd.f32 %v7995_v4, %v7753_v41  ;;  %v4194_v19 = vrot.slane %v4179_v18, 4  ;;  %v5545_v42 = vrot.slane %v8038_v49, 9  ;;  %v9020_v41 = vld [vmem:[#allocation87_spill] sm:$0xff]  ;;  %v3590_v31 = vld [vmem:[#allocation4 + $0x218] sm:$0xff] }
 0x3e7   : > { %v7987_v30 = vsel %vm3514_vm2, %v3440_v48, %v3501_v28  ;;  %4672 = vmatpush.xpose.msra.mxu1 %v7959_v47  ;;  %v3596_v48 = vld [vmem:[#allocation4 + $0x248] sm:$0xff]  ;;  %v1357_v47 = vadd.f32 %v1293_v46, %v7791_v62  ;;  %v8031_v28 = vsel %vm4071_vm3, %v4206_v32, %v4220_v8  ;;  %4469 = vst [vmem:[#allocation1 + $0x11] ss:$2 sm:$0xff] %v4201_v20  ;;  %v5546_v40 = vrot.slane %v8041_v52, 9  ;;  %v4178_v43 = vld [vmem:[#allocation3 + $0x38] sm:$0xf] }
 0x3e8   : > { %3747 = vmatmul.f32.vlgmr.msrb.gmra.mxu0 %v7987_v30  ;;  %v8044_v62 = vsel %vm4071_vm3, %v4221_v3, %v4208_v6  ;;  %4448 = vst [vmem:[#allocation1] ss:$2 sm:$0xff] %v4165_v2  ;;  %v1619_v24 = vadd.f32 %v1555_v9, %v1356_v12  ;;  %v5544_v13 = vrot.slane %v8031_v28, 9  ;;  %v1298_v4 = vmul.f32 %v6806_v38, %v9020_v41  ;;  %v8075_v36 = vld [vmem:[#allocation3 + $0x18] sm:$0x3c]  ;;  %v3588_v33 = vld [vmem:[#allocation4 + $0x208] sm:$0xff] }
 0x3e9   : > { %3856 = vmatpush.msra.mxu0 %v3598_v23  ;;  %1677 = vst [vmem:[%s6873_s29 + $0x100] sm:$0xff] %v1613_v53  ;;  %4631 = vmatmul.f32.gmra.mxu3 %v4572_v50  ;;  %v1620_v44 = vadd.f32 %v1556_v56, %v1357_v47  ;;  %v5547_v32 = vrot.slane %v8044_v62, 9  ;;  %v1299_v8 = vmul.f32 %v6808_v21, %v9020_v41  ;;  %v4268_v63 = vrot.slane %v8046_v57, 4  ;;  %v4254_v7 = vld [vmem:[#allocation3 + $0x8] sm:$0x3c]  ;;  %v4556_v9 = vld [vmem:[%s8760_s9 + $0x18] sm:$0xff] }
 0x3ea   : > { %1678 = vst [vmem:[%s6873_s29 + $0x108] sm:$0xff] %v1614_v25  ;;  %v4195_v46 = vrot.slane %v4181_v54, 4  ;;  %v1466_v12 = vpop.permute.xlu1 %1465  ;;  %v4218_v3 = vrot.slane %v8051_v1, 4  ;;  %v4219_v39 = vrot.slane %v8060_v27, 4  ;;  %v1264_v23 = vmul.f32 %v6806_v38, %v9021_v58  ;;  %v4202_v45 = vld [vmem:[#allocation3 + $0x38] sm:$0x1e] }
 0x3eb   : > { %4673 = vmatpush.xpose.msra.mxu1 %v4441_v60  ;;  %3857 = vmatpush.msra.mxu0 %v3596_v48  ;;  %1679 = vst [vmem:[%s6873_s29 + $0x110] sm:$0xff] %v1615_v61  ;;  %v4180_v60 = vld [vmem:[#allocation3 + $0x48] sm:$0xf]  ;;  %v1557_v2 = vmul.f32 %v6851_v51, %v1466_v12  ;;  %v1558_v53 = vmul.f32 %v6853_v35, %v1466_v12  ;;  %v9022_v50 = vld [vmem:[#allocation12_spill] sm:$0xff]  ;;  %v4558_v54 = vld [vmem:[%s8760_s9 + $0x28] sm:$0xff] }
 0x3ec   : > { %1680 = vst [vmem:[%s6873_s29 + $0x118] sm:$0xff] %v1616_v34  ;;  %v1474_v6 = vpop.permute.xlu0 %1473  ;;  %v8086_v55 = vmul.f32 %v6808_v21, %v9021_v58  ;;  %v4198_v37 = vsel %vm4071_vm3, %v4178_v43, %v4194_v19  ;;  %v1362_v61 = vadd.f32 %v1298_v4, %v7794_v15  ;;  %v1363_v49 = vadd.f32 %v1299_v8, %v9022_v50  ;;  %v4251_v41 = vld [vmem:[#allocation3 + $0x28] sm:$0x3c]  ;;  %v9024_v62 = vld [vmem:[#allocation68_spill] sm:$0xff] }
 0x3ed   : > { %3858 = vmatpush.msra.mxu0 %v3594_v22  ;;  %1683 = vst [vmem:[%s6873_s29 + $0x130] sm:$0xff] %v1619_v24  ;;  %v1561_v20 = vmul.f32 %v6851_v51, %v1474_v6  ;;  %v1621_v56 = vadd.f32 %v1557_v2, %v1358_v10  ;;  %v1622_v47 = vadd.f32 %v1558_v53, %v1359_v29  ;;  %v4204_v22 = vld [vmem:[#allocation3 + $0x48] sm:$0x1e]  ;;  %v4557_v10 = vld [vmem:[%s8760_s9 + $0x20] sm:$0xff]  ;;  %v4269_v19 = vrot.slane %v8075_v36, 4 }
 0x3ee   : > { %v8027_v26 = vpop.permute.xlu2 %1405  ;;  %v4473_v0 = vld.sshfl [vmem:[#allocation1 + $0x18] sm:$0xff pattern:$0x75316420]  ;;  %1684 = vst [vmem:[%s6873_s29 + $0x138] sm:$0xff] %v1620_v44  ;;  %v1562_v28 = vmul.f32 %v6853_v35, %v1474_v6  ;;  %v4199_v34 = vsel %vm4071_vm3, %v4180_v60, %v4195_v46  ;;  %v4245_v15 = vsel %vm7862_vm7, %v5544_v13, %v5545_v42  ;;  %v4222_v1 = vsel %vm4071_vm3, %v4202_v45, %v4218_v3  ;;  %v9023_v6 = vld [vmem:[#allocation41_spill] sm:$0xff]  ;;  %v4575_v2 = vld [vmem:[%s8760_s9 + $0xb0] sm:$0xff] }
 0x3ef   : > { %3859 = vmatpush.msra.mxu0 %v3592_v17  ;;  %v4455_v25 = vld.sshfl [vmem:[#allocation1] sm:$0xff pattern:$0x75316420]  ;;  %v4456_v48 = vld.sshfl [vmem:[#allocation1 + $0x8] sm:$0xff pattern:$0x75316420]  ;;  %4764 = vmatpush.xpose.msrb.mxu1 %v4473_v0  ;;  %v4223_v24 = vsel %vm4071_vm3, %v4218_v3, %v4202_v45  ;;  %v4225_v27 = vsel %vm4071_vm3, %v4204_v22, %v4219_v39  ;;  %v4226_v17 = vsel %vm4071_vm3, %v4219_v39, %v4204_v22 }
 0x3f0   : > { %3750 = vmatmul.f32.gmra.mxu0 %v8056_v11  ;;  %4696 = vmatpush.xpose.msra.mxu2 %v4455_v25  ;;  %4463 = vst [vmem:[#allocation1] ss:$2 sm:$0xff] %v4198_v37  ;;  %v4472_v29 = vld.sshfl [vmem:[#allocation1 + $0x10] sm:$0xff pattern:$0x75316420]  ;;  %v1625_v44 = vadd.f32 %v1561_v20, %v1362_v61  ;;  %v8118_v42 = vsel %vm4071_vm3, %v4254_v7, %v4268_v63  ;;  %v5540_v46 = vrot.slane %v4222_v1, 9 }
 0x3f1   : > { %3860 = vmatpush.msra.mxu0 %v3590_v31  ;;  %4719 = vmatpush.xpose.msrb.mxu3 %v4456_v48  ;;  %4465 = vst [vmem:[#allocation1 + $0x1] ss:$2 sm:$0xff] %v4199_v34  ;;  %v4256_v13 = vld [vmem:[#allocation3 + $0x10] sm:$0x3c]  ;;  %v1626_v4 = vadd.f32 %v1562_v28, %v1363_v49  ;;  %v1527_v8 = vmul.f32 %v6851_v51, %v8027_v26  ;;  %v5541_v12 = vrot.slane %v4223_v24, 9  ;;  %v5542_v60 = vrot.slane %v4225_v27, 9 }
 0x3f2   : > { %4674 = vmatmul.f32.vlgmr.msra.gmra.mxu1 %v4556_v9  ;;  %1685 = vst [vmem:[%s6873_s29 + $0x140] sm:$0xff] %v1621_v56  ;;  %v4277_v43 = vsel %vm4071_vm3, %v4268_v63, %v4254_v7  ;;  %v4253_v31 = vld [vmem:[#allocation3 + $0x40] sm:$0x3c]  ;;  %v1328_v36 = vadd.f32 %v1264_v23, %v9023_v6  ;;  %v1268_v52 = vmul.f32 %v6806_v38, %v9024_v62  ;;  %v5543_v3 = vrot.slane %v4226_v17, 9  ;;  %v4576_v23 = vld [vmem:[%s8760_s9 + $0xb8] sm:$0xff]  ;;  %v9028_v50 = vld [vmem:[#allocation11_spill] sm:$0xff] }
 0x3f3   : > { %3861 = vmatpush.msra.mxu0 %v3588_v33  ;;  %1686 = vst [vmem:[%s6873_s29 + $0x148] sm:$0xff] %v1622_v47  ;;  %4697 = vmatmul.f32.vlgmr.msra.gmra.mxu2 %v4557_v10  ;;  %v4279_v57 = vsel %vm4071_vm3, %v4256_v13, %v4269_v19  ;;  %v4266_v63 = vrot.slane %v4251_v41, 4  ;;  %v5553_v39 = vrot.slane %v4277_v43, 10  ;;  %v1528_v53 = vmul.f32 %v6853_v35, %v8027_v26  ;;  %v4574_v7 = vld [vmem:[%s8760_s9 + $0xa8] sm:$0xff]  ;;  %v4250_v61 = vld [vmem:[#allocation3 + $0x38] sm:$0x3c] }
 0x3f4   : > { %4720 = vmatmul.f32.vlgmr.msrb.gmra.mxu3 %v4558_v54  ;;  %4482 = vst [vmem:[#allocation1 + $0x10] ss:$2 sm:$0xff] %v4245_v15  ;;  %v1591_v58 = vadd.f32 %v1527_v8, %v1328_v36  ;;  %v9026_v37 = vld [vmem:[#allocation66_spill] sm:$0xff]  ;;  %v4237_v9 = vsel %vm7862_vm7, %v5540_v46, %v5541_v12  ;;  %v1269_v48 = vmul.f32 %v6808_v21, %v9024_v62  ;;  %v5554_v56 = vrot.slane %v4279_v57, 10  ;;  %v4252_v34 = vld [vmem:[#allocation3 + $0x48] sm:$0x3c] }
 0x3f5   : > { %4649 = vmatpush.xpose.msrb.mxu0 %v7953_v5  ;;  %v4249_v5 = vsel %vm7862_vm7, %v5546_v40, %v5547_v32  ;;  %v4280_v40 = vsel %vm4071_vm3, %v4269_v19, %v4256_v13  ;;  %v5552_v32 = vrot.slane %v8118_v42, 10  ;;  %1689 = vst [vmem:[%s6873_s29 + $0x160] sm:$0xff] %v1625_v44  ;;  %v9027_v0 = vld [vmem:[#allocation10_spill] sm:$0xff]  ;;  %v4241_v28 = vsel %vm7862_vm7, %v5542_v60, %v5543_v3  ;;  %v8168_v54 = vld [vmem:[#allocation3 + $0x18] sm:$0xf]  ;;  %v9029_v19 = vld [vmem:[#allocation15_spill] sm:$0xff] }
 0x3f6   : > { %v8095_v18 = vpop.permute.xlu2 %1413  ;;  %4484 = vst [vmem:[#allocation1 + $0x11] ss:$2 sm:$0xff] %v4249_v5  ;;  %v1329_v33 = vadd.f32 %v8086_v55, %v9027_v0  ;;  %v5555_v47 = vrot.slane %v4280_v40, 10  ;;  %v1332_v49 = vadd.f32 %v1268_v52, %v9028_v50  ;;  %v4270_v22 = vsel %vm4071_vm3, %v4250_v61, %v4266_v63  ;;  %v8170_v15 = vld [vmem:[#allocation3 + $0x18] sm:$0x1e]  ;;  %v9031_v8 = vld [vmem:[#allocation67_spill] sm:$0xff] }
 0x3f7   : > { %1690 = vst [vmem:[%s6873_s29 + $0x168] sm:$0xff] %v1626_v4  ;;  %v1531_v25 = vmul.f32 %v6851_v51, %v8095_v18  ;;  %v4271_v10 = vsel %vm4071_vm3, %v4266_v63, %v4250_v61  ;;  %v9030_v27 = vld [vmem:[#allocation61_spill] sm:$0xff]  ;;  %v4293_v44 = vsel %vm7912_vm9, %v5552_v32, %v5553_v39  ;;  %v1532_v41 = vmul.f32 %v6853_v35, %v8095_v18  ;;  %v9032_v36 = vld [vmem:[#allocation72_spill] sm:$0xff]  ;;  %v8187_v18 = vld [vmem:[#allocation3 + $0x20] sm:$0x3c] }
 0x3f8   : > { %3862 = vmatmul.f32.vlgmr.msra.gmra.mxu0 %v7987_v30  ;;  %v4267_v30 = vrot.slane %v4253_v31, 4  ;;  %v4471_v26 = vld.sshfl [vmem:[#allocation1 + $0x8] sm:$0xff pattern:$0x75316420]  ;;  %1655 = vst [vmem:[%s6873_s29 + $0x50] sm:$0xff] %v1591_v58  ;;  %v1070_v17 = vadd.f32 %v9030_v27, %v9029_v19  ;;  %v4297_v43 = vsel %vm7912_vm9, %v5554_v56, %v5555_v47  ;;  %v5548_v46 = vrot.slane %v4270_v22, 10 }
 0x3f9   : > { %4650 = vmatpush.xpose.msrb.mxu0 %v8011_v16  ;;  %v9025_v16 = vld [vmem:[#allocation45_spill] sm:$0xff]  ;;  %4765 = vmatpush.xpose.msrb.mxu1 %v4471_v26  ;;  %v1595_v4 = vadd.f32 %v1531_v25, %v1332_v49  ;;  %v5549_v12 = vrot.slane %v4271_v10, 10  ;;  %v4305_v31 = vld [vmem:[#allocation3 + $0x20] sm:$0xf]  ;;  %v1274_v62 = vmul.f32 %v6806_v38, %v9032_v36  ;;  %v9033_v3 = vld [vmem:[#allocation20_spill] sm:$0xff]  ;;  %v1275_v39 = vmul.f32 %v6808_v21, %v9032_v36 }
 0x3fa   : > { %v1011_v45 = vmul.f32 %v9026_v37, %v9025_v16  ;;  %v4470_v20 = vld.sshfl [vmem:[#allocation1] sm:$0xff pattern:$0x75316420]  ;;  %4677 = vmatmul.f32.gmra.mxu1 %v4574_v7  ;;  %v4273_v1 = vsel %vm4071_vm3, %v4252_v34, %v4267_v30  ;;  %v4274_v24 = vsel %vm4071_vm3, %v4267_v30, %v4252_v34  ;;  %v1012_v5 = vmul.f32 %v9031_v8, %v9025_v16  ;;  %v9035_v32 = vld [vmem:[#allocation55_spill] sm:$0xff]  ;;  %v4302_v30 = vld [vmem:[#allocation3 + $0x10] sm:$0xf] }
 0x3fb   : > { %4478 = vst [vmem:[#allocation1] ss:$2 sm:$0xff] %v4237_v9  ;;  %4700 = vmatmul.f32.gmra.mxu2 %v4575_v2  ;;  %v1333_v6 = vadd.f32 %v1269_v48, %v1070_v17  ;;  %v5550_v52 = vrot.slane %v4273_v1, 10  ;;  %v5551_v60 = vrot.slane %v4274_v24, 10  ;;  %v9034_v57 = vld [vmem:[#allocation65_spill] sm:$0xff]  ;;  %v4316_v2 = vrot.slane %v8168_v54, 4 }
 0x3fc   : > { %4480 = vst [vmem:[#allocation1 + $0x1] ss:$2 sm:$0xff] %v4241_v28  ;;  %4723 = vmatmul.f32.gmra.mxu3 %v4576_v23  ;;  %v813_v40 = vmul.f32 %v9034_v57, %v9033_v3  ;;  %v1075_v63 = vadd.f32 %v1011_v45, %v9035_v32  ;;  %v4329_v58 = vld [vmem:[#allocation3 + $0x20] sm:$0x1e]  ;;  %v4340_v23 = vrot.slane %v8170_v15, 4  ;;  %v4317_v16 = vrot.slane %v4305_v31, 4 }
 0x3fd   : > { %4741 = vmatpush.xpose.msra.mxu0 %v4472_v29  ;;  %v1592_v29 = vadd.f32 %v1528_v53, %v1329_v33  ;;  %v4487_v13 = vld.sshfl [vmem:[#allocation1 + $0x10] sm:$0xff pattern:$0x75316420]  ;;  %v4488_v42 = vld.sshfl [vmem:[#allocation1 + $0x18] sm:$0xff pattern:$0x75316420]  ;;  %v1596_v0 = vadd.f32 %v1532_v41, %v1333_v6  ;;  %v4285_v26 = vsel %vm7912_vm9, %v5548_v46, %v5549_v12  ;;  %v4289_v61 = vsel %vm7912_vm9, %v5550_v52, %v5551_v60 }
 0x3fe   : > { %v1426_v55 = vpop.permute.xlu2 %1425  ;;  %4787 = vmatpush.xpose.msrb.mxu2 %v4487_v13  ;;  %4810 = vmatpush.xpose.msra.mxu3 %v4488_v42  ;;  %4497 = vst [vmem:[#allocation1 + $0x10] ss:$2 sm:$0xff] %v4293_v44  ;;  %v4326_v53 = vld [vmem:[#allocation3 + $0x10] sm:$0x1e]  ;;  %v4304_v7 = vld [vmem:[#allocation3] sm:$0xf]  ;;  %v1076_v33 = vadd.f32 %v1012_v5, %v813_v40  ;;  %v1338_v28 = vadd.f32 %v1274_v62, %v1075_v63 }
 0x3ff   : > { %4499 = vst [vmem:[#allocation1 + $0x11] ss:$2 sm:$0xff] %v4297_v43  ;;  %v1537_v45 = vmul.f32 %v6851_v51, %v1426_v55  ;;  %v8203_v9 = vld [vmem:[#allocation3 + $0x50] sm:$0xf]  ;;  %v1538_v56 = vmul.f32 %v6853_v35, %v1426_v55  ;;  %v4341_v50 = vrot.slane %v4329_v58, 4  ;;  %v4561_v49 = vld [vmem:[%s8760_s9 + $0x40] sm:$0xff]  ;;  %v8230_v27 = vsel %vm4071_vm3, %v4326_v53, %v4340_v23 }
 0x400   : > { %3865 = vmatmul.f32.gmra.mxu0 %v8056_v11  ;;  %1656 = vst [vmem:[%s6873_s29 + $0x58] sm:$0xff] %v1592_v29  ;;  %v4560_v11 = vld [vmem:[%s8760_s9 + $0x38] sm:$0xff]  ;;  %v4562_v34 = vld [vmem:[%s8760_s9 + $0x48] sm:$0xff]  ;;  %v1339_v54 = vadd.f32 %v1275_v39, %v1076_v33  ;;  %v4389_v15 = vrot.slane %v8187_v18, 4  ;;  %v4555_v24 = vld [vmem:[%s8760_s9 + $0x10] sm:$0xff]  ;;  %v4320_v29 = vsel %vm4071_vm3, %v4302_v30, %v4316_v2  ;;  %v4321_v44 = vsel %vm4071_vm3, %v4304_v7, %v4317_v16 }
 0x401   : > { %4742 = vmatpush.xpose.msra.mxu0 %v4470_v20  ;;  %1659 = vst [vmem:[%s6873_s29 + $0x70] sm:$0xff] %v1595_v4  ;;  %v8207_v20 = vld [vmem:[#allocation3 + $0x40] sm:$0xf]  ;;  %v9036_v22 = vld [vmem:[#allocation24_spill] sm:$0xff]  ;;  %v1601_v13 = vadd.f32 %v1537_v45, %v1338_v28  ;;  %v8237_v42 = vsel %vm4071_vm3, %v4340_v23, %v4326_v53  ;;  %v4300_v12 = vld [vmem:[#allocation3 + $0x8] sm:$0xf] }
 0x402   : > { %v1278_v55 = vmul.f32 %v6806_v38, %v9036_v22  ;;  %v1279_v10 = vmul.f32 %v6808_v21, %v9036_v22  ;;  %4766 = vmatmul.f32.vlgmr.msrb.gmra.mxu1 %v4560_v11  ;;  %v4328_v1 = vld [vmem:[#allocation3] sm:$0x1e]  ;;  %v8227_v19 = vld [vmem:[#allocation3 + $0x50] sm:$0x1e]  ;;  %1660 = vst [vmem:[%s6873_s29 + $0x78] sm:$0xff] %v1596_v0  ;;  %v1602_v5 = vadd.f32 %v1538_v56, %v1339_v54  ;;  %v4315_v31 = vrot.slane %v8203_v9, 4 }
 0x403   : > { %v4485_v25 = vld.sshfl [vmem:[#allocation1] sm:$0xff pattern:$0x75316420]  ;;  %v4486_v48 = vld.sshfl [vmem:[#allocation1 + $0x8] sm:$0xff pattern:$0x75316420]  ;;  %v4351_v36 = vsel %vm4071_vm3, %v4328_v1, %v4341_v50  ;;  %v4352_v62 = vsel %vm4071_vm3, %v4341_v50, %v4328_v1 }
 0x404   : > { %4788 = vmatpush.xpose.msrb.mxu2 %v4485_v25  ;;  %4811 = vmatpush.xpose.msra.mxu3 %v4486_v48  ;;  %4493 = vst [vmem:[#allocation1] ss:$2 sm:$0xff] %v4285_v26  ;;  %v8232_v17 = vld [vmem:[#allocation3 + $0x40] sm:$0x1e]  ;;  %v4314_v6 = vrot.slane %v8207_v20, 4  ;;  %v9037_v52 = vld [vmem:[#allocation27_spill] sm:$0xff]  ;;  %v4319_v54 = vsel %vm4071_vm3, %v4300_v12, %v4315_v31 }
 0x405   : > { %4495 = vst [vmem:[#allocation1 + $0x1] ss:$2 sm:$0xff] %v4289_v61  ;;  %v8240_v46 = vld [vmem:[#allocation3] sm:$0x3c]  ;;  %v1284_v60 = vmul.f32 %v6806_v38, %v9037_v52  ;;  %v8250_v3 = vmul.f32 %v6808_v21, %v9037_v52  ;;  %v4324_v40 = vld [vmem:[#allocation3 + $0x8] sm:$0x1e] }
 0x406   : > { %v1434_v47 = vpop.permute.xlu2 %1433  ;;  %v4502_v41 = vld.sshfl [vmem:[#allocation1 + $0x10] sm:$0xff pattern:$0x75316420]  ;;  %v4503_v4 = vld.sshfl [vmem:[#allocation1 + $0x18] sm:$0xff pattern:$0x75316420] }
 0x407   : > { %4789 = vmatmul.f32.vlgmr.msrb.gmra.mxu2 %v4561_v49  ;;  %4812 = vmatmul.f32.vlgmr.msra.gmra.mxu3 %v4562_v34  ;;  %v1541_v43 = vmul.f32 %v6851_v51, %v1434_v47  ;;  %4512 = vst [vmem:[#allocation1 + $0x10] ss:$2 sm:$0xff] %v4320_v29  ;;  %v4339_v32 = vrot.slane %v8227_v19, 4  ;;  %v4375_v63 = vld [vmem:[#allocation3 + $0x18] sm:$0x3c]  ;;  %v9038_v39 = vld [vmem:[#allocation74_spill] sm:$0xff]  ;;  %v1542_v33 = vmul.f32 %v6853_v35, %v1434_v47 }
 0x408   : > { %4856 = vmatpush.xpose.msra.mxu1 %v4503_v4  ;;  %4651 = vmatmul.f32.vlgmr.msrb.gmra.mxu0 %v4555_v24  ;;  %4514 = vst [vmem:[#allocation1 + $0x11] ss:$2 sm:$0xff] %v4321_v44  ;;  %v1342_v30 = vadd.f32 %v1278_v55, %v9038_v39  ;;  %v8257_v2 = vld [vmem:[%s8762_s11] sm:$0xff]  ;;  %v9039_v53 = vld [vmem:[#allocation30_spill] sm:$0xff]  ;;  %v5560_v23 = vrot.slane %v8230_v27, 9  ;;  %v5561_v7 = vrot.slane %v8237_v42, 9  ;;  %v8289_v55 = vsel %vm4071_vm3, %v8240_v46, %v4389_v15  ;;  %v8396_v14 = vpop.f32.mrf.mxu3 }
 0x409   : > { %4833 = vmatpush.xpose.msrb.mxu0 %v4502_v41  ;;  %v8261_v58 = vmul.f32 %v6806_v38, %v9039_v53  ;;  %v4298_v16 = vld [vmem:[#allocation3 + $0x48] sm:$0xf]  ;;  %v4338_v0 = vrot.slane %v8232_v17, 4  ;;  %1665 = vst [vmem:[%s6873_s29 + $0xa0] sm:$0xff] %v1601_v13  ;;  %5038 = vperm.xlu0 %5701, %v8257_v2   ;;  %v5562_v11 = vrot.slane %v4351_v36, 9  ;;  %v5563_v45 = vrot.slane %v4352_v62, 9 }
 0x40a   : > { %5018 = vperm.xlu1 %5702, %v8257_v2   ;;  %1666 = vst [vmem:[%s6873_s29 + $0xa8] sm:$0xff] %v1602_v5  ;;  %v1605_v9 = vadd.f32 %v1541_v43, %v1342_v30  ;;  %v4579_v20 = vld [vmem:[%s8760_s9 + $0xd0] sm:$0xff]  ;;  %v4580_v25 = vld [vmem:[%s8760_s9 + $0xd8] sm:$0xff]  ;;  %v4578_v48 = vld [vmem:[%s8760_s9 + $0xc8] sm:$0xff]  ;;  %5028 = vperm.xlu2 %5703, %v8257_v2   ;;  %v4318_v56 = vsel %vm4071_vm3, %v4298_v16, %v4314_v6  ;;  %v4388_v1 = vrot.slane %v4375_v63, 4  ;;  %v5570_v18 = vrot.slane %v8289_v55, 10 }
 0x40b   : > { %v9040_v61 = vld [vmem:[#allocation75_spill] sm:$0xff]  ;;  %v9041_v49 = vld [vmem:[#allocation78_spill] sm:$0xff]  ;;  %v4345_v29 = vsel %vm4071_vm3, %v4324_v40, %v4339_v32  ;;  %v4374_v19 = vld [vmem:[#allocation3 + $0x10] sm:$0x3c]  ;;  %4769 = vmatmul.f32.gmra.mxu1 %v4578_v48  ;;  %v4346_v44 = vsel %vm4071_vm3, %v4339_v32, %v4324_v40  ;;  %v4369_v41 = vsel %vm7862_vm7, %v5562_v11, %v5563_v45  ;;  %v4400_v5 = vsel %vm4071_vm3, %v4389_v15, %v8240_v46 }
 0x40c   : > { %v4500_v28 = vld.sshfl [vmem:[#allocation1] sm:$0xff pattern:$0x75316420]  ;;  %v4501_v47 = vld.sshfl [vmem:[#allocation1 + $0x8] sm:$0xff pattern:$0x75316420]  ;;  %v1343_v50 = vadd.f32 %v1279_v10, %v9040_v61  ;;  %v1348_v34 = vadd.f32 %v1284_v60, %v9041_v49  ;;  %v4365_v43 = vsel %vm7862_vm7, %v5560_v23, %v5561_v7  ;;  %v4396_v62 = vsel %vm4071_vm3, %v4374_v19, %v4388_v1 }
 0x40d   : > { %v4322_v24 = vld [vmem:[#allocation3 + $0x48] sm:$0x1e]  ;;  %4857 = vmatpush.xpose.msra.mxu1 %v4501_v47  ;;  %4508 = vst [vmem:[#allocation1] ss:$2 sm:$0xff] %v4318_v56  ;;  %4834 = vmatpush.xpose.msrb.mxu0 %v4500_v28  ;;  %v8299_v13 = vld [vmem:[#allocation3 + $0x50] sm:$0x3c]  ;;  %v4397_v52 = vsel %vm4071_vm3, %v4388_v1, %v4374_v19  ;;  %v1291_v23 = vmul.f32 %v6808_v21, %v9039_v53 }
 0x40e   : > { %v1446_v26 = vpop.permute.xlu2 %1445  ;;  %v4559_v10 = vld [vmem:[%s8760_s9 + $0x30] sm:$0xff]  ;;  %v4342_v27 = vsel %vm4071_vm3, %v4322_v24, %v4338_v0  ;;  %v4343_v17 = vsel %vm4071_vm3, %v4338_v0, %v4322_v24  ;;  %4510 = vst [vmem:[#allocation1 + $0x1] ss:$2 sm:$0xff] %v4319_v54  ;;  %v4371_v42 = vld [vmem:[#allocation3 + $0x40] sm:$0x3c]  ;;  %v1606_v4 = vadd.f32 %v1542_v33, %v1343_v50  ;;  %v5558_v15 = vrot.slane %v4345_v29, 9 }
 0x40f   : > { %v1547_v22 = vmul.f32 %v6851_v51, %v1446_v26  ;;  %1669 = vst [vmem:[%s6873_s29 + $0xc0] sm:$0xff] %v1605_v9  ;;  %4792 = vmatmul.f32.gmra.mxu2 %v4579_v20  ;;  %4815 = vmatmul.f32.gmra.mxu3 %v4580_v25  ;;  %v4517_v12 = vld.sshfl [vmem:[#allocation1 + $0x10] sm:$0xff pattern:$0x75316420]  ;;  %v1548_v6 = vmul.f32 %v6853_v35, %v1446_v26  ;;  %v5556_v60 = vrot.slane %v4342_v27, 9  ;;  %v5557_v40 = vrot.slane %v4343_v17, 9 }
 0x410   : > { %v4518_v31 = vld.sshfl [vmem:[#allocation1 + $0x18] sm:$0xff pattern:$0x75316420]  ;;  %4743 = vmatmul.f32.vlgmr.msra.gmra.mxu0 %v4559_v10  ;;  %4879 = vmatpush.xpose.msra.mxu2 %v4517_v12  ;;  %v5559_v46 = vrot.slane %v4346_v44, 9  ;;  %v9042_v32 = vld [vmem:[#allocation79_spill] sm:$0xff]  ;;  %v9043_v39 = vmov 4  }
 0x411   : > { %v1611_v36 = vadd.f32 %v1547_v22, %v1348_v34  ;;  %4902 = vmatpush.xpose.msrb.mxu3 %v4518_v31  ;;  %4527 = vst [vmem:[#allocation1 + $0x10] ss:$2 sm:$0xff] %v4365_v43  ;;  %v1349_v63 = vadd.f32 %v8250_v3, %v9042_v32  ;;  %v9044_v30 = vmov 6   ;;  %v5571_v7 = vrot.slane %v4400_v5, 10  ;;  %v4372_v16 = vld [vmem:[#allocation3 + $0x8] sm:$0x3c] }
 0x412   : > { %4529 = vst [vmem:[#allocation1 + $0x11] ss:$2 sm:$0xff] %v4369_v41  ;;  %5704 = vset.pattern.permute.xlu1 %v9043_v39  ;;  %5706 = vset.pattern.permute.xlu0 %v9044_v30  ;;  %v4387_v0 = vrot.slane %v8299_v13, 4  ;;  %v4386_v11 = vrot.slane %v4371_v42, 4  ;;  %v9045_v33 = vmov 5   ;;  %v5568_v9 = vrot.slane %v4396_v62, 10 }
 0x413   : > { %1670 = vst [vmem:[%s6873_s29 + $0xc8] sm:$0xff] %v1606_v4  ;;  %5048 = vperm.xlu1 %5704, %v8257_v2   ;;  %5705 = vset.pattern.permute.xlu2 %v9045_v33  ;;  %v5569_v3 = vrot.slane %v4397_v52, 10  ;;  %v1612_v26 = vadd.f32 %v1548_v6, %v1349_v63  ;;  %v4577_v53 = vld [vmem:[%s8760_s9 + $0xc0] sm:$0xff]  ;;  %v4564_v25 = vld [vmem:[%s8760_s9 + $0x58] sm:$0xff]  ;;  %v4357_v48 = vsel %vm7862_vm7, %v5556_v60, %v5557_v40  ;;  %v4370_v50 = vld [vmem:[#allocation3 + $0x48] sm:$0x3c] }
 0x414   : > { %1675 = vst [vmem:[%s6873_s29 + $0xf0] sm:$0xff] %v1611_v36  ;;  %5058 = vperm.xlu2 %5705, %v8257_v2   ;;  %5068 = vperm.xlu0 %5706, %v8257_v2   ;;  %v4361_v61 = vsel %vm7862_vm7, %v5558_v15, %v5559_v46  ;;  %v9046_v49 = vld [vmem:[#allocation82_spill] sm:$0xff]  ;;  %v9047_v22 = vld [vmem:[#allocation83_spill] sm:$0xff]  ;;  %v4565_v54 = vld [vmem:[%s8760_s9 + $0x60] sm:$0xff]  ;;  %v4417_v59 = vsel %vm7912_vm9, %v5570_v18, %v5571_v7  ;;  %v9049_v36 = vmov 7   ;;  %v9051_v15 = vmov 1  }
 0x415   : > { %v4515_v56 = vld.sshfl [vmem:[#allocation1] sm:$0xff pattern:$0x75316420]  ;;  %v4516_v28 = vld.sshfl [vmem:[#allocation1 + $0x8] sm:$0xff pattern:$0x75316420]  ;;  %v1354_v34 = vadd.f32 %v8261_v58, %v9046_v49  ;;  %v1355_v55 = vadd.f32 %v1291_v23, %v9047_v22  ;;  %v4390_v24 = vsel %vm4071_vm3, %v4370_v50, %v4386_v11  ;;  %v4391_v10 = vsel %vm4071_vm3, %v4386_v11, %v4370_v50  ;;  %4858 = vmatmul.f32.vlgmr.msra.gmra.mxu1 %v4564_v25 }
 0x416   : > { %v1458_v45 = vpop.permute.xlu2 %1457  ;;  %4880 = vmatpush.xpose.msra.mxu2 %v4515_v56  ;;  %4903 = vmatpush.xpose.msrb.mxu3 %v4516_v28  ;;  %4523 = vst [vmem:[#allocation1] ss:$2 sm:$0xff] %v4357_v48  ;;  %v4566_v1 = vld [vmem:[%s8760_s9 + $0x68] sm:$0xff]  ;;  %v4393_v58 = vsel %vm4071_vm3, %v4372_v16, %v4387_v0  ;;  %v4394_v29 = vsel %vm4071_vm3, %v4387_v0, %v4372_v16  ;;  %v9048_v42 = vld [vmem:[#allocation32_spill] sm:$0xff]  ;;  %v5564_v4 = vrot.slane %v4390_v24, 10  ;;  %v5565_v5 = vrot.slane %v4391_v10, 10 }
 0x417   : > { %v1553_v20 = vmul.f32 %v6851_v51, %v1458_v45  ;;  %v1554_v47 = vmul.f32 %v6853_v35, %v1458_v45  ;;  %4525 = vst [vmem:[#allocation1 + $0x1] ss:$2 sm:$0xff] %v4361_v61  ;;  %v4413_v27 = vsel %vm7912_vm9, %v5568_v9, %v5569_v3  ;;  %v1296_v41 = vmul.f32 %v6806_v38, %v9048_v42  ;;  %v9050_v62 = vld [vmem:[#allocation85_spill] sm:$0xff]  ;;  %v4563_v18 = vld [vmem:[%s8760_s9 + $0x50] sm:$0xff]  ;;  %v9052_v46 = vld [vmem:[#allocation86_spill] sm:$0xff] }
 0x418   : > { %1676 = vst [vmem:[%s6873_s29 + $0xf8] sm:$0xff] %v1612_v26  ;;  %4746 = vmatmul.f32.gmra.mxu0 %v4577_v53  ;;  %v1297_v43 = vmul.f32 %v6808_v21, %v9048_v42  ;;  %v5566_v12 = vrot.slane %v4393_v58, 10  ;;  %v5567_v31 = vrot.slane %v4394_v29, 10  ;;  %v4583_v63 = vld [vmem:[%s8760_s9 + $0xf0] sm:$0xff]  ;;  %v4584_v23 = vld [vmem:[%s8760_s9 + $0xf8] sm:$0xff]  ;;  %v4582_v7 = vld [vmem:[%s8760_s9 + $0xe8] sm:$0xff]  ;;  %v4405_v16 = vsel %vm7912_vm9, %v5564_v4, %v5565_v5 }
 0x419   : > { %v1617_v19 = vadd.f32 %v1553_v20, %v1354_v34  ;;  %v4532_v17 = vld.sshfl [vmem:[#allocation1 + $0x10] sm:$0xff pattern:$0x75316420]  ;;  %v4533_v44 = vld.sshfl [vmem:[#allocation1 + $0x18] sm:$0xff pattern:$0x75316420]  ;;  %v1618_v13 = vadd.f32 %v1554_v47, %v1355_v55  ;;  %4881 = vmatmul.f32.vlgmr.msra.gmra.mxu2 %v4565_v54  ;;  %4904 = vmatmul.f32.vlgmr.msrb.gmra.mxu3 %v4566_v1  ;;  %v1360_v52 = vadd.f32 %v1296_v41, %v9050_v62  ;;  %v8416_v34 = vpop.f32.mrf.mxu3  ;;  %v8433_v1 = vpop.f32.mrf.mxu2 }
 0x41a   : > { %4948 = vmatpush.xpose.msrb.mxu1 %v4533_v44  ;;  %4542 = vst [vmem:[#allocation1 + $0x10] ss:$2 sm:$0xff] %v4413_v27  ;;  %4925 = vmatpush.xpose.msra.mxu0 %v4532_v17  ;;  %v1361_v32 = vadd.f32 %v1297_v43, %v9052_v46  ;;  %v4409_v9 = vsel %vm7912_vm9, %v5566_v12, %v5567_v31  ;;  %v9053_v53 = vmov 2   ;;  %v4581_v25 = vld [vmem:[%s8760_s9 + $0xe0] sm:$0xff]  ;;  %v4568_v48 = vld [vmem:[%s8760_s9 + $0x78] sm:$0xff]  ;;  %v4570_v61 = vld [vmem:[%s8760_s9 + $0x88] sm:$0xff] }
 0x41b   : > { %4544 = vst [vmem:[#allocation1 + $0x11] ss:$2 sm:$0xff] %v4417_v59  ;;  %5707 = vset.pattern.permute.xlu1 %v9049_v36  ;;  %v4569_v47 = vld [vmem:[%s8760_s9 + $0x80] sm:$0xff]  ;;  %v9054_v50 = vmov 3   ;;  %v9055_v49 = vmov 0   ;;  %v4567_v22 = vld [vmem:[%s8760_s9 + $0x70] sm:$0xff] }
 0x41c   : > { %1681 = vst [vmem:[%s6873_s29 + $0x120] sm:$0xff] %v1617_v19  ;;  %5078 = vperm.xlu1 %5707, %v8257_v2   ;;  %5708 = vset.pattern.permute.xlu2 %v9051_v15  ;;  %v4586_v55 = vld [vmem:[%s8760_s9 + $0x108] sm:$0xff]  ;;  %v4587_v54 = vld [vmem:[%s8760_s9 + $0x110] sm:$0xff]  ;;  %v4585_v59 = vld [vmem:[%s8760_s9 + $0x100] sm:$0xff]  ;;  %v9056_v29 = vmov 8  }
 0x41d   : > { %1682 = vst [vmem:[%s6873_s29 + $0x128] sm:$0xff] %v1618_v13  ;;  %5711 = vset.pattern.permute.xlu0 %v9043_v39  ;;  %4861 = vmatmul.f32.gmra.mxu1 %v4582_v7  ;;  %v8391_v39 = vld [vmem:[%s8762_s11 + $0x8] sm:$0xff] }
 0x41e   : > { %v1470_v6 = vpop.permute.xlu2 %1469  ;;  %v4530_v0 = vld.sshfl [vmem:[#allocation1] sm:$0xff pattern:$0x75316420]  ;;  %v4531_v11 = vld.sshfl [vmem:[#allocation1 + $0x8] sm:$0xff pattern:$0x75316420]  ;;  %5022 = vperm.xlu2 %5708, %v8391_v39   ;;  %5052 = vperm.xlu0 %5711, %v8391_v39  }
 0x41f   : > { %v1559_v60 = vmul.f32 %v6851_v51, %v1470_v6  ;;  %v1560_v40 = vmul.f32 %v6853_v35, %v1470_v6  ;;  %4949 = vmatpush.xpose.msrb.mxu1 %v4531_v11  ;;  %4538 = vst [vmem:[#allocation1] ss:$2 sm:$0xff] %v4405_v16  ;;  %4926 = vmatpush.xpose.msra.mxu0 %v4530_v0 }
 0x420   : > { %4540 = vst [vmem:[#allocation1 + $0x1] ss:$2 sm:$0xff] %v4409_v9  ;;  %4835 = vmatmul.f32.vlgmr.msrb.gmra.mxu0 %v4563_v18 }
 0x421   : > { %v1623_v45 = vadd.f32 %v1559_v60, %v1360_v52  ;;  %v1624_v3 = vadd.f32 %v1560_v40, %v1361_v32  ;;  %4884 = vmatmul.f32.gmra.mxu2 %v4583_v63  ;;  %4907 = vmatmul.f32.gmra.mxu3 %v4584_v23  ;;  %v8440_v24 = vpop.f32.mrf.mxu3 }
 0x422   : > { %v4547_v26 = vld.sshfl [vmem:[#allocation1 + $0x10] sm:$0xff pattern:$0x75316420]  ;;  %v4548_v20 = vld.sshfl [vmem:[#allocation1 + $0x18] sm:$0xff pattern:$0x75316420] }
 0x423   : > { %1687 = vst [vmem:[%s6873_s29 + $0x150] sm:$0xff] %v1623_v45  ;;  %4971 = vmatpush.xpose.msrb.mxu2 %v4547_v26  ;;  %4994 = vmatpush.xpose.msra.mxu3 %v4548_v20 }
 0x424   : > { %1688 = vst [vmem:[%s6873_s29 + $0x158] sm:$0xff] %v1624_v3  ;;  %5709 = vset.pattern.permute.xlu1 %v9053_v53 }
 0x425   : > { %5032 = vperm.xlu1 %5709, %v8391_v39   ;;  %4950 = vmatmul.f32.vlgmr.msrb.gmra.mxu1 %v4568_v48 }
 0x426   : > { %5710 = vset.pattern.permute.xlu2 %v9054_v50  ;;  %5736 = vset.pattern.permute.xlu0 %v9055_v49 }
 0x427   : > { %v4545_v56 = vld.sshfl [vmem:[#allocation1] sm:$0xff pattern:$0x75316420]  ;;  %v4546_v28 = vld.sshfl [vmem:[#allocation1 + $0x8] sm:$0xff pattern:$0x75316420]  ;;  %5042 = vperm.xlu2 %5710, %v8391_v39  }
 0x428   : > { %4972 = vmatpush.xpose.msrb.mxu2 %v4545_v56  ;;  %4995 = vmatpush.xpose.msra.mxu3 %v4546_v28 }
 0x429   : > { %4838 = vmatmul.f32.gmra.mxu0 %v4581_v25  ;;  %v8447_v10 = vpop.f32.mrf.mxu3 }
 0x42b   : > { %4973 = vmatmul.f32.vlgmr.msrb.gmra.mxu2 %v4569_v47  ;;  %4996 = vmatmul.f32.vlgmr.msra.gmra.mxu3 %v4570_v61 }
 0x42d   : > { %5712 = vset.pattern.permute.xlu1 %v9045_v33  ;;  %v4588_v33 = vld [vmem:[%s8760_s9 + $0x118] sm:$0xff]  ;;  %4953 = vmatmul.f32.gmra.mxu1 %v4586_v55 }
 0x42e   : > { %5062 = vperm.xlu1 %5712, %v8391_v39  }
 0x42f   : > { %5713 = vset.pattern.permute.xlu2 %v9044_v30  ;;  %v8445_v30 = vpop.f32.mrf.mxu2 }
 0x430   : > { %5072 = vperm.xlu2 %5713, %v8391_v39  }
 0x431   : > { %4927 = vmatmul.f32.vlgmr.msra.gmra.mxu0 %v4567_v22  ;;  %v8454_v27 = vpop.f32.mrf.mxu3 }
 0x433   : > { %4976 = vmatmul.f32.gmra.mxu2 %v4587_v54  ;;  %4999 = vmatmul.f32.gmra.mxu3 %v4588_v33 }
 0x436   : > { %5714 = vset.pattern.permute.xlu1 %v9049_v36  ;;  %v8449_v58 = vpop.f32.mrf.mxu1 }
 0x437   : > { %5082 = vperm.xlu1 %5714, %v8391_v39   ;;  %v8452_v19 = vpop.f32.mrf.mxu2 }
 0x438   : > { %5715 = vset.pattern.permute.xlu2 %v9055_v49 }
 0x439   : > { %4930 = vmatmul.f32.gmra.mxu0 %v4585_v59  ;;  %5007 = vperm.xlu2 %5715, %v8257_v2   ;;  %v8460_v13 = vpop.f32.mrf.mxu3 }
 0x43e   : > { %v8456_v17 = vpop.f32.mrf.mxu1 }
 0x43f   : > { %5744 = vset.pattern.permute.xlu1 %v9054_v50  ;;  %v8458_v44 = vpop.f32.mrf.mxu2 }
 0x441   : > { %5742 = vset.pattern.permute.xlu2 %v9056_v29 }
 0x447   : > { %v8464_v41 = vpop.f32.mrf.mxu2 }
 0x44c   : > { %v8462_v42 = vpop.f32.mrf.mxu1 }
 0x44f   : > { %v8470_v12 = vpop.f32.mrf.mxu2 }
 0x454   : > { %v8466_v5 = vpop.f32.mrf.mxu1 }
 0x45c   : > { %v4609_v4 = vpop.f32.mrf.mxu3 }
 0x45d   : > { %v4606_v62 = vpop.f32.mrf.mxu2 }
 0x463   : > { %v4655_v6 = vpop.f32.mrf.mxu1 }
 0x464   : > { %v4629_v31 = vpop.f32.mrf.mxu3 }
 0x465   : > { %v8468_v43 = vpop.f32.mrf.mxu0  ;;  %v4630_v7 = vadd.f32 %v4629_v31, %v4606_v62 }
 0x46c   : > { %v4632_v52 = vpop.f32.mrf.mxu3 }
 0x46d   : > { %v8472_v36 = vpop.f32.mrf.mxu0  ;;  %v4633_v9 = vadd.f32 %v4632_v52, %v4609_v4 }
 0x46f   : > { %v4675_v60 = vpop.f32.mrf.mxu1  ;;  %v4656_v53 = vadd.f32 %v4655_v6, %v4633_v9 }
 0x475   : > { %v8474_v40 = vpop.f32.mrf.mxu0 }
 0x476   : > { %v4698_v18 = vpop.f32.mrf.mxu2 }
 0x477   : > { %v4721_v15 = vpop.f32.mrf.mxu3  ;;  %v4678_v46 = vpop.f32.mrf.mxu1 }
 0x478   : > { %v4679_v28 = vadd.f32 %v4678_v46, %v4656_v53 }
 0x47d   : > { %v8476_v32 = vpop.f32.mrf.mxu0 }
 0x47e   : > { %v4701_v63 = vpop.f32.mrf.mxu2 }
 0x47f   : > { %v4724_v23 = vpop.f32.mrf.mxu3  ;;  %v4767_v16 = vpop.f32.mrf.mxu1  ;;  %v4702_v55 = vadd.f32 %v4701_v63, %v4679_v28 }
 0x480   : > { %v5039_v28 = vpop.permute.xlu0 %5038 }
 0x481   : > { %v4725_v31 = vadd.f32 %v4724_v23, %v4702_v55 }
 0x485   : > { %v4652_v0 = vpop.f32.mrf.mxu0 }
 0x486   : > { %v4653_v11 = vadd.f32 %v4652_v0, %v4630_v7  ;;  %v5019_v7 = vpop.permute.xlu1 %5018 }
 0x488   : > { %v4676_v45 = vadd.f32 %v4675_v60, %v4653_v11  ;;  %v4770_v48 = vpop.f32.mrf.mxu1  ;;  %v5029_v11 = vpop.permute.xlu2 %5028 }
 0x48a   : > { %v4790_v3 = vpop.f32.mrf.mxu2  ;;  %v4813_v26 = vpop.f32.mrf.mxu3  ;;  %v4699_v20 = vadd.f32 %v4698_v18, %v4676_v45 }
 0x48c   : > { %v4722_v56 = vadd.f32 %v4721_v15, %v4699_v20 }
 0x48d   : > { %v4744_v25 = vpop.f32.mrf.mxu0 }
 0x48e   : > { %v4745_v22 = vadd.f32 %v4744_v25, %v4722_v56  ;;  %v5049_v20 = vpop.permute.xlu1 %5048 }
 0x490   : > { %v4768_v33 = vadd.f32 %v4767_v16, %v4745_v22 }
 0x492   : > { %v4793_v47 = vpop.f32.mrf.mxu2  ;;  %v4816_v61 = vpop.f32.mrf.mxu3  ;;  %v4791_v62 = vadd.f32 %v4790_v3, %v4768_v33 }
 0x493   : > { %v4859_v59 = vpop.f32.mrf.mxu1  ;;  %v5059_v3 = vpop.permute.xlu2 %5058 }
 0x494   : > { %v4814_v18 = vadd.f32 %v4813_v26, %v4791_v62 }
 0x495   : > { %v4747_v54 = vpop.f32.mrf.mxu0 }
 0x496   : > { %v4748_v60 = vadd.f32 %v4747_v54, %v4725_v31  ;;  %v5079_v31 = vpop.permute.xlu1 %5078 }
 0x498   : > { %v4771_v6 = vadd.f32 %v4770_v48, %v4748_v60 }
 0x49a   : > { %v4794_v46 = vadd.f32 %v4793_v47, %v4771_v6 }
 0x49b   : > { %v4862_v15 = vpop.f32.mrf.mxu1 }
 0x49c   : > { %v4882_v4 = vpop.f32.mrf.mxu2  ;;  %v4905_v52 = vpop.f32.mrf.mxu3  ;;  %v4817_v16 = vadd.f32 %v4816_v61, %v4794_v46 }
 0x49d   : > { %v4836_v0 = vpop.f32.mrf.mxu0 }
 0x49e   : > { %v4837_v45 = vadd.f32 %v4836_v0, %v4814_v18  ;;  %v5069_v18 = vpop.permute.xlu0 %5068 }
 0x4a0   : > { %v4860_v53 = vadd.f32 %v4859_v59, %v4837_v45  ;;  %v5023_v59 = vpop.permute.xlu2 %5022 }
 0x4a2   : > { %v4883_v56 = vadd.f32 %v4882_v4, %v4860_v53 }
 0x4a3   : > { %v4951_v22 = vpop.f32.mrf.mxu1 }
 0x4a4   : > { %v4885_v9 = vpop.f32.mrf.mxu2  ;;  %v4908_v25 = vpop.f32.mrf.mxu3  ;;  %v4906_v55 = vadd.f32 %v4905_v52, %v4883_v56 }
 0x4a6   : > { %v4839_v63 = vpop.f32.mrf.mxu0 }
 0x4a7   : > { %v4840_v23 = vadd.f32 %v4839_v63, %v4817_v16  ;;  %v5033_v63 = vpop.permute.xlu1 %5032 }
 0x4a9   : > { %v4863_v54 = vadd.f32 %v4862_v15, %v4840_v23  ;;  %v5043_v23 = vpop.permute.xlu2 %5042 }
 0x4ab   : > { %v4886_v60 = vadd.f32 %v4885_v9, %v4863_v54  ;;  %v4954_v4 = vpop.f32.mrf.mxu1 }
 0x4ad   : > { %v4909_v6 = vadd.f32 %v4908_v25, %v4886_v60  ;;  %v5053_v60 = vpop.permute.xlu0 %5052 }
 0x4ae   : > { %v4928_v33 = vpop.f32.mrf.mxu0  ;;  %v4974_v26 = vpop.f32.mrf.mxu2 }
 0x4af   : > { %v4929_v48 = vadd.f32 %v4928_v33, %v4906_v55  ;;  %v4997_v62 = vpop.f32.mrf.mxu3 }
 0x4b1   : > { %v4952_v47 = vadd.f32 %v4951_v22, %v4929_v48 }
 0x4b3   : > { %v4975_v0 = vadd.f32 %v4974_v26, %v4952_v47 }
 0x4b5   : > { %v8478_v45 = vadd.f32 %v4997_v62, %v4975_v0  ;;  %v5063_v0 = vpop.permute.xlu1 %5062 }
 0x4b6   : > { %v4931_v61 = vpop.f32.mrf.mxu0  ;;  %v4977_v52 = vpop.f32.mrf.mxu2 }
 0x4b7   : > { %v5075_v46 = vmul.f32 %v5069_v18, %v8478_v45  ;;  %v4932_v53 = vadd.f32 %v4931_v61, %v4909_v6  ;;  %v5000_v16 = vpop.f32.mrf.mxu3  ;;  %v5035_v25 = vmul.f32 %v5029_v11, %v8478_v45  ;;  %v5025_v55 = vmul.f32 %v5019_v7, %v8478_v45 }
 0x4b8   : > { %v5045_v33 = vmul.f32 %v5039_v28, %v8478_v45  ;;  %v5055_v18 = vmul.f32 %v5049_v20, %v8478_v45  ;;  %v5065_v28 = vmul.f32 %v5059_v3, %v8478_v45  ;;  %v5073_v20 = vpop.permute.xlu2 %5072 }
 0x4b9   : > { %v4955_v15 = vadd.f32 %v4954_v4, %v4932_v53  ;;  %5139 = vrot.lane.b32.xlu2 %v5075_v46, %s5875_s17  ;;  %v5085_v4 = vmul.f32 %v5079_v31, %v8478_v45  ;;  %v5776_v31 = vld [vmem:[%s8752_s1 + $0xb8] sm:$0xff]  ;;  %v5777_v53 = vld [vmem:[%s8752_s1 + $0xd0] sm:$0xff] }
 0x4bb   : > { %v4978_v9 = vadd.f32 %v4977_v52, %v4955_v15  ;;  %v5779_v52 = vld [vmem:[%s8752_s1 + $0xc8] sm:$0xff]  ;;  %v5780_v15 = vld [vmem:[%s8752_s1 + $0xf0] sm:$0xff] }
 0x4bd   : > { %v8482_v56 = vadd.f32 %v5000_v16, %v4978_v9  ;;  %v5083_v61 = vpop.permute.xlu1 %5082  ;;  %v5781_v16 = vld [vmem:[%s8752_s1 + $0xe8] sm:$0xff]  ;;  %v5782_v9 = vld [vmem:[%s8752_s1 + $0xe0] sm:$0xff] }
 0x4bf   : > { %v5036_v22 = vmul.f32 %v5033_v63, %v8482_v56  ;;  %v5026_v54 = vmul.f32 %v5023_v59, %v8482_v56  ;;  %v5046_v26 = vmul.f32 %v5043_v23, %v8482_v56  ;;  %v5056_v11 = vmul.f32 %v5053_v60, %v8482_v56  ;;  %v3667_v63 = vld [vmem:[%s8759_s8] sm:$0xff]  ;;  %v5207_v23 = vld [vmem:[#allocation6 + $0x110] sm:$0xff] }
 0x4c0   : > { %v5066_v7 = vmul.f32 %v5063_v0, %v8482_v56  ;;  %v5086_v46 = vmul.f32 %v5083_v61, %v8482_v56  ;;  %v5076_v3 = vmul.f32 %v5073_v20, %v8482_v56  ;;  %5264 = vmatpush.msra.mxu1 %v5207_v23  ;;  %v8544_v60 = vpop.permute.xlu2 %5007  ;;  %v5198_v0 = vld [vmem:[#allocation6 + $0xc8] sm:$0xff]  ;;  %v5187_v20 = vld [vmem:[#allocation6 + $0x70] sm:$0xff] }
 0x4c1   : > { %v5721_v48 = vpack.i.bf16 %v5036_v22, %v5035_v25  ;;  %v5716_v62 = vpack.i.bf16 %v5026_v54, %v5025_v55  ;;  %v5726_v47 = vpack.i.bf16 %v5046_v26, %v5045_v33  ;;  %v5731_v59 = vpack.i.bf16 %v5056_v11, %v5055_v18  ;;  %v5208_v25 = vld [vmem:[#allocation6 + $0x118] sm:$0xff]  ;;  %v5783_v22 = vld [vmem:[%s8752_s1 + $0xf8] sm:$0xff]  ;;  %v5205_v55 = vld [vmem:[#allocation6 + $0x100] sm:$0xff] }
 0x4c2   : > { %v5737_v6 = vpack.i.bf16 %v5066_v7, %v5065_v28  ;;  %5310 = vmatpush.msrb.mxu3 %v5208_v25  ;;  %v5206_v54 = vld [vmem:[#allocation6 + $0x108] sm:$0xff]  ;;  %v5203_v33 = vld [vmem:[#allocation6 + $0xf0] sm:$0xff]  ;;  %5265 = vmatpush.msra.mxu1 %v5205_v55  ;;  %v5201_v26 = vld [vmem:[#allocation6 + $0xe0] sm:$0xff] }
 0x4c3   : > { %5722 = vrot.lane.b32.xlu1 %v5721_v48, %s5876_s19  ;;  %5717 = vrot.lane.b32.xlu0 %v5716_v62, %s5877_s20  ;;  %v5202_v48 = vld [vmem:[#allocation6 + $0xe8] sm:$0xff]  ;;  %v5200_v62 = vld [vmem:[#allocation6 + $0xd8] sm:$0xff]  ;;  %v5195_v11 = vld [vmem:[#allocation6 + $0xb0] sm:$0xff] }
 0x4c4   : > { %5727 = vrot.lane.b32.xlu2 %v5726_v47, %s5878_s21  ;;  %5311 = vmatpush.msrb.mxu3 %v5206_v54  ;;  %v5197_v47 = vld [vmem:[#allocation6 + $0xc0] sm:$0xff]  ;;  %v5196_v7 = vld [vmem:[#allocation6 + $0xb8] sm:$0xff]  ;;  %v5194_v28 = vld [vmem:[#allocation6 + $0xa8] sm:$0xff] }
 0x4c5   : > { %5227 = vmatpush.msrb.mxu0 %v5203_v33  ;;  %v5193_v18 = vld [vmem:[#allocation6 + $0xa0] sm:$0xff]  ;;  %v5175_v55 = vld [vmem:[#allocation6 + $0x10] sm:$0xff]  ;;  %v5176_v54 = vld [vmem:[#allocation6 + $0x18] sm:$0xff] }
 0x4c6   : > { %v5177_v25 = vld [vmem:[#allocation6 + $0x20] sm:$0xff] }
 0x4c7   : > { %5228 = vmatpush.msrb.mxu0 %v5201_v26  ;;  %v5173_v33 = vld [vmem:[#allocation6] sm:$0xff] }
 0x4cb   : > { %5738 = vrot.lane.b32.xlu1 %v5737_v6, %s5879_s24  ;;  %5732 = vrot.lane.b32.xlu0 %v5731_v59, %s5872_s25  ;;  %v5191_v59 = vld [vmem:[#allocation6 + $0x90] sm:$0xff]  ;;  %v5192_v6 = vld [vmem:[#allocation6 + $0x98] sm:$0xff]  ;;  %s5582_s25 = sshll.u32 %s9085_s22, 5 }
 0x4cc   : > { %5088 = vperm.xlu2 %5742, %v8257_v2   ;;  %v5775_v2 = vld [vmem:[%s8752_s1 + $0xc0] sm:$0xff]  ;;  %s8645_s16 = scalar_lea.vmem %s8765_s14, %s5582_s25  ;;  %s593_s20 = scalar_lea.vmem %s8766_s15, %s5582_s25 }
 0x4d3   : > { %5147 = vrot.lane.b32.xlu1 %v5085_v4, %s5880_s26  ;;  %5012 = vperm.xlu0 %5736, %v8391_v39   ;;  %v5189_v4 = vld [vmem:[#allocation6 + $0x80] sm:$0xff] }
 0x4d4   : > { %5149 = vrot.lane.b32.xlu2 %v5086_v46, %s5880_s26  ;;  %v5190_v46 = vld [vmem:[#allocation6 + $0x88] sm:$0xff] }
 0x4d5   : > { %5745 = vset.pattern.permute.xlu2 %v9054_v50 }
 0x4db   : > { %5743 = vset.pattern.permute.xlu0 %v9056_v29  ;;  %5141 = vrot.lane.b32.xlu1 %v5076_v3, %s5875_s17  ;;  %v5778_v29 = vld [vmem:[%s8752_s1 + $0xd8] sm:$0xff]  ;;  %v5188_v3 = vld [vmem:[#allocation6 + $0x78] sm:$0xff] }
 0x4dc   : > { %1481 = vperm.xlu2 %5745, %v5775_v2   ;;  %5092 = vperm.xlu0 %5743, %v8391_v39   ;;  %v3668_v39 = vld [vmem:[%s8759_s8 + $0x8] sm:$0xff] }
 0x4e3   : > { %1477 = vperm.xlu1 %5744, %v5776_v31   ;;  %v5185_v31 = vld [vmem:[#allocation6 + $0x60] sm:$0xff] }
 0x4e4   : > { %1489 = vperm.xlu2 %5745, %v5777_v53   ;;  %5746 = vset.pattern.permute.xlu0 %v9054_v50  ;;  %v5186_v53 = vld [vmem:[#allocation6 + $0x68] sm:$0xff] }
 0x4e5   : > { %1493 = vperm.xlu0 %5746, %v5778_v29   ;;  %v5183_v29 = vld [vmem:[#allocation6 + $0x50] sm:$0xff] }
 0x4eb   : > { %1485 = vperm.xlu1 %5744, %v5779_v52   ;;  %v5181_v52 = vld [vmem:[#allocation6 + $0x40] sm:$0xff] }
 0x4ec   : > { %5748 = vset.pattern.permute.xlu2 %v9055_v49 }
 0x4ed   : > { %3676 = vperm.xlu2 %5748, %v3668_v39   ;;  %1505 = vperm.xlu0 %5746, %v5780_v15   ;;  %v5184_v39 = vld [vmem:[#allocation6 + $0x58] sm:$0xff]  ;;  %v5182_v15 = vld [vmem:[#allocation6 + $0x48] sm:$0xff] }
 0x4f3   : > { %5747 = vset.pattern.permute.xlu1 %v9055_v49 }
 0x4f4   : > { %3671 = vperm.xlu1 %5747, %v3667_v63   ;;  %v5179_v63 = vld [vmem:[#allocation6 + $0x30] sm:$0xff] }
 0x4f5   : > { %5750 = vset.pattern.permute.xlu2 %v9054_v50  ;;  %5752 = vset.pattern.permute.xlu0 %v9055_v49 }
 0x4f6   : > { %1501 = vperm.xlu2 %5750, %v5781_v16   ;;  %v5180_v16 = vld [vmem:[#allocation6 + $0x38] sm:$0xff] }
 0x4fc   : > { %5749 = vset.pattern.permute.xlu1 %v9054_v50  ;;  %v5204_v50 = vld [vmem:[#allocation6 + $0xf8] sm:$0xff] }
 0x4fd   : > { %1497 = vperm.xlu1 %5749, %v5782_v9   ;;  %5273 = vmatpush.msra.mxu2 %v5204_v50  ;;  %v5174_v50 = vld [vmem:[#allocation6 + $0x8] sm:$0xff] }
 0x4fe   : > { %5751 = vset.pattern.permute.xlu2 %v9055_v49  ;;  %v5199_v49 = vld [vmem:[#allocation6 + $0xd0] sm:$0xff] }
 0x4ff   : > { %5274 = vmatpush.msra.mxu2 %v5202_v48  ;;  %5229 = vmatpush.msrb.mxu0 %v5199_v49  ;;  %v9057_v48 = vld [vmem:[#allocation34_spill] sm:$0xff] }
 0x500   : > { %v1302_v49 = vmul.f32 %v6806_v38, %v9057_v48 }
 0x501   : > { %5275 = vmatpush.msra.mxu2 %v5200_v62  ;;  %5230 = vmatpush.msrb.mxu0 %v5197_v47  ;;  %v1303_v62 = vmul.f32 %v6808_v21, %v9057_v48 }
 0x503   : > { %5276 = vmatpush.msra.mxu2 %v5198_v0  ;;  %5231 = vmatpush.msrb.mxu0 %v5195_v11 }
 0x505   : > { %1509 = vperm.xlu1 %5749, %v5783_v22   ;;  %5277 = vmatpush.msra.mxu2 %v5196_v7  ;;  %v5178_v22 = vld [vmem:[#allocation6 + $0x28] sm:$0xff]  ;;  %v9058_v7 = vld [vmem:[#allocation88_spill] sm:$0xff] }
 0x506   : > { %5232 = vmatpush.msrb.mxu0 %v5193_v18  ;;  %v1366_v18 = vadd.f32 %v1302_v49, %v9058_v7  ;;  %v5210_v49 = vld [vmem:[%s8763_s12 + $0x8] sm:$0xff] }
 0x507   : > { %5278 = vmatpush.msra.mxu2 %v5194_v28  ;;  %5218 = vperm.xlu0 %5752, %v5210_v49  }
 0x508   : > { %5233 = vmatpush.msrb.mxu0 %v5191_v59  ;;  %v5015_v59 = vmul.f32 %v8544_v60, %v8478_v45  ;;  %v9061_v60 = vld [vmem:[#allocation25_spill] sm:$0xff] }
 0x509   : > { %5279 = vmatpush.msra.mxu2 %v5192_v6  ;;  %v9059_v6 = vld [vmem:[#allocation89_spill] sm:$0xff] }
 0x50a   : > { %5234 = vmatpush.msrb.mxu0 %v5189_v4  ;;  %v1367_v4 = vadd.f32 %v1303_v62, %v9059_v6 }
 0x50b   : > { %5280 = vmatpush.msra.mxu2 %v5190_v46 }
 0x50c   : > { %5235 = vmatpush.msrb.mxu0 %v5187_v20 }
 0x50d   : > { %5281 = vmatpush.msra.mxu2 %v5188_v3  ;;  %v9060_v3 = vld [vmem:[#allocation50_spill] sm:$0xff] }
 0x50e   : > { %5236 = vmatpush.msrb.mxu0 %v5185_v31  ;;  %v1043_v31 = vmul.f32 %v9026_v37, %v9060_v3 }
 0x50f   : > { %5282 = vmatpush.msra.mxu2 %v5186_v53  ;;  %v1044_v53 = vmul.f32 %v9031_v8, %v9060_v3 }
 0x510   : > { %5237 = vmatpush.msrb.mxu0 %v5183_v29 }
 0x511   : > { %5283 = vmatpush.msra.mxu2 %v5184_v39 }
 0x512   : > { %5238 = vmatpush.msrb.mxu0 %v5181_v52 }
 0x513   : > { %v8546_v61 = vpop.permute.xlu2 %5139  ;;  %5284 = vmatpush.msra.mxu2 %v5182_v15  ;;  %v9062_v15 = vld [vmem:[#allocation64_spill] sm:$0xff] }
 0x514   : > { %5239 = vmatpush.msrb.mxu0 %v5179_v63  ;;  %v844_v63 = vmul.f32 %v9062_v15, %v9061_v60 }
 0x515   : > { %5285 = vmatpush.msra.mxu2 %v5180_v16  ;;  %v845_v16 = vmul.f32 %v9034_v57, %v9061_v60 }
 0x516   : > { %5240 = vmatpush.msrb.mxu0 %v5177_v25 }
 0x517   : > { %5286 = vmatpush.msra.mxu2 %v5178_v22  ;;  %v1107_v22 = vadd.f32 %v1043_v31, %v844_v63 }
 0x518   : > { %5241 = vmatpush.msrb.mxu0 %v5175_v55  ;;  %v1108_v55 = vadd.f32 %v1044_v53, %v845_v16 }
 0x519   : > { %5287 = vmatpush.msra.mxu2 %v5176_v54 }
 0x51a   : > { %5242 = vmatpush.msrb.mxu0 %v5173_v33 }
 0x51b   : > { %5288 = vmatpush.msra.mxu2 %v5174_v50 }
 0x51e   : > { %v8548_v2 = vpop.permute.xlu2 %5727 }
 0x51f   : > { %v5729_v33 = vunpack.i.l.bf16 %v8548_v2 }
 0x526   : > { %v5089_v9 = vpop.permute.xlu2 %5088 }
 0x527   : > { %v5095_v23 = vmul.f32 %v5089_v9, %v8478_v45  ;;  %v9063_v9 = vld [vmem:[#allocation81_spill] sm:$0xff] }
 0x528   : > { %v1307_v25 = vmul.f32 %v6808_v21, %v9063_v9 }
 0x529   : > { %5572 = vmatmul.msk.f32.vlgmr.msra.gmra.mxu1 %vm5153_vm10, %v5095_v23  ;;  %5574 = vmatmul.msk.f32.vlgmr.msrb.gmra.mxu3 %vm5153_vm10, %v5095_v23  ;;  %v1306_v23 = vmul.f32 %v6806_v38, %v9063_v9  ;;  %v5730_v9 = vunpack.i.h.bf16 %v8548_v2 }
 0x52b   : > { %v1370_v62 = vadd.f32 %v1306_v23, %v1107_v22  ;;  %v9064_v22 = vld [vmem:[#allocation52_spill] sm:$0xff] }
 0x52e   : > { %v8553_v26 = vpop.permute.xlu2 %5149 }
 0x535   : > { %v8559_v47 = vpop.permute.xlu1 %5722  ;;  %v5718_v0 = vpop.permute.xlu0 %5717 }
 0x536   : > { %v5719_v11 = vunpack.i.l.bf16 %v5718_v0  ;;  %v1482_v28 = vpop.permute.xlu2 %1481  ;;  %v5724_v29 = vunpack.i.l.bf16 %v8559_v47  ;;  %v5725_v63 = vunpack.i.h.bf16 %v8559_v47 }
 0x537   : > { %v1565_v46 = vmul.f32 %v6851_v51, %v1482_v28  ;;  %v1566_v20 = vmul.f32 %v6853_v35, %v1482_v28 }
 0x538   : > { %v5154_v39 = vsel %vm5153_vm10, %v5015_v59, %v5719_v11  ;;  %v1371_v11 = vadd.f32 %v1307_v25, %v1108_v55 }
 0x539   : > { %v1629_v52 = vadd.f32 %v1565_v46, %v1366_v18  ;;  %v1630_v45 = vadd.f32 %v1566_v20, %v1367_v4  ;;  %v5157_v54 = vsel %vm5156_vm11, %v5154_v39, %v5724_v29 }
 0x53a   : > { %v5160_v59 = vsel %vm5159_vm12, %v5157_v54, %v5729_v33 }
 0x53b   : > { %1693 = vst [vmem:[%s6873_s29 + $0x180] sm:$0xff] %v1629_v52  ;;  %v5720_v52 = vunpack.i.h.bf16 %v5718_v0  ;;  %v1049_v0 = vmul.f32 %v9026_v37, %v9064_v22 }
 0x53c   : > { %1694 = vst [vmem:[%s6873_s29 + $0x188] sm:$0xff] %v1630_v45 }
 0x53d   : > { %v5739_v50 = vpop.permute.xlu1 %5738  ;;  %v5733_v48 = vpop.permute.xlu0 %5732 }
 0x53e   : > { %v5740_v7 = vunpack.i.l.bf16 %v5739_v50  ;;  %v5734_v18 = vunpack.i.l.bf16 %v5733_v48  ;;  %v1490_v28 = vpop.permute.xlu2 %1489  ;;  %v5735_v55 = vunpack.i.h.bf16 %v5733_v48  ;;  %v5741_v33 = vunpack.i.h.bf16 %v5739_v50 }
 0x53f   : > { %v1569_v6 = vmul.f32 %v6851_v51, %v1490_v28  ;;  %v1570_v4 = vmul.f32 %v6853_v35, %v1490_v28 }
 0x540   : > { %v5162_v46 = vsel %vm3514_vm2, %v5160_v59, %v5734_v18 }
 0x541   : > { %v1633_v20 = vadd.f32 %v1569_v6, %v1370_v62  ;;  %v1634_v3 = vadd.f32 %v1570_v4, %v1371_v11  ;;  %v5165_v31 = vsel %vm5164_vm13, %v5162_v46, %v5740_v7  ;;  %v9065_v62 = vld [vmem:[#allocation28_spill] sm:$0xff]  ;;  %v9066_v7 = vld [vmem:[#allocation95_spill] sm:$0xff] }
 0x542   : > { %v5168_v29 = vsel %vm5167_vm14, %v5165_v31, %v8546_v61  ;;  %v850_v11 = vmul.f32 %v9062_v15, %v9065_v62  ;;  %v1312_v48 = vmul.f32 %v6806_v38, %v9066_v7  ;;  %v851_v59 = vmul.f32 %v9034_v57, %v9065_v62  ;;  %v9068_v6 = vld [vmem:[#allocation48_spill] sm:$0xff]  ;;  %v9070_v62 = vld [vmem:[#allocation54_spill] sm:$0xff] }
 0x543   : > { %1697 = vst [vmem:[%s6873_s29 + $0x1a0] sm:$0xff] %v1633_v20  ;;  %v1037_v4 = vmul.f32 %v9026_v37, %v9068_v6  ;;  %v1313_v46 = vmul.f32 %v6808_v21, %v9066_v7 }
 0x544   : > { %1698 = vst [vmem:[%s6873_s29 + $0x1a8] sm:$0xff] %v1634_v3 }
 0x545   : > { %v5148_v53 = vpop.permute.xlu1 %5147  ;;  %v5013_v39 = vpop.permute.xlu0 %5012 }
 0x546   : > { %v5171_v45 = vsel %vm5170_vm15, %v5168_v29, %v5148_v53  ;;  %v5016_v60 = vmul.f32 %v5013_v39, %v8482_v56  ;;  %v1038_v29 = vmul.f32 %v9031_v8, %v9068_v6 }
 0x547   : > { %v3677_v16 = vpop.permute.xlu2 %3676  ;;  %5243 = vmatmul.f32.vlgmr.msrb.gmra.mxu0 %v5171_v45  ;;  %5289 = vmatmul.f32.vlgmr.msra.gmra.mxu2 %v5171_v45 }
 0x548   : > { %v5155_v23 = vsel %vm5153_vm10, %v5016_v60, %v5720_v52  ;;  %v3706_v25 = vadd.f32 %v8445_v30, %v3677_v16  ;;  %v3821_v61 = vadd.f32 %v8447_v10, %v3677_v16  ;;  %v1050_v30 = vmul.f32 %v9031_v8, %v9064_v22  ;;  %v5209_v60 = vld [vmem:[%s8763_s12] sm:$0xff] }
 0x549   : > { %v5158_v54 = vsel %vm5156_vm11, %v5155_v23, %v5725_v63  ;;  %v9069_v23 = vld [vmem:[#allocation77_spill] sm:$0xff]  ;;  %5213 = vperm.xlu2 %5751, %v5209_v60  }
 0x54a   : > { %v3729_v47 = vadd.f32 %v8416_v34, %v3706_v25  ;;  %v3844_v49 = vadd.f32 %v8470_v12, %v3821_v61  ;;  %v5161_v2 = vsel %vm5159_vm12, %v5158_v54, %v5730_v9  ;;  %v9067_v12 = vld [vmem:[#allocation22_spill] sm:$0xff]  ;;  %v1114_v39 = vadd.f32 %v1050_v30, %v851_v59 }
 0x54b   : > { %v5163_v10 = vsel %vm3514_vm2, %v5161_v2, %v5735_v55  ;;  %v838_v28 = vmul.f32 %v9062_v15, %v9067_v12  ;;  %v1301_v25 = vmul.f32 %v6808_v21, %v9069_v23  ;;  %v1042_v30 = vmul.f32 %v9031_v8, %v9070_v62  ;;  %v9072_v59 = vld [vmem:[#allocation90_spill] sm:$0xff] }
 0x54c   : > { %v3752_v18 = vadd.f32 %v8472_v36, %v3729_v47  ;;  %v3867_v50 = vadd.f32 %v8476_v32, %v3844_v49  ;;  %v5166_v34 = vsel %vm5164_vm13, %v5163_v10, %v5741_v33  ;;  %v1113_v36 = vadd.f32 %v1049_v0, %v850_v11 }
 0x54d   : > { %v5142_v20 = vpop.permute.xlu1 %5141  ;;  %v1101_v0 = vadd.f32 %v1037_v4, %v838_v28  ;;  %v1041_v11 = vmul.f32 %v9026_v37, %v9070_v62  ;;  %v1304_v6 = vmul.f32 %v6806_v38, %v9072_v59  ;;  %v1305_v4 = vmul.f32 %v6808_v21, %v9072_v59 }
 0x54e   : > { %v3775_v32 = vadd.f32 %v8456_v17, %v3752_v18  ;;  %v3890_v3 = vadd.f32 %v8466_v5, %v3867_v50  ;;  %v5169_v31 = vsel %vm5167_vm14, %v5166_v34, %v5142_v20  ;;  %v5093_v53 = vpop.permute.xlu0 %5092  ;;  %v1376_v17 = vadd.f32 %v1312_v48, %v1113_v36  ;;  %v9071_v34 = vld [vmem:[#allocation33_spill] sm:$0xff]  ;;  %v9074_v36 = vld [vmem:[#allocation94_spill] sm:$0xff] }
 0x54f   : > { %v5096_v52 = vmul.f32 %v5093_v53, %v8482_v56  ;;  %v5172_v45 = vsel %vm5170_vm15, %v5169_v31, %v8553_v26  ;;  %v1377_v26 = vadd.f32 %v1313_v46, %v1114_v39  ;;  %v843_v28 = vmul.f32 %v9034_v57, %v9071_v34  ;;  %v9073_v46 = vld [vmem:[#allocation93_spill] sm:$0xff] }
 0x550   : > { %v3798_v5 = vadd.f32 %v8458_v44, %v3775_v32  ;;  %v3913_v63 = vadd.f32 %v8460_v13, %v3890_v3  ;;  %v1502_v56 = vpop.permute.xlu2 %1501  ;;  %5246 = vmatmul.f32.gmra.mxu0 %v5172_v45  ;;  %5292 = vmatmul.f32.gmra.mxu2 %v5172_v45  ;;  %v839_v44 = vmul.f32 %v9034_v57, %v9067_v12  ;;  %v9075_v3 = vld [vmem:[#allocation98_spill] sm:$0xff] }
 0x551   : > { %v1575_v16 = vmul.f32 %v6851_v51, %v1502_v56  ;;  %v1576_v9 = vmul.f32 %v6853_v35, %v1502_v56  ;;  %5573 = vmatmul.msk.f32.gmra.mxu1 %vm5153_vm10, %v5096_v52  ;;  %5575 = vmatmul.msk.f32.gmra.mxu3 %vm5153_vm10, %v5096_v52  ;;  %v1300_v13 = vmul.f32 %v6806_v38, %v9069_v23 }
 0x552   : > { %3917 = vst [vmem:[%s8645_s16 + $0x10] sm:$0xff] %v3798_v5  ;;  %v1102_v55 = vadd.f32 %v1038_v29, %v839_v44  ;;  %v842_v12 = vmul.f32 %v9062_v15, %v9071_v34  ;;  %v1314_v31 = vmul.f32 %v6806_v38, %v9075_v3  ;;  %v1315_v53 = vmul.f32 %v6808_v21, %v9075_v3  ;;  %v9083_v3 = vld [vmem:[#allocation97_spill] sm:$0xff] }
 0x553   : > { %v1639_v61 = vadd.f32 %v1575_v16, %v1376_v17  ;;  %v1640_v22 = vadd.f32 %v1576_v9, %v1377_v26  ;;  %3918 = vst [vmem:[%s8645_s16 + $0x18] sm:$0xff] %v3913_v63  ;;  %v1364_v33 = vadd.f32 %v1300_v13, %v1101_v0  ;;  %v1106_v39 = vadd.f32 %v1042_v30, %v843_v28  ;;  %v9076_v63 = vld [vmem:[#allocation91_spill] sm:$0xff]  ;;  %v9077_v26 = vld [vmem:[#allocation92_spill] sm:$0xff] }
 0x554   : > { %v1365_v47 = vadd.f32 %v1301_v25, %v1102_v55  ;;  %v1105_v29 = vadd.f32 %v1041_v11, %v842_v12  ;;  %v1378_v56 = vadd.f32 %v1314_v31, %v9076_v63  ;;  %v1379_v16 = vadd.f32 %v1315_v53, %v9077_v26 }
 0x555   : > { %1703 = vst [vmem:[%s6873_s29 + $0x1d0] sm:$0xff] %v1639_v61  ;;  %v1478_v54 = vpop.permute.xlu1 %1477  ;;  %v1369_v60 = vadd.f32 %v1305_v4, %v1106_v39  ;;  %v1316_v31 = vmul.f32 %v6806_v38, %v9083_v3 }
 0x556   : > { %1704 = vst [vmem:[%s6873_s29 + $0x1d8] sm:$0xff] %v1640_v22  ;;  %v1563_v49 = vmul.f32 %v6851_v51, %v1478_v54  ;;  %v1564_v2 = vmul.f32 %v6853_v35, %v1478_v54  ;;  %v1368_v45 = vadd.f32 %v1304_v6, %v1105_v29 }
 0x557   : > { %v1494_v10 = vpop.permute.xlu0 %1493 }
 0x558   : > { %v1627_v7 = vadd.f32 %v1563_v49, %v1364_v33  ;;  %v1628_v48 = vadd.f32 %v1564_v2, %v1365_v47  ;;  %v1571_v18 = vmul.f32 %v6851_v51, %v1494_v10  ;;  %v1572_v50 = vmul.f32 %v6853_v35, %v1494_v10  ;;  %v9078_v49 = vld [vmem:[#allocation56_spill] sm:$0xff]  ;;  %v9079_v10 = vld [vmem:[#allocation35_spill] sm:$0xff] }
 0x559   : > { %v1047_v2 = vmul.f32 %v9026_v37, %v9078_v49  ;;  %v1048_v62 = vmul.f32 %v9031_v8, %v9078_v49 }
 0x55a   : > { %1691 = vst [vmem:[%s6873_s29 + $0x170] sm:$0xff] %v1627_v7  ;;  %v1635_v20 = vadd.f32 %v1571_v18, %v9073_v46  ;;  %v1636_v32 = vadd.f32 %v1572_v50, %v9074_v36 }
 0x55b   : > { %1692 = vst [vmem:[%s6873_s29 + $0x178] sm:$0xff] %v1628_v48 }
 0x55c   : > { %1699 = vst [vmem:[%s6873_s29 + $0x1b0] sm:$0xff] %v1635_v20 }
 0x55d   : > { %1700 = vst [vmem:[%s6873_s29 + $0x1b8] sm:$0xff] %v1636_v32  ;;  %v1486_v52 = vpop.permute.xlu1 %1485 }
 0x55e   : > { %v1567_v17 = vmul.f32 %v6851_v51, %v1486_v52  ;;  %v1568_v5 = vmul.f32 %v6853_v35, %v1486_v52 }
 0x55f   : > { %v1506_v9 = vpop.permute.xlu0 %1505 }
 0x560   : > { %v1631_v44 = vadd.f32 %v1567_v17, %v1368_v45  ;;  %v1632_v23 = vadd.f32 %v1568_v5, %v1369_v60  ;;  %v1577_v13 = vmul.f32 %v6851_v51, %v1506_v9  ;;  %v1578_v25 = vmul.f32 %v6853_v35, %v1506_v9 }
 0x562   : > { %1695 = vst [vmem:[%s6873_s29 + $0x190] sm:$0xff] %v1631_v44  ;;  %v1641_v61 = vadd.f32 %v1577_v13, %v1378_v56  ;;  %v1642_v22 = vadd.f32 %v1578_v25, %v1379_v16 }
 0x563   : > { %1696 = vst [vmem:[%s6873_s29 + $0x198] sm:$0xff] %v1632_v23 }
 0x564   : > { %1705 = vst [vmem:[%s6873_s29 + $0x1e0] sm:$0xff] %v1641_v61 }
 0x565   : > { %1706 = vst [vmem:[%s6873_s29 + $0x1e8] sm:$0xff] %v1642_v22 }
 0x566   : > { %v3672_v0 = vpop.permute.xlu1 %3671 }
 0x567   : > { %v3703_v55 = vadd.f32 %v8433_v1, %v3672_v0  ;;  %v3818_v54 = vadd.f32 %v8440_v24, %v3672_v0  ;;  %v848_v1 = vmul.f32 %v9062_v15, %v9079_v10  ;;  %v849_v24 = vmul.f32 %v9034_v57, %v9079_v10 }
 0x569   : > { %v3726_v33 = vadd.f32 %v8396_v14, %v3703_v55  ;;  %v3841_v47 = vadd.f32 %v8464_v41, %v3818_v54  ;;  %v9080_v14 = vld [vmem:[#allocation96_spill] sm:$0xff]  ;;  %v1111_v18 = vadd.f32 %v1047_v2, %v848_v1 }
 0x56a   : > { %v1310_v41 = vmul.f32 %v6806_v38, %v9080_v14  ;;  %v1311_v7 = vmul.f32 %v6808_v21, %v9080_v14 }
 0x56b   : > { %v3749_v11 = vadd.f32 %v8468_v43, %v3726_v33  ;;  %v3864_v30 = vadd.f32 %v8474_v40, %v3841_v47  ;;  %v1112_v40 = vadd.f32 %v1048_v62, %v849_v24 }
 0x56c   : > { %v1374_v28 = vadd.f32 %v1310_v41, %v1111_v18 }
 0x56d   : > { %v3772_v48 = vadd.f32 %v8449_v58, %v3749_v11  ;;  %v3887_v43 = vadd.f32 %v8462_v42, %v3864_v30  ;;  %v1375_v59 = vadd.f32 %v1311_v7, %v1112_v40  ;;  %v9081_v58 = vld [vmem:[#allocation58_spill] sm:$0xff] }
 0x56e   : > { %v1053_v46 = vmul.f32 %v9026_v37, %v9081_v58  ;;  %v1054_v42 = vmul.f32 %v9031_v8, %v9081_v58  ;;  %v1317_v37 = vmul.f32 %v6808_v21, %v9083_v3 }
 0x56f   : > { %v3795_v50 = vadd.f32 %v8452_v19, %v3772_v48  ;;  %v3910_v34 = vadd.f32 %v8454_v27, %v3887_v43  ;;  %v1498_v12 = vpop.permute.xlu1 %1497  ;;  %v9082_v27 = vld [vmem:[#allocation37_spill] sm:$0xff] }
 0x570   : > { %v1573_v6 = vmul.f32 %v6851_v51, %v1498_v12  ;;  %v1574_v4 = vmul.f32 %v6853_v35, %v1498_v12  ;;  %v854_v36 = vmul.f32 %v9062_v15, %v9082_v27  ;;  %v855_v32 = vmul.f32 %v9034_v57, %v9082_v27 }
 0x571   : > { %3915 = vst [vmem:[%s8645_s16] sm:$0xff] %v3795_v50 }
 0x572   : > { %v1637_v20 = vadd.f32 %v1573_v6, %v1374_v28  ;;  %v1638_v19 = vadd.f32 %v1574_v4, %v1375_v59  ;;  %3916 = vst [vmem:[%s8645_s16 + $0x8] sm:$0xff] %v3910_v34  ;;  %v1117_v8 = vadd.f32 %v1053_v46, %v854_v36  ;;  %v1118_v53 = vadd.f32 %v1054_v42, %v855_v32 }
 0x574   : > { %1701 = vst [vmem:[%s6873_s29 + $0x1c0] sm:$0xff] %v1637_v20  ;;  %v1380_v39 = vadd.f32 %v1316_v31, %v1117_v8  ;;  %v1381_v52 = vadd.f32 %v1317_v37, %v1118_v53 }
 0x575   : > { %1702 = vst [vmem:[%s6873_s29 + $0x1c8] sm:$0xff] %v1638_v19 }
 0x577   : > { %v1510_v29 = vpop.permute.xlu1 %1509 }
 0x578   : > { %v1579_v15 = vmul.f32 %v6851_v51, %v1510_v29  ;;  %v1580_v45 = vmul.f32 %v6853_v35, %v1510_v29 }
 0x579   : > { %v5219_v51 = vpop.permute.xlu0 %5218 }
 0x57a   : > { %v1643_v60 = vadd.f32 %v1579_v15, %v1380_v39  ;;  %v1644_v57 = vadd.f32 %v1580_v45, %v1381_v52 }
 0x57c   : > { %1707 = vst [vmem:[%s6873_s29 + $0x1f0] sm:$0xff] %v1643_v60 }
 0x57d   : > { %1708 = vst [vmem:[%s6873_s29 + $0x1f8] sm:$0xff] %v1644_v57 }
 0x5a3   : > { %v5214_v38 = vpop.permute.xlu2 %5213 }
 0x5a6   : > { %v5267_v21 = vpop.f32.mrf.mxu1 }
 0x5ac   : > { %v5313_v16 = vpop.f32.mrf.mxu3 }
 0x5c4   : > { %v5244_v17 = vpop.f32.mrf.mxu0 }
 0x5c5   : > { %v5245_v5 = vadd.f32 %v5244_v17, %v5214_v38 }
 0x5c7   : > { %v5268_v63 = vadd.f32 %v5267_v21, %v5245_v5 }
 0x5c9   : > { %5319 = vst [vmem:[%s593_s20] sm:$0xff] %v5268_v63 }
 0x5ca   : > { %v5290_v56 = vpop.f32.mrf.mxu2 }
 0x5cb   : > { %v5291_v26 = vadd.f32 %v5290_v56, %v5214_v38 }
 0x5cd   : > { %v5314_v35 = vadd.f32 %v5313_v16, %v5291_v26  ;;  %v5247_v9 = vpop.f32.mrf.mxu0 }
 0x5ce   : > { %v5248_v44 = vadd.f32 %v5247_v9, %v5219_v51  ;;  %v5270_v23 = vpop.f32.mrf.mxu1 }
 0x5cf   : > { %5320 = vst [vmem:[%s593_s20 + $0x8] sm:$0xff] %v5314_v35 }
 0x5d0   : > { %v5271_v13 = vadd.f32 %v5270_v23, %v5248_v44 }
 0x5d2   : > { %5321 = vst [vmem:[%s593_s20 + $0x10] sm:$0xff] %v5271_v13 }
 0x5d3   : > { %v5293_v25 = vpop.f32.mrf.mxu2 }
 0x5d4   : > { %v5294_v61 = vadd.f32 %v5293_v25, %v5219_v51  ;;  %v5316_v22 = vpop.f32.mrf.mxu3 }
 0x5d6   : > { %v5317_v0 = vadd.f32 %v5316_v22, %v5294_v61 }
 0x5d8   : > { %5322 = vst [vmem:[%s593_s20 + $0x18] sm:$0xff] %v5317_v0 }
 0x5d9 PF: > { %s28_s18 = sadd.s32 1, %s5858_s18  }
 0x5da   : > { %p25_p7 = scmp.ge.s32.totalorder %s28_s18, 4  }
 0x5dc   :  { %27 = sbr.rel (!%p25_p7) target bundleno = 2 (0x2), region = 186 }
 0x5e1   :  { %5376 = vsyncpa [#allocation5], 1 }
 0x5e2   :  { %5378 = vsyncpa [#allocation5 + $0x1], 1 }
 0x5e3   :  { %5379 = vsyncpa [#allocation7], 1 }

</bundles_post_ra>
